<compile_context>
chip_gen: v6e
topology: v6e:2x2x1
jax: 0.10.0
libtpu: 0.0.40
codegen_flags: <defaults>
</compile_context>

<pallas_src>
import functools

import numpy as np
import jax
import jax.numpy as jnp
from jax.experimental import pallas as pl
from jax.experimental.pallas import tpu as pltpu

F32_MIN = float(np.finfo(np.float32).min)


def _neighbor_attention_kernel(hv_ref, he_ref, aux_ref,
                               wq_ref, wf_ref, wo_ref, ssum_ref,
                               out_ref, *, inv_sqrt_d):
    # Block shapes (per grid step, Bt = batch_tile, NK = N*K, all tile-aligned):
    #   hv_ref   [Bt, N, H]       node features                    (bf16)
    #   he_ref   [Bt, NK, C_in]   neighbor features                (bf16)
    #   aux_ref  [Bt, NK, 2H]     [latent bias | mask], H-wide     (f32)
    #   wq_ref   [H, H]           W_Q^T                            (bf16)
    #   wf_ref   [C_in, 3H]       [W_K | W_V | W_b head-expanded]  (bf16)
    #   wo_ref   [H, H]           W_O^T                            (bf16)
    #   ssum_ref [H, H]           block-diag per-head segment sum  (bf16, 0/1)
    #   out_ref  [Bt, N, H]                                        (f32)
    Bt, N, H = hv_ref.shape
    NK, C_in = he_ref.shape[1], he_ref.shape[2]
    K = NK // N
    Ntot = Bt * N
    M = Bt * NK

    # Leading-dim merges are free: N and K are multiples of 8 (wrapper pads).
    hv = hv_ref[...].reshape(Ntot, H)
    he = he_ref[...].reshape(M, C_in)
    aux = aux_ref[...].reshape(M, 2 * H)
    bias_l = aux[:, :H]          # latent bias, replicated over nodes & head lanes
    mask_b = aux[:, H:]          # attention mask, replicated over head lanes

    # ---- fused projections (bf16 MXU, f32 accumulate) ----
    q = jnp.dot(hv, wq_ref[...], preferred_element_type=jnp.float32)       # [Ntot, H]
    kvb = jnp.dot(he, wf_ref[...], preferred_element_type=jnp.float32)     # [M, 3H]
    kp = kvb[:, :H]                                                         # [M, H]
    vp = kvb[:, H:2 * H]                                                    # [M, H]
    bias_e = kvb[:, 2 * H:]                                                 # [M, H] (head-expanded)

    # ---- H-wide attention logits ----
    # Replicate q over the K neighbors of each node via a sublane broadcast
    # (no selector matmul), then per-head segment-sum with the block-diagonal
    # 0/1 matrix Ssum so every lane of head h carries that head's logit.
    qk_prod = kp.reshape(Ntot, K, H) * q.reshape(Ntot, 1, H)                # [Ntot, K, H]
    qkH = jnp.dot(qk_prod.reshape(M, H).astype(jnp.bfloat16), ssum_ref[...],
                  preferred_element_type=jnp.float32)                       # [M, H]
    logits = qkH * inv_sqrt_d + bias_e + bias_l                             # [M, H]
    masked = jnp.where(mask_b > 0, logits, jnp.float32(F32_MIN))

    # ---- masked softmax over the K neighbors (per-node max on sublanes) ----
    m3 = masked.reshape(Ntot, K, H)
    node_max = jnp.max(m3, axis=1, keepdims=True)                           # [Ntot, 1, H]
    e3 = jnp.exp(m3 - node_max)
    denom = jnp.sum(e3, axis=1, keepdims=True)                              # [Ntot, 1, H]
    attend = e3 * pl.reciprocal(jnp.maximum(denom, 1e-30), approx=True)
    attend = attend.reshape(M, H) * mask_b                                  # exact zeros on masked

    # ---- attention-weighted V, per-node reduction, output projection ----
    weighted = attend * vp                                                  # [M, H]
    h_upd = jnp.sum(weighted.reshape(Ntot, K, H), axis=1)                   # [Ntot, H]
    out = jnp.dot(h_upd.astype(wo_ref.dtype), wo_ref[...],
                  preferred_element_type=jnp.float32)                       # [Ntot, H]
    # TODO(synk): output stays (Bt, N, H) f32; a lane-dense (Bt, N*H) slab
    # would need an in-kernel lane<->sublane relayout copy, so it is skipped.
    out_ref[...] = out.reshape(Bt, N, H).astype(out_ref.dtype)


def _has_two_tensorcores():
    """Heuristic: does this device shard a 'parallel' grid over 2 TensorCores?"""
    try:
        kind = jax.devices()[0].device_kind.lower()
    except Exception:
        return True
    return ("v7" in kind) or ("v4" in kind) or ("megacore" in kind)


def _pick_batch_tile(B, per_batch_block_bytes, per_batch_scratch_bytes, multicore):
    """Largest divisor of B whose (double-buffered) blocks fit a conservative
    VMEM budget; if the chip has 2 TensorCores, keep the grid length >= 2."""
    budget = 32 * 1024 * 1024   # conservative: v7x has only 64 MiB physical VMEM
    best = 1
    for t in range(1, B + 1):
        if B % t:
            continue
        need = 2 * t * per_batch_block_bytes + t * per_batch_scratch_bytes
        if need > budget:
            continue
        if multicore and B >= 2 and B // t < 2:
            continue
        best = t
    return best


def neighbor_attention(z, h_V, h_E, mask_attend, params, num_heads=4,
                       batch_tile=None, multicore=None,
                       compute_dtype=jnp.bfloat16):
    B, N, K, C_in = h_E.shape
    H = h_V.shape[-1]
    heads = num_heads
    assert H % heads == 0
    d = H // heads
    inv_sqrt_d = 1.0 / float(np.sqrt(d))

    # Shape sanity for the hard-coded 33-column edge-feature offset of W_b.
    assert C_in > 33 and params["W_b"].shape == (C_in - 33, heads)
    assert params["W_z"].shape[-1] == K * heads

    # ---- pad K and N up to multiples of 8 (dummy neighbors/nodes, mask=0) ----
    Kp = -(-K // 8) * 8
    Np = -(-N // 8) * 8
    NK = Np * Kp

    mask = mask_attend if mask_attend is not None else jnp.ones((B, N, K), jnp.float32)
    mask = mask.astype(jnp.float32)
    h_V_p, h_E_p = h_V, h_E
    if (Kp, Np) != (K, N):
        h_V_p = jnp.pad(h_V, ((0, 0), (0, Np - N), (0, 0)))
        h_E_p = jnp.pad(h_E, ((0, 0), (0, Np - N), (0, Kp - K), (0, 0)))
        mask = jnp.pad(mask, ((0, 0), (0, Np - N), (0, Kp - K)))

    # ---- weight prep (grid-invariant, done once) ----
    # W_b: replicate each head column d times (H-wide), zero-pad rows 0..32 so
    # the edge bias comes out of the same he @ W matmul as K and V.
    wb_rep = jnp.zeros((C_in, H), jnp.float32).at[33:, :].set(
        jnp.repeat(params["W_b"], d, axis=1))
    w_fused = jnp.concatenate([params["W_K"], params["W_V"], wb_rep],
                              axis=1).astype(compute_dtype)                 # [C_in, 3H]
    w_q = params["W_Q"].astype(compute_dtype)
    w_o = params["W_O"].astype(compute_dtype)

    # Block-diagonal per-head segment-sum selector Ssum = S @ S^T (0/1, bf16-exact).
    ssum_np = (np.arange(H)[:, None] // d == np.arange(H)[None, :] // d).astype(np.float32)
    ssum = jnp.asarray(ssum_np, dtype=compute_dtype)                        # [H, H]

    # ---- lane-dense aux tensor: [latent bias | mask], both head-expanded ----
    bias_latent = (z @ params["W_z"]).reshape(B, 1, K, heads)
    if Kp != K:
        bias_latent = jnp.pad(bias_latent, ((0, 0), (0, 0), (0, Kp - K), (0, 0)))
    bias_latent = jnp.repeat(bias_latent, d, axis=-1)                       # [B,1,Kp,H]
    bias_rep = jnp.broadcast_to(bias_latent, (B, Np, Kp, H)).reshape(B, NK, H)
    mask_rep = jnp.broadcast_to(mask[..., None], (B, Np, Kp, H)).reshape(B, NK, H)
    aux = jnp.concatenate([bias_rep, mask_rep], axis=-1).astype(jnp.float32)  # [B,NK,2H]

    hv_c = h_V_p.astype(compute_dtype)
    he_c = h_E_p.reshape(B, NK, C_in).astype(compute_dtype)

    # ---- batch-tile sizing (VMEM-budget + TensorCore-count aware) ----
    if multicore is None:
        multicore = _has_two_tensorcores()
    per_batch_block_bytes = (Np * H * 2) + (NK * C_in * 2) + (NK * 2 * H * 4) + (Np * H * 4)
    per_batch_scratch_bytes = NK * 12 * H * 4   # rough bound on f32 intermediates
    if batch_tile is None:
        batch_tile = _pick_batch_tile(B, per_batch_block_bytes,
                                      per_batch_scratch_bytes, multicore)
    assert B % batch_tile == 0

    kernel = functools.partial(_neighbor_attention_kernel, inv_sqrt_d=inv_sqrt_d)

    flops = 2 * B * (Np * H * H + NK * C_in * 3 * H + NK * H * H + Np * H * H)
    transcendentals = B * NK * H
    bytes_accessed = (hv_c.size * 2 + he_c.size * 2 + aux.size * 4 + B * Np * H * 4
                      + w_q.size * 2 + w_fused.size * 2 + w_o.size * 2 + ssum.size * 2)

    out = pl.pallas_call(
        kernel,
        out_shape=jax.ShapeDtypeStruct((B, Np, H), jnp.float32),
        grid=(B // batch_tile,),
        in_specs=[
            pl.BlockSpec((batch_tile, Np, H), lambda b: (b, 0, 0)),         # h_V
            pl.BlockSpec((batch_tile, NK, C_in), lambda b: (b, 0, 0)),      # h_E (flat)
            pl.BlockSpec((batch_tile, NK, 2 * H), lambda b: (b, 0, 0)),     # aux
            pl.BlockSpec((H, H), lambda b: (0, 0)),                         # W_Q^T
            pl.BlockSpec((C_in, 3 * H), lambda b: (0, 0)),                  # fused W
            pl.BlockSpec((H, H), lambda b: (0, 0)),                         # W_O^T
            pl.BlockSpec((H, H), lambda b: (0, 0)),                         # Ssum
        ],
        out_specs=pl.BlockSpec((batch_tile, Np, H), lambda b: (b, 0, 0)),
        compiler_params=pltpu.CompilerParams(
            dimension_semantics=("parallel",),
            vmem_limit_bytes=48 * 1024 * 1024),
        cost_estimate=pl.CostEstimate(flops=int(flops),
                                      transcendentals=int(transcendentals),
                                      bytes_accessed=int(bytes_accessed)),
    )(hv_c, he_c, aux, w_q, w_fused, w_o, ssum)

    if Np != N:
        out = out[:, :N, :]
    return out


def neighbor_attention_ref(z, h_V, h_E, mask_attend, params, num_heads=4):
    """Pure-JAX (f32) reference mirroring the PyTorch forward."""
    B, N, K, C = h_E.shape
    H = h_V.shape[-1]
    d = H // num_heads
    Q = h_V @ params["W_Q"]
    Kp = h_E @ params["W_K"]
    Vp = h_E @ params["W_V"]
    bl = (z @ params["W_z"]).reshape(B, 1, K, num_heads)
    be = h_E[..., 33:] @ params["W_b"]
    Qh = Q.reshape(B, N, num_heads, d)
    Kh = Kp.reshape(B, N, K, num_heads, d)
    logits = jnp.einsum("bnhd,bnkhd->bnkh", Qh, Kh) / np.sqrt(d) + bl + be
    if mask_attend is None:
        attend = jax.nn.softmax(logits, axis=2)
    else:
        m4 = mask_attend[:, :, :, None]
        masked = jnp.where(m4 > 0, logits, jnp.float32(F32_MIN))
        attend = jax.nn.softmax(masked, axis=2) * m4
    Vh = Vp.reshape(B, N, K, num_heads, d)
    upd = jnp.einsum("bnkh,bnkhd->bnhd", attend, Vh).reshape(B, N, H)
    return upd @ params["W_O"]


def init_params(key, num_hidden, num_in, num_latent, n_neighbors, num_heads=4):
    ks = jax.random.split(key, 6)

    def lin(k, fan_in, fan_out):
        bound = 1.0 / np.sqrt(fan_in)
        # stored transposed [fan_in, fan_out] so x @ W matches torch Linear (no bias)
        return jax.random.uniform(k, (fan_in, fan_out), jnp.float32, -bound, bound)

    return {
        "W_Q": lin(ks[0], num_hidden, num_hidden),
        "W_K": lin(ks[1], num_in, num_hidden),
        "W_V": lin(ks[2], num_in, num_hidden),
        "W_O": lin(ks[3], num_hidden, num_hidden),
        "W_z": lin(ks[4], num_latent, n_neighbors * num_heads),
        "W_b": lin(ks[5], num_in - 33, num_heads),
    }


if __name__ == "__main__":
    key = jax.random.PRNGKey(0)

    # ---- test 1: aligned shapes, explicit mask ----
    B, N, K, heads = 4, 16, 8, 4
    num_hidden, num_latent, num_in = 32, 16, 64   # num_in > 33 (edge-bias slice)
    k1, k2, k3, k4, kp, key = jax.random.split(key, 6)
    z = jax.random.normal(k1, (B, num_latent), jnp.float32)
    h_V = jax.random.normal(k2, (B, N, num_hidden), jnp.float32)
    h_E = jax.random.normal(k3, (B, N, K, num_in), jnp.float32)
    mask = (jax.random.uniform(k4, (B, N, K)) > 0.2).astype(jnp.float32)
    params = init_params(kp, num_hidden, num_in, num_latent, K, heads)

    out = jax.block_until_ready(neighbor_attention(z, h_V, h_E, mask, params, num_heads=heads))
    ref = neighbor_attention_ref(z, h_V, h_E, mask, params, num_heads=heads)
    assert out.shape == (B, N, num_hidden)
    np.testing.assert_allclose(np.asarray(out), np.asarray(ref), rtol=5e-2, atol=5e-2)

    # ---- test 2: unaligned N/K (exercises the pad-to-8 path), no mask ----
    B2, N2, K2 = 3, 12, 6
    num_in2, num_latent2 = 40, 8
    k1, k2, k3, kp2, key = jax.random.split(key, 5)
    z2 = jax.random.normal(k1, (B2, num_latent2), jnp.float32)
    h_V2 = jax.random.normal(k2, (B2, N2, num_hidden), jnp.float32)
    h_E2 = jax.random.normal(k3, (B2, N2, K2, num_in2), jnp.float32)
    params2 = init_params(kp2, num_hidden, num_in2, num_latent2, K2, heads)

    out2 = jax.block_until_ready(neighbor_attention(z2, h_V2, h_E2, None, params2, num_heads=heads))
    ref2 = neighbor_attention_ref(z2, h_V2, h_E2, None, params2, num_heads=heads)
    assert out2.shape == (B2, N2, num_hidden)
    np.testing.assert_allclose(np.asarray(out2), np.asarray(ref2), rtol=5e-2, atol=5e-2)

    print("KERNEL_OK")
</pallas_src>

<mosaic_0001>
module attributes {stable_mosaic.version = 11 : i64} {
  func.func @_neighbor_attention_kernel(%arg0: i32, %arg1: memref<4x16x32xbf16, #tpu.memory_space<vmem>>, %arg2: memref<4x128x64xbf16, #tpu.memory_space<vmem>>, %arg3: memref<4x128x64xf32, #tpu.memory_space<vmem>>, %arg4: memref<32x32xbf16, #tpu.memory_space<vmem>>, %arg5: memref<64x96xbf16, #tpu.memory_space<vmem>>, %arg6: memref<32x32xbf16, #tpu.memory_space<vmem>>, %arg7: memref<32x32xbf16, #tpu.memory_space<vmem>>, %arg8: memref<4x16x32xf32, #tpu.memory_space<vmem>>) attributes {dimension_semantics = [#tpu.dimension_semantics<parallel>], iteration_bounds = array<i64: 1>, scalar_prefetch = 0 : i64, scratch_operands = 0 : i64, tpu.core_type = #tpu.core_type<tc>, window_params = [{transform_indices = @transform_0, window_bounds = array<i64: 4, 16, 32>}, {transform_indices = @transform_1, window_bounds = array<i64: 4, 128, 64>}, {transform_indices = @transform_2, window_bounds = array<i64: 4, 128, 64>}, {pipeline_mode = #tpu.pipeline_mode<synchronous>, transform_indices = @transform_3, window_bounds = array<i64: 32, 32>}, {pipeline_mode = #tpu.pipeline_mode<synchronous>, transform_indices = @transform_4, window_bounds = array<i64: 64, 96>}, {pipeline_mode = #tpu.pipeline_mode<synchronous>, transform_indices = @transform_5, window_bounds = array<i64: 32, 32>}, {pipeline_mode = #tpu.pipeline_mode<synchronous>, transform_indices = @transform_6, window_bounds = array<i64: 32, 32>}, {transform_indices = @transform_7, window_bounds = array<i64: 4, 16, 32>}]} {
    %c0 = arith.constant 0 : index
    %c0_0 = arith.constant 0 : index
    %c0_1 = arith.constant 0 : index
    %0 = vector.load %arg1[%c0, %c0_0, %c0_1] : memref<4x16x32xbf16, #tpu.memory_space<vmem>>, vector<4x16x32xbf16>
    %1 = vector.shape_cast %0 : vector<4x16x32xbf16> to vector<64x32xbf16>
    %c0_2 = arith.constant 0 : index
    %c0_3 = arith.constant 0 : index
    %c0_4 = arith.constant 0 : index
    %2 = vector.load %arg2[%c0_2, %c0_3, %c0_4] : memref<4x128x64xbf16, #tpu.memory_space<vmem>>, vector<4x128x64xbf16>
    %3 = vector.shape_cast %2 : vector<4x128x64xbf16> to vector<512x64xbf16>
    %c0_5 = arith.constant 0 : index
    %c0_6 = arith.constant 0 : index
    %c0_7 = arith.constant 0 : index
    %4 = vector.load %arg3[%c0_5, %c0_6, %c0_7] : memref<4x128x64xf32, #tpu.memory_space<vmem>>, vector<4x128x64xf32>
    %5 = vector.shape_cast %4 : vector<4x128x64xf32> to vector<512x64xf32>
    %6 = vector.extract_strided_slice %5 {offsets = [0, 0], sizes = [512, 32], strides = [1, 1]} : vector<512x64xf32> to vector<512x32xf32>
    %7 = vector.extract_strided_slice %5 {offsets = [0, 32], sizes = [512, 32], strides = [1, 1]} : vector<512x64xf32> to vector<512x32xf32>
    %c0_8 = arith.constant 0 : index
    %c0_9 = arith.constant 0 : index
    %8 = vector.load %arg4[%c0_8, %c0_9] : memref<32x32xbf16, #tpu.memory_space<vmem>>, vector<32x32xbf16>
    %cst = arith.constant dense<0.000000e+00> : vector<64x32xf32>
    %9 = tpu.matmul %1, %8, %cst {dimension_numbers = #tpu.dot_dimension_numbers<[1], [0], [0], [1], [0, 0, 1, 1], [], []>} : vector<64x32xbf16>, vector<32x32xbf16>, vector<64x32xf32> -> vector<64x32xf32>
    %c0_10 = arith.constant 0 : index
    %c0_11 = arith.constant 0 : index
    %10 = vector.load %arg5[%c0_10, %c0_11] : memref<64x96xbf16, #tpu.memory_space<vmem>>, vector<64x96xbf16>
    %cst_12 = arith.constant dense<0.000000e+00> : vector<512x96xf32>
    %11 = tpu.matmul %3, %10, %cst_12 {dimension_numbers = #tpu.dot_dimension_numbers<[1], [0], [0], [1], [0, 0, 1, 1], [], []>} : vector<512x64xbf16>, vector<64x96xbf16>, vector<512x96xf32> -> vector<512x96xf32>
    %12 = vector.extract_strided_slice %11 {offsets = [0, 0], sizes = [512, 32], strides = [1, 1]} : vector<512x96xf32> to vector<512x32xf32>
    %13 = vector.extract_strided_slice %11 {offsets = [0, 32], sizes = [512, 32], strides = [1, 1]} : vector<512x96xf32> to vector<512x32xf32>
    %14 = vector.extract_strided_slice %11 {offsets = [0, 64], sizes = [512, 32], strides = [1, 1]} : vector<512x96xf32> to vector<512x32xf32>
    %15 = vector.shape_cast %12 : vector<512x32xf32> to vector<64x8x32xf32>
    %16 = vector.shape_cast %9 : vector<64x32xf32> to vector<64x1x32xf32>
    %17 = vector.broadcast %16 : vector<64x1x32xf32> to vector<64x8x32xf32>
    %18 = arith.mulf %15, %17 : vector<64x8x32xf32>
    %19 = vector.shape_cast %18 : vector<64x8x32xf32> to vector<512x32xf32>
    %20 = arith.truncf %19 : vector<512x32xf32> to vector<512x32xbf16>
    %c0_13 = arith.constant 0 : index
    %c0_14 = arith.constant 0 : index
    %21 = vector.load %arg7[%c0_13, %c0_14] : memref<32x32xbf16, #tpu.memory_space<vmem>>, vector<32x32xbf16>
    %cst_15 = arith.constant dense<0.000000e+00> : vector<512x32xf32>
    %22 = tpu.matmul %20, %21, %cst_15 {dimension_numbers = #tpu.dot_dimension_numbers<[1], [0], [0], [1], [0, 0, 1, 1], [], []>} : vector<512x32xbf16>, vector<32x32xbf16>, vector<512x32xf32> -> vector<512x32xf32>
    %cst_16 = arith.constant 0.353553385 : f32
    %23 = vector.broadcast %cst_16 : f32 to vector<512x32xf32>
    %24 = arith.mulf %22, %23 : vector<512x32xf32>
    %25 = arith.addf %24, %14 : vector<512x32xf32>
    %26 = arith.addf %25, %6 : vector<512x32xf32>
    %cst_17 = arith.constant 0.000000e+00 : f32
    %27 = vector.broadcast %cst_17 : f32 to vector<512x32xf32>
    %28 = arith.cmpf ogt, %7, %27 : vector<512x32xf32>
    %cst_18 = arith.constant -3.40282347E+38 : f32
    %29 = vector.broadcast %cst_18 : f32 to vector<512x32xf32>
    %30 = arith.select %28, %26, %29 : vector<512x32xi1>, vector<512x32xf32>
    %31 = vector.shape_cast %30 : vector<512x32xf32> to vector<64x8x32xf32>
    %cst_19 = arith.constant dense<0xFF800000> : vector<64x32xf32>
    %32 = vector.multi_reduction <maximumf>, %31, %cst_19 [1] : vector<64x8x32xf32> to vector<64x32xf32>
    %33 = vector.shape_cast %32 : vector<64x32xf32> to vector<64x1x32xf32>
    %34 = vector.broadcast %33 : vector<64x1x32xf32> to vector<64x8x32xf32>
    %35 = arith.subf %31, %34 : vector<64x8x32xf32>
    %36 = math.exp %35 : vector<64x8x32xf32>
    %cst_20 = arith.constant dense<0.000000e+00> : vector<64x32xf32>
    %37 = vector.multi_reduction <add>, %36, %cst_20 [1] : vector<64x8x32xf32> to vector<64x32xf32>
    %38 = vector.shape_cast %37 : vector<64x32xf32> to vector<64x1x32xf32>
    %cst_21 = arith.constant 1.000000e-30 : f32
    %39 = vector.broadcast %cst_21 : f32 to vector<64x1x32xf32>
    %40 = arith.maximumf %38, %39 : vector<64x1x32xf32>
    %41 = tpu.reciprocal %40 {approx = true} : vector<64x1x32xf32> -> vector<64x1x32xf32>
    %42 = vector.broadcast %41 : vector<64x1x32xf32> to vector<64x8x32xf32>
    %43 = arith.mulf %36, %42 : vector<64x8x32xf32>
    %44 = vector.shape_cast %43 : vector<64x8x32xf32> to vector<512x32xf32>
    %45 = arith.mulf %44, %7 : vector<512x32xf32>
    %46 = arith.mulf %45, %13 : vector<512x32xf32>
    %47 = vector.shape_cast %46 : vector<512x32xf32> to vector<64x8x32xf32>
    %cst_22 = arith.constant dense<0.000000e+00> : vector<64x32xf32>
    %48 = vector.multi_reduction <add>, %47, %cst_22 [1] : vector<64x8x32xf32> to vector<64x32xf32>
    %49 = arith.truncf %48 : vector<64x32xf32> to vector<64x32xbf16>
    %c0_23 = arith.constant 0 : index
    %c0_24 = arith.constant 0 : index
    %50 = vector.load %arg6[%c0_23, %c0_24] : memref<32x32xbf16, #tpu.memory_space<vmem>>, vector<32x32xbf16>
    %cst_25 = arith.constant dense<0.000000e+00> : vector<64x32xf32>
    %51 = tpu.matmul %49, %50, %cst_25 {dimension_numbers = #tpu.dot_dimension_numbers<[1], [0], [0], [1], [0, 0, 1, 1], [], []>} : vector<64x32xbf16>, vector<32x32xbf16>, vector<64x32xf32> -> vector<64x32xf32>
    %52 = vector.shape_cast %51 : vector<64x32xf32> to vector<4x16x32xf32>
    %c0_26 = arith.constant 0 : index
    %c0_27 = arith.constant 0 : index
    %c0_28 = arith.constant 0 : index
    %53 = vector.load %arg8[%c0_26, %c0_27, %c0_28] : memref<4x16x32xf32, #tpu.memory_space<vmem>>, vector<4x16x32xf32>
    tpu.vector_store %arg8[%c0_26, %c0_27, %c0_28], %52 {strides = array<i32>} : memref<4x16x32xf32, #tpu.memory_space<vmem>>, vector<4x16x32xf32>,
    return
  }
  func.func @transform_0(%arg0: i32) -> (i32, i32, i32) {
    %c0_i32 = arith.constant 0 : i32
    %c0_i32_0 = arith.constant 0 : i32
    %c0_i32_1 = arith.constant 0 : i32
    return %arg0, %c0_i32, %c0_i32_0 : i32, i32, i32
  }
  func.func @transform_1(%arg0: i32) -> (i32, i32, i32) {
    %c0_i32 = arith.constant 0 : i32
    %c0_i32_0 = arith.constant 0 : i32
    %c0_i32_1 = arith.constant 0 : i32
    return %arg0, %c0_i32, %c0_i32_0 : i32, i32, i32
  }
  func.func @transform_2(%arg0: i32) -> (i32, i32, i32) {
    %c0_i32 = arith.constant 0 : i32
    %c0_i32_0 = arith.constant 0 : i32
    %c0_i32_1 = arith.constant 0 : i32
    return %arg0, %c0_i32, %c0_i32_0 : i32, i32, i32
  }
  func.func @transform_3(%arg0: i32) -> (i32, i32) {
    %c0_i32 = arith.constant 0 : i32
    %c0_i32_0 = arith.constant 0 : i32
    %c0_i32_1 = arith.constant 0 : i32
    return %c0_i32, %c0_i32_0 : i32, i32
  }
  func.func @transform_4(%arg0: i32) -> (i32, i32) {
    %c0_i32 = arith.constant 0 : i32
    %c0_i32_0 = arith.constant 0 : i32
    %c0_i32_1 = arith.constant 0 : i32
    return %c0_i32, %c0_i32_0 : i32, i32
  }
  func.func @transform_5(%arg0: i32) -> (i32, i32) {
    %c0_i32 = arith.constant 0 : i32
    %c0_i32_0 = arith.constant 0 : i32
    %c0_i32_1 = arith.constant 0 : i32
    return %c0_i32, %c0_i32_0 : i32, i32
  }
  func.func @transform_6(%arg0: i32) -> (i32, i32) {
    %c0_i32 = arith.constant 0 : i32
    %c0_i32_0 = arith.constant 0 : i32
    %c0_i32_1 = arith.constant 0 : i32
    return %c0_i32, %c0_i32_0 : i32, i32
  }
  func.func @transform_7(%arg0: i32) -> (i32, i32, i32) {
    %c0_i32 = arith.constant 0 : i32
    %c0_i32_0 = arith.constant 0 : i32
    %c0_i32_1 = arith.constant 0 : i32
    return %arg0, %c0_i32, %c0_i32_0 : i32, i32, i32
  }
}

</mosaic_0001>

<bundles_post_ra>
// kernel: tpu_custom_call.1
= control target key start
LH: loop header
LB: loop body
LE: loop exit
PB: predicated region body
PF: predicated region fallthrough
CT: control target
= control target key end

     0   :  { %vm200_vm0 = vcmask 261120   ;;  %vm470_vm1 = vcmask 523264   ;;  %s9081_s0 = inlined_call_operand.vmem [shape: bf16[4,16,32], index: 0, kind: input, shape index: {}]   ;;  %s9082_s1 = inlined_call_operand.vmem [shape: bf16[4,128,64], index: 1, kind: input, shape index: {}]   ;;  %s9083_s2 = inlined_call_operand.vmem [shape: f32[4,128,64], index: 2, kind: input, shape index: {}]   ;;  %s9084_s3 = inlined_call_operand.vmem [shape: bf16[32,32], index: 3, kind: input, shape index: {}]   ;;  %s9085_s4 = inlined_call_operand.vmem [shape: bf16[64,96], index: 4, kind: input, shape index: {}]   ;;  %s9086_s5 = inlined_call_operand.vmem [shape: bf16[32,32], index: 5, kind: input, shape index: {}]   ;;  %s9087_s6 = inlined_call_operand.vmem [shape: bf16[32,32], index: 6, kind: input, shape index: {}]   ;;  %s9088_s7 = inlined_call_operand.hbm [shape: f32[4,16,32], index: 7, kind: output, shape index: {}]  }
   0x1   :  { %v5517_v0 = vld [vmem:[%s9084_s3 + $0x8] sm:$0xff]   ;;  %v5518_v1 = vld [vmem:[%s9085_s4 + $0x18] sm:$0xff]   ;;  %v5519_v2 = vld [vmem:[%s9084_s3] sm:$0xff]  }
   0x2   :  { %5346 = vmatprep.subr.bf16.mxu0 %v5517_v0  ;;  %5358 = vmatprep.subr.bf16.mxu1 %v5518_v1  ;;  %v5520_v3 = vld [vmem:[%s9085_s4 + $0x10] sm:$0xff]   ;;  %v5521_v4 = vld [vmem:[%s9081_s0] sm:$0xff]   ;;  %v5522_v5 = vld [vmem:[%s9081_s0 + $0x8] sm:$0xff]  }
   0x3   :  { %5347 = vmatpush3.bf16.msra.mxu0 %v5517_v0  ;;  %5359 = vmatpush3.bf16.msra.mxu1 %v5518_v1  ;;  %v5523_v6 = vld [vmem:[%s9085_s4 + $0x8] sm:$0xff]   ;;  %v5525_v7 = vld [vmem:[%s9082_s1] sm:$0xff]   ;;  %v5527_v10 = vld [vmem:[%s9082_s1 + $0x10] sm:$0xff]  }
   0x4   :  { %5348 = vmatprep.subr.bf16.mxu0 %v5519_v2  ;;  %5360 = vmatprep.subr.bf16.mxu1 %v5520_v3  ;;  %v5524_v8 = vld [vmem:[%s9085_s4] sm:$0xff]   ;;  %v5526_v9 = vld [vmem:[%s9082_s1 + $0x8] sm:$0xff]   ;;  %v5528_v11 = vld [vmem:[%s9082_s1 + $0x18] sm:$0xff]  }
   0x5   :  { %5350 = vmatprep.mubr.msk.bf16.mxu0 %vm200_vm0, %v5521_v4  ;;  %5366 = vmatprep.mubr.msk.bf16.mxu1 %vm470_vm1, %v5525_v7  ;;  %v5539_v12 = vld [vmem:[%s9081_s0 + $0x10] sm:$0xff]   ;;  %v5540_v13 = vld [vmem:[%s9081_s0 + $0x18] sm:$0xff]   ;;  %v5529_v14 = vld [vmem:[%s9082_s1 + $0x20] sm:$0xff]  }
   0x6   :  { %v5530_v15 = vld [vmem:[%s9082_s1 + $0x28] sm:$0xff]   ;;  %v5531_v16 = vld [vmem:[%s9082_s1 + $0x30] sm:$0xff]   ;;  %v5532_v17 = vld [vmem:[%s9082_s1 + $0x38] sm:$0xff]  }
   0x7   :  { %5349 = vmatpush3.bf16.msra.mxu0 %v5519_v2  ;;  %5361 = vmatpush3.bf16.msra.mxu1 %v5520_v3  ;;  %v5533_v18 = vld [vmem:[%s9082_s1 + $0x40] sm:$0xff]  }
   0x8   :  { %5362 = vmatprep.subr.bf16.mxu1 %v5523_v6 }
   0xa   :  { %5351 = vmatmul.mubr.msk.bf16.vlgmr.msra.gmra.mxu0 %vm200_vm0, %v5522_v5 }
   0xb   :  { %5363 = vmatpush3.bf16.msra.mxu1 %v5523_v6  ;;  %5354 = vmatprep.mubr.msk.bf16.mxu0 %vm200_vm0, %v5539_v12 }
   0xc   :  { %5364 = vmatprep.subr.bf16.mxu1 %v5524_v8 }
   0xf   :  { %5365 = vmatpush3.bf16.msra.mxu1 %v5524_v8 }
  0x12   :  { %5367 = vmatmul.mubr.msk.bf16.vlgmr.msra.gmra.mxu1 %vm470_vm1, %v5526_v9  ;;  %5355 = vmatmul.mubr.msk.bf16.gmra.mxu0 %vm200_vm0, %v5540_v13 }
  0x13   :  { %5370 = vmatprep.mubr.msk.bf16.mxu1 %vm470_vm1, %v5527_v10 }
  0x1a   :  { %5371 = vmatmul.mubr.msk.bf16.gmra.mxu1 %vm470_vm1, %v5528_v11 }
  0x1b   :  { %5374 = vmatprep.mubr.msk.bf16.mxu1 %vm470_vm1, %v5529_v14 }
  0x22   :  { %5375 = vmatmul.mubr.msk.bf16.gmra.mxu1 %vm470_vm1, %v5530_v15 }
  0x23   :  { %5378 = vmatprep.mubr.msk.bf16.mxu1 %vm470_vm1, %v5531_v16 }
  0x2a   :  { %5379 = vmatmul.mubr.msk.bf16.gmra.mxu1 %vm470_vm1, %v5532_v17 }
  0x2b   :  { %5382 = vmatprep.mubr.msk.bf16.mxu1 %vm470_vm1, %v5533_v18 }
  0x2c   :  { %12 = vsyncpa [#allocation3], 0  ;;  %v5534_v19 = vld [vmem:[%s9082_s1 + $0x48] sm:$0xff]   ;;  %v5535_v20 = vld [vmem:[%s9082_s1 + $0x50] sm:$0xff]   ;;  %v5905_v44 = vmov 1966171168   ;;  %v868_v46 = vlaneseq }
  0x2d   :  { %v5536_v21 = vld [vmem:[%s9082_s1 + $0x58] sm:$0xff]   ;;  %v5537_v22 = vld [vmem:[%s9082_s1 + $0x60] sm:$0xff]   ;;  %v5538_v23 = vld [vmem:[%s9082_s1 + $0x68] sm:$0xff]   ;;  %v866_v45 = vunpack.c.l.s4 %v5905_v44  ;;  %s5907_s13 = smov 32   ;;  %vm2905_vm3 = vcmask 523520   ;;  %s5909_s20 = smov [#allocation2]  }
  0x2e   :  { %v5541_v24 = vld [vmem:[%s9082_s1 + $0x70] sm:$0xff]   ;;  %v5542_v25 = vld [vmem:[%s9082_s1 + $0x78] sm:$0xff]   ;;  %v5543_v26 = vld [vmem:[%s9082_s1 + $0x80] sm:$0xff]   ;;  %v869_v48 = vshrl.u32 %v868_v46, 7  ;;  %s5135_s21 = sshll.u32 %s5909_s20, 4  ;;  %s5136_s21 = int_to_ptr.vmem [resolvable:$true] %s5135_s21 }
  0x2f   :  { %v5544_v27 = vld [vmem:[%s9082_s1 + $0x88] sm:$0xff]   ;;  %v5545_v28 = vld [vmem:[%s9082_s1 + $0x90] sm:$0xff]   ;;  %v5546_v30 = vld [vmem:[%s9082_s1 + $0x98] sm:$0xff]   ;;  %v867_v47 = vunpack.c.0.s8 %v866_v45  ;;  %s5883_s4 = scalar_lea.vmem %s5136_s21, 1024  ;;  %p5888_p1 = scmp.lt.s32.totalorder %s5136_s21, %s5136_s21 }
  0x30   :  { %v5559_v29 = vld [vmem:[%s9087_s6 + $0x8] sm:$0xff]   ;;  %v5547_v31 = vld [vmem:[%s9082_s1 + $0xa0] sm:$0xff]   ;;  %v5549_v34 = vld [vmem:[%s9082_s1 + $0xb0] sm:$0xff]   ;;  %v6130_v3 = vsub.s32 0, %v869_v48  ;;  %p5884_p0 = scmp.ne.s32.totalorder %s5136_s21, %s5883_s4  ;;  %p5889_p2 = scmp.lt.s32.totalorder %s5883_s4, %s5883_s4 }
  0x31   :  { %5430 = vmatprep.subr.bf16.mxu0 %v5559_v29  ;;  %v5560_v32 = vld [vmem:[%s9087_s6] sm:$0xff]   ;;  %v5548_v33 = vld [vmem:[%s9082_s1 + $0xa8] sm:$0xff]   ;;  %v5550_v35 = vld [vmem:[%s9082_s1 + $0xb8] sm:$0xff]   ;;  %v6120_v50 = vsub.s32 %v867_v47, %v869_v48 }
  0x32   :  { %5383 = vmatmul.mubr.msk.bf16.gmra.mxu1 %vm470_vm1, %v5534_v19  ;;  %5431 = vmatpush3.bf16.msra.mxu0 %v5559_v29  ;;  %v5551_v36 = vld [vmem:[%s9082_s1 + $0xc0] sm:$0xff]   ;;  %v5552_v37 = vld [vmem:[%s9082_s1 + $0xc8] sm:$0xff]   ;;  %v5553_v38 = vld [vmem:[%s9082_s1 + $0xd0] sm:$0xff]   ;;  %p5890_p3 = por %p5889_p2, %p5888_p1 }
  0x33   :  { %5386 = vmatprep.mubr.msk.bf16.mxu1 %vm470_vm1, %v5535_v20  ;;  %5432 = vmatprep.subr.bf16.mxu0 %v5560_v32  ;;  %v5554_v39 = vld [vmem:[%s9082_s1 + $0xd8] sm:$0xff]   ;;  %v5555_v40 = vld [vmem:[%s9082_s1 + $0xe0] sm:$0xff]   ;;  %v5556_v41 = vld [vmem:[%s9082_s1 + $0xe8] sm:$0xff]  }
  0x34   :  { %v5557_v42 = vld [vmem:[%s9082_s1 + $0xf0] sm:$0xff]   ;;  %v5558_v43 = vld [vmem:[%s9082_s1 + $0xf8] sm:$0xff]   ;;  %s5906_s1 = smov 64   ;;  %p5891_p4 = pnand %p5890_p3, %p5884_p0 }
  0x36   :  { %5433 = vmatpush3.bf16.msra.mxu0 %v5560_v32 }
  0x3a   :  { %5387 = vmatmul.mubr.msk.bf16.gmra.mxu1 %vm470_vm1, %v5536_v21 }
  0x3b   :  { %5390 = vmatprep.mubr.msk.bf16.mxu1 %vm470_vm1, %v5537_v22 }
  0x42   :  { %5391 = vmatmul.mubr.msk.bf16.gmra.mxu1 %vm470_vm1, %v5538_v23 }
  0x43   :  { %5394 = vmatprep.mubr.msk.bf16.mxu1 %vm470_vm1, %v5541_v24 }
  0x4a   :  { %5395 = vmatmul.mubr.msk.bf16.gmra.mxu1 %vm470_vm1, %v5542_v25 }
  0x4b   :  { %5398 = vmatprep.mubr.msk.bf16.mxu1 %vm470_vm1, %v5543_v26 }
  0x52   :  { %5399 = vmatmul.mubr.msk.bf16.gmra.mxu1 %vm470_vm1, %v5544_v27 }
  0x53   :  { %5402 = vmatprep.mubr.msk.bf16.mxu1 %vm470_vm1, %v5545_v28 }
  0x5a   :  { %5403 = vmatmul.mubr.msk.bf16.gmra.mxu1 %vm470_vm1, %v5546_v30 }
  0x5b   :  { %5406 = vmatprep.mubr.msk.bf16.mxu1 %vm470_vm1, %v5547_v31 }
  0x62   :  { %5407 = vmatmul.mubr.msk.bf16.gmra.mxu1 %vm470_vm1, %v5548_v33 }
  0x63   :  { %5410 = vmatprep.mubr.msk.bf16.mxu1 %vm470_vm1, %v5549_v34 }
  0x6a   :  { %5411 = vmatmul.mubr.msk.bf16.gmra.mxu1 %vm470_vm1, %v5550_v35 }
  0x6b   :  { %5414 = vmatprep.mubr.msk.bf16.mxu1 %vm470_vm1, %v5551_v36 }
  0x72   :  { %5415 = vmatmul.mubr.msk.bf16.gmra.mxu1 %vm470_vm1, %v5552_v37 }
  0x73   :  { %5418 = vmatprep.mubr.msk.bf16.mxu1 %vm470_vm1, %v5553_v38 }
  0x7a   :  { %5419 = vmatmul.mubr.msk.bf16.gmra.mxu1 %vm470_vm1, %v5554_v39 }
  0x7b   :  { %5422 = vmatprep.mubr.msk.bf16.mxu1 %vm470_vm1, %v5555_v40 }
  0x82   :  { %5423 = vmatmul.mubr.msk.bf16.gmra.mxu1 %vm470_vm1, %v5556_v41 }
  0x83   :  { %5426 = vmatprep.mubr.msk.bf16.mxu1 %vm470_vm1, %v5557_v42 }
  0x8a   :  { %5427 = vmatmul.mubr.msk.bf16.gmra.mxu1 %vm470_vm1, %v5558_v43 }
  0xca   :  { %v5352_v49 = vpop.f32.mrf.mxu0 }
  0xcb   :  { %v962_v55 = vcombine.high %v5352_v49, %v5352_v49  ;;  %v969_v62 = vrot.slane %v5352_v49, %v6120_v50 }
  0xcc   :  { %v247_v51 = vpop.f32.mrf.mxu0 }
  0xcd   :  { %v864_v52 = vcombine.high %v247_v51, %v247_v51  ;;  %v871_v53 = vrot.slane %v247_v51, %v6120_v50  ;;  %v976_v4 = vrot.slane %v962_v55, %v6120_v50  ;;  %v977_v9 = vcombine.high %v969_v62, %v969_v62 }
  0xce   :  { %v5353_v54 = vpop.f32.mrf.mxu0  ;;  %v6140_v10 = vrot.slane %v969_v62, %v6120_v50 }
  0xcf   :  { %v878_v56 = vrot.slane %v864_v52, %v6120_v50  ;;  %v879_v57 = vcombine.high %v871_v53, %v871_v53  ;;  %v887_v58 = vrot.slane %v871_v53, %v6120_v50  ;;  %v1018_v6 = vrot.slane %v5353_v54, %v6120_v50 }
  0xd0   :  { %v250_v59 = vpop.f32.mrf.mxu0  ;;  %v978_v18 = vcombine.high %v976_v4, %v976_v4  ;;  %v6152_v19 = vrot.slane %v976_v4, %v6120_v50  ;;  %v1011_v22 = vcombine.high %v5353_v54, %v5353_v54  ;;  %v6175_v36 = vrot.slane %v977_v9, %v6120_v50 }
  0xd1   :  { %v913_v60 = vcombine.high %v250_v59, %v250_v59  ;;  %v920_v61 = vrot.slane %v250_v59, %v6120_v50  ;;  %v880_v63 = vcombine.high %v878_v56, %v878_v56  ;;  %v901_v0 = vrot.slane %v879_v57, %v6120_v50 }
  0xd2   :  { %v909_v1 = vcombine.high %v887_v58, %v887_v58  ;;  %v6128_v2 = vpop.f32.mrf.mxu1  ;;  %v894_v11 = vrot.slane %v878_v56, %v6120_v50  ;;  %v1259_v15 = vrot.slane %v887_v58, %v6130_v3  ;;  %v1026_v23 = vcombine.high %v1018_v6, %v1018_v6  ;;  %v5356_v45 = vpop.f32.mrf.mxu0 }
  0xd3   :  { %v927_v5 = vrot.slane %v913_v60, %v6120_v50  ;;  %2205 = vrot.lane.b32.xlu0 %v6128_v2, %s5906_s1  ;;  %v928_v7 = vcombine.high %v920_v61, %v920_v61  ;;  %v908_v12 = vrot.slane %v880_v63, %v6120_v50  ;;  %v6145_v13 = vrot.slane %v920_v61, %v6120_v50 }
  0xd4   :  { %v6137_v8 = vpop.f32.mrf.mxu1  ;;  %v1267_v14 = vrot.slane %v909_v1, %v6130_v3  ;;  %v911_v17 = vcombine.high %v901_v0, %v901_v0  ;;  %v1263_v21 = vrot.slane %v901_v0, %v6130_v3  ;;  %v910_v30 = vcombine.high %v894_v11, %v894_v11  ;;  %v263_v1 = vpop.f32.mrf.mxu0 }
  0xd5   :  { %v929_v20 = vcombine.high %v927_v5, %v927_v5  ;;  %v6158_v24 = vrot.slane %v928_v7, %v6120_v50  ;;  %v6164_v27 = vrot.slane %v927_v5, %v6120_v50  ;;  %v1576_v28 = vmul.f32 %v1259_v15, %v6137_v8 }
  0xd6   :  { %v6149_v16 = vpop.f32.mrf.mxu1  ;;  %v1271_v25 = vrot.slane %v911_v17, %v6130_v3  ;;  %v958_v31 = vcombine.high %v6145_v13, %v6145_v13  ;;  %v1578_v32 = vmul.f32 %v6128_v2, %v1267_v14  ;;  %v912_v35 = vcombine.high %v908_v12, %v908_v12 }
  0xd7   :  { %2201 = vrot.lane.b32.xlu0 %v6137_v8, %s5906_s1  ;;  %v1007_v37 = vcombine.high %v6140_v10, %v6140_v10  ;;  %v6180_v38 = vrot.slane %v929_v20, %v6120_v50  ;;  %v6185_v40 = vrot.slane %v978_v18, %v6120_v50  ;;  %v6188_v41 = vrot.slane %v1011_v22, %v6120_v50 }
  0xd8   :  { %v6161_v26 = vpop.f32.mrf.mxu1  ;;  %v1579_v33 = vmul.f32 %v6149_v16, %v1271_v25  ;;  %v960_v44 = vcombine.high %v6158_v24, %v6158_v24  ;;  %v6195_v46 = vrot.slane %v1018_v6, %v6120_v50  ;;  %v6198_v47 = vrot.slane %v1026_v23, %v6120_v50  ;;  %v5357_v25 = vpop.f32.mrf.mxu0 }
  0xd9   :  { %v1577_v29 = vmul.f32 %v1263_v21, %v6161_v26  ;;  %v1283_v48 = vrot.slane %v910_v30, %v6130_v3  ;;  %v959_v49 = vcombine.high %v6164_v27, %v6164_v27  ;;  %v1275_v51 = vrot.slane %v894_v11, %v6130_v3 }
  0xda   :  { %v6172_v34 = vpop.f32.mrf.mxu1  ;;  %v1641_v42 = vpack.c.bf16 %v1579_v33, %v1578_v32  ;;  %v1287_v53 = vrot.slane %v912_v35, %v6130_v3  ;;  %v1279_v54 = vrot.slane %v908_v12, %v6130_v3  ;;  %v1299_v55 = vrot.slane %v958_v31, %v6130_v3 }
  0xdb   :  { %v1640_v39 = vpack.c.bf16 %v1577_v29, %v1576_v28  ;;  %2207 = vrot.lane.b32.xlu0 %v6149_v16, %s5906_s1  ;;  %v1582_v56 = vmul.f32 %v6172_v34, %v1283_v48  ;;  %v1291_v57 = vrot.slane %v6145_v13, %v6130_v3  ;;  %v1295_v58 = vrot.slane %v6158_v24, %v6130_v3 }
  0xdc   :  { %v6190_v43 = vpop.f32.mrf.mxu1  ;;  %v961_v59 = vcombine.high %v6180_v38, %v6180_v38  ;;  %v1303_v62 = vrot.slane %v960_v44, %v6130_v3  ;;  %v1307_v63 = vrot.slane %v6164_v27, %v6130_v3  ;;  %v1311_v0 = vrot.slane %v6180_v38, %v6130_v3 }
  0xdd   :  { %5434 = vmatprep.mubr.msk.bf16.mxu0 %vm200_vm0, %v1640_v39  ;;  %v1580_v4 = vmul.f32 %v1275_v51, %v6190_v43  ;;  %v6231_v6 = vrot.slane %v959_v49, %v6130_v3  ;;  %v6234_v7 = vrot.slane %v1007_v37, %v6130_v3  ;;  %v1323_v11 = vrot.slane %v6140_v10, %v6130_v3 }
  0xde   :  { %v6205_v52 = vpop.f32.mrf.mxu1  ;;  %5435 = vmatmul.mubr.msk.bf16.vlgmr.msra.gmra.mxu0 %vm200_vm0, %v1641_v42  ;;  %v1158_v12 = vcombine.high %v5356_v45, %v5356_v45  ;;  %v1165_v13 = vrot.slane %v5356_v45, %v6120_v50  ;;  %v1060_v14 = vcombine.high %v263_v1, %v263_v1  ;;  %v1319_v17 = vrot.slane %v961_v59, %v6130_v3 }
  0xdf   :  { %2203 = vrot.lane.b32.xlu0 %v6161_v26, %s5906_s1  ;;  %v1583_v60 = vmul.f32 %v6205_v52, %v1287_v53  ;;  %v1009_v18 = vcombine.high %v6175_v36, %v6175_v36  ;;  %v1067_v24 = vrot.slane %v263_v1, %v6120_v50  ;;  %v1327_v28 = vrot.slane %v6175_v36, %v6130_v3 }
  0xe0   :  { %v6221_v61 = vpop.f32.mrf.mxu1  ;;  %v1172_v22 = vrot.slane %v1158_v12, %v6120_v50  ;;  %v1173_v23 = vcombine.high %v1165_v13, %v1165_v13  ;;  %v6258_v30 = vrot.slane %v1165_v13, %v6120_v50  ;;  %v1074_v31 = vrot.slane %v1060_v14, %v6120_v50 }
  0xe1   :  { %9178 = vst [vmem:[#allocation5_spill] sm:$0xff] %v6221_v61  ;;  %v1581_v5 = vmul.f32 %v1279_v54, %v6221_v61  ;;  %v1643_v20 = vpack.c.bf16 %v1583_v60, %v1582_v56  ;;  %v1207_v39 = vcombine.high %v5357_v25, %v5357_v25  ;;  %v6275_v45 = vrot.slane %v1009_v18, %v6130_v3 }
  0xe2   :  { %v6236_v9 = vpop.f32.mrf.mxu1  ;;  %v1174_v37 = vcombine.high %v1172_v22, %v1172_v22  ;;  %v6281_v51 = vrot.slane %v1172_v22, %v6120_v50  ;;  %v6284_v53 = vrot.slane %v1173_v23, %v6120_v50  ;;  %v6287_v54 = vrot.slane %v1067_v24, %v6120_v50 }
  0xe3   :  { %v1642_v15 = vpack.c.bf16 %v1581_v5, %v1580_v4  ;;  %2213 = vrot.lane.b32.xlu0 %v6172_v34, %s5906_s1  ;;  %2221 = vrot.lane.b32.xlu1 %v6236_v9, %s5906_s1  ;;  %v1586_v42 = vmul.f32 %v6236_v9, %v1299_v55  ;;  %v266_v55 = vpop.f32.mrf.mxu0  ;;  %v1203_v59 = vcombine.high %v6258_v30, %v6258_v30 }
  0xe4   :  { %v6248_v21 = vpop.f32.mrf.mxu1  ;;  %v1075_v60 = vcombine.high %v1067_v24, %v1067_v24  ;;  %v6295_v1 = vrot.slane %v1174_v37, %v6120_v50  ;;  %v6298_v4 = vrot.slane %v1074_v31, %v6120_v50  ;;  %v1214_v5 = vrot.slane %v5357_v25, %v6120_v50 }
  0xe5   :  { %9179 = vst [vmem:[#allocation6_spill] sm:$0xff] %v6248_v21  ;;  %5438 = vmatprep.mubr.msk.bf16.mxu0 %vm200_vm0, %v1642_v15  ;;  %v1584_v48 = vmul.f32 %v1291_v57, %v6248_v21  ;;  %v1221_v12 = vrot.slane %v1207_v39, %v6120_v50  ;;  %v1105_v18 = vcombine.high %v6287_v54, %v6287_v54 }
  0xe6   :  { %v6261_v32 = vpop.f32.mrf.mxu1  ;;  %5439 = vmatmul.mubr.msk.bf16.gmra.mxu0 %vm200_vm0, %v1643_v20  ;;  %v1222_v20 = vcombine.high %v1214_v5, %v1214_v5  ;;  %v6311_v23 = vrot.slane %v1214_v5, %v6120_v50  ;;  %v6315_v24 = vrot.slane %v1075_v60, %v6120_v50  ;;  %v6442_v35 = vrot.slane %v1203_v59, %v6130_v3 }
  0xe7   :  { %v1587_v44 = vmul.f32 %v6261_v32, %v1303_v62  ;;  %2209 = vrot.lane.b32.xlu0 %v6190_v43, %s5906_s1  ;;  %2217 = vrot.lane.b32.xlu1 %v6248_v21, %s5906_s1  ;;  %v1076_v62 = vcombine.high %v1074_v31, %v1074_v31  ;;  %v1223_v22 = vcombine.high %v1221_v12, %v1221_v12 }
  0xe8   :  { %v6278_v49 = vpop.f32.mrf.mxu1  ;;  %v1116_v31 = vrot.slane %v266_v55, %v6120_v50  ;;  %v1205_v59 = vcombine.high %v6284_v53, %v6284_v53 }
  0xe9   :  { %9180 = vst [vmem:[#allocation7_spill] sm:$0xff] %v6278_v49  ;;  %v1585_v56 = vmul.f32 %v1295_v58, %v6278_v49  ;;  %v1645_v13 = vpack.c.bf16 %v1587_v44, %v1586_v42  ;;  %v1109_v58 = vcombine.high %v266_v55, %v266_v55  ;;  %v6318_v25 = vrot.slane %v1076_v62, %v6120_v50 }
  0xea   :  { %v6292_v57 = vpop.f32.mrf.mxu1  ;;  %v1124_v27 = vcombine.high %v1116_v31, %v1116_v31  ;;  %v6345_v60 = vrot.slane %v1223_v22, %v6120_v50  ;;  %v1252_v62 = vcombine.high %v6311_v23, %v6311_v23  ;;  %v6350_v5 = vrot.slane %v1116_v31, %v6120_v50 }
  0xeb   :  { %9181 = vst [vmem:[#allocation8_spill] sm:$0xff] %v6292_v57  ;;  %v1644_v14 = vpack.c.bf16 %v1585_v56, %v1584_v48  ;;  %2215 = vrot.lane.b32.xlu0 %v6205_v52, %s5906_s1  ;;  %2223 = vrot.lane.b32.xlu1 %v6261_v32, %s5906_s1  ;;  %v1123_v37 = vrot.slane %v1109_v58, %v6120_v50 }
  0xec   :  { %v6306_v15 = vpop.f32.mrf.mxu1  ;;  %v1590_v39 = vmul.f32 %v6292_v57, %v6231_v6  ;;  %v6332_v48 = vrot.slane %v1221_v12, %v6120_v50  ;;  %v6335_v56 = vrot.slane %v1222_v20, %v6120_v50  ;;  %v6363_v58 = vrot.slane %v1124_v27, %v6120_v50 }
  0xed   :  { %9182 = vst [vmem:[#allocation9_spill] sm:$0xff] %v6306_v15  ;;  %5442 = vmatprep.mubr.msk.bf16.mxu0 %vm200_vm0, %v1644_v14  ;;  %v1588_v42 = vmul.f32 %v1307_v63, %v6306_v15  ;;  %v1125_v63 = vcombine.high %v1123_v37, %v1123_v37  ;;  %v6360_v14 = vrot.slane %v1123_v37, %v6120_v50 }
  0xee   :  { %v6328_v44 = vpop.f32.mrf.mxu1  ;;  %5443 = vmatmul.mubr.msk.bf16.gmra.mxu0 %vm200_vm0, %v1645_v13  ;;  %v1154_v22 = vcombine.high %v6350_v5, %v6350_v5  ;;  %v1107_v31 = vcombine.high %v6315_v24, %v6315_v24  ;;  %v6476_v10 = vrot.slane %v1205_v59, %v6130_v3 }
  0xef   :  { %9183 = vst [vmem:[#allocation10_spill] sm:$0xff] %v6328_v44  ;;  %v1591_v55 = vmul.f32 %v6328_v44, %v1319_v17  ;;  %2211 = vrot.lane.b32.xlu0 %v6221_v61, %s5906_s1  ;;  %2219 = vrot.lane.b32.xlu1 %v6278_v49, %s5906_s1  ;;  %v6353_v17 = vrot.slane %v1105_v18, %v6130_v3 }
  0xf0   :  { %v6342_v6 = vpop.f32.mrf.mxu1  ;;  %v6380_v37 = vrot.slane %v1125_v63, %v6120_v50  ;;  %v6387_v27 = vrot.slane %v1107_v31, %v6130_v3  ;;  %v6402_v31 = vrot.slane %v1154_v22, %v6130_v3  ;;  %v1155_v22 = vcombine.high %v6360_v14, %v6360_v14 }
  0xf1   :  { %9184 = vst [vmem:[#allocation11_spill] sm:$0xff] %v6342_v6  ;;  %v1647_v12 = vpack.c.bf16 %v1591_v55, %v1590_v39  ;;  %v1589_v13 = vmul.f32 %v1311_v0, %v6342_v6  ;;  %v1106_v39 = vcombine.high %v6298_v4, %v6298_v4 }
  0xf2   :  { %v6365_v20 = vpop.f32.mrf.mxu1  ;;  %v6434_v29 = vrot.slane %v1155_v22, %v6130_v3 }
  0xf3   :  { %9185 = vst [vmem:[#allocation12_spill] sm:$0xff] %v6365_v20  ;;  %v1646_v0 = vpack.c.bf16 %v1589_v13, %v1588_v42  ;;  %2229 = vrot.lane.b32.xlu1 %v6292_v57, %s5906_s1  ;;  %2237 = vrot.lane.b32.xlu0 %v6365_v20, %s5906_s1  ;;  %v1108_v13 = vcombine.high %v6318_v25, %v6318_v25 }
  0xf4   :  { %v6384_v55 = vpop.f32.mrf.mxu1  ;;  %v1594_v63 = vmul.f32 %v6365_v20, %v6234_v7  ;;  %v6399_v18 = vrot.slane %v1106_v39, %v6130_v3  ;;  %v1156_v7 = vcombine.high %v6363_v58, %v6363_v58 }
  0xf5   :  { %9186 = vst [vmem:[#allocation13_spill] sm:$0xff] %v6384_v55  ;;  %5446 = vmatprep.mubr.msk.bf16.mxu0 %vm200_vm0, %v1646_v0  ;;  %v6410_v38 = vrot.slane %v1108_v13, %v6130_v3  ;;  %v1157_v13 = vcombine.high %v6380_v37, %v6380_v37 }
  0xf6   :  { %v6406_v33 = vpop.f32.mrf.mxu1  ;;  %5447 = vmatmul.mubr.msk.bf16.gmra.mxu0 %vm200_vm0, %v1647_v12  ;;  %v6431_v0 = vrot.slane %v1156_v7, %v6130_v3  ;;  %v1592_v12 = vmul.f32 %v1323_v11, %v6384_v55  ;;  %v1204_v11 = vcombine.high %v6281_v51, %v6281_v51 }
  0xf7   :  { %9187 = vst [vmem:[#allocation14_spill] sm:$0xff] %v6406_v33  ;;  %v1595_v39 = vmul.f32 %v6406_v33, %v6275_v45  ;;  %2225 = vrot.lane.b32.xlu1 %v6306_v15, %s5906_s1  ;;  %2233 = vrot.lane.b32.xlu0 %v6384_v55, %s5906_s1  ;;  %v6453_v22 = vrot.slane %v1157_v13, %v6130_v3 }
  0xf8   :  { %v6428_v42 = vpop.f32.mrf.mxu1  ;;  %v1206_v45 = vcombine.high %v6295_v1, %v6295_v1  ;;  %v6479_v15 = vrot.slane %v1204_v11, %v6130_v3  ;;  %v1254_v11 = vcombine.high %v6335_v56, %v6335_v56 }
  0xf9   :  { %9188 = vst [vmem:[#allocation15_spill] sm:$0xff] %v6428_v42  ;;  %v1593_v7 = vmul.f32 %v1327_v28, %v6428_v42  ;;  %v1649_v28 = vpack.c.bf16 %v1595_v39, %v1594_v63  ;;  %v6484_v39 = vrot.slane %v1252_v62, %v6130_v3 }
  0xfa   :  { %v6457_v20 = vpop.f32.mrf.mxu1  ;;  %v6492_v36 = vrot.slane %v1206_v45, %v6130_v3  ;;  %v6516_v62 = vrot.slane %v1254_v11, %v6130_v3  ;;  %v9193_v45 = vcombine.high %v6152_v19, %v6152_v19  ;;  %v9195_v11 = vrot.slane %v6152_v19, %v6130_v3 }
  0xfb   :  { %9189 = vst [vmem:[#allocation16_spill] sm:$0xff] %v6457_v20  ;;  %v1648_v13 = vpack.c.bf16 %v1593_v7, %v1592_v12  ;;  %2231 = vrot.lane.b32.xlu1 %v6328_v44, %s5906_s1  ;;  %2239 = vrot.lane.b32.xlu0 %v6406_v33, %s5906_s1  ;;  %v9191_v12 = vcombine.high %v6185_v40, %v6185_v40 }
  0xfc   :  { %v6473_v55 = vpop.f32.mrf.mxu1  ;;  %v1347_v33 = vrot.slane %v9193_v45, %v6130_v3  ;;  %v1027_v45 = vcombine.high %v6188_v41, %v6188_v41  ;;  %v1056_v19 = vcombine.high %v6195_v46, %v6195_v46 }
  0xfd   :  { %9190 = vst [vmem:[#allocation17_spill] sm:$0xff] %v6473_v55  ;;  %5450 = vmatprep.mubr.msk.bf16.mxu0 %vm200_vm0, %v1648_v13  ;;  %v1351_v7 = vrot.slane %v9191_v12, %v6130_v3  ;;  %v1253_v13 = vcombine.high %v6332_v48, %v6332_v48  ;;  %v1255_v12 = vcombine.high %v6345_v60, %v6345_v60 }
  0xfe   :  { %v6498_v63 = vpop.f32.mrf.mxu1  ;;  %5451 = vmatmul.mubr.msk.bf16.gmra.mxu0 %vm200_vm0, %v1649_v28  ;;  %v1343_v28 = vrot.slane %v6185_v40, %v6130_v3  ;;  %v1596_v59 = vmul.f32 %v9195_v11, %v6473_v55 }
  0xff   :  { %9192 = vst [vmem:[#allocation18_spill] sm:$0xff] %v6498_v63  ;;  %2227 = vrot.lane.b32.xlu1 %v6342_v6, %s5906_s1  ;;  %2245 = vrot.lane.b32.xlu0 %v6457_v20, %s5906_s1  ;;  %v1599_v44 = vmul.f32 %v6498_v63, %v1351_v7  ;;  %v6528_v57 = vrot.slane %v1253_v13, %v6130_v3 }
 0x100   :  { %v6525_v6 = vpop.f32.mrf.mxu1  ;;  %v6531_v40 = vrot.slane %v1255_v12, %v6130_v3  ;;  %v1598_v7 = vmul.f32 %v6457_v20, %v1347_v33  ;;  %v1058_v13 = vcombine.high %v6198_v47, %v6198_v47  ;;  %v1055_v33 = vrot.slane %v1027_v45, %v6120_v50 }
 0x101   :  { %9194 = vst [vmem:[#allocation19_spill] sm:$0xff] %v6525_v6  ;;  %v1597_v21 = vmul.f32 %v1343_v28, %v6525_v6  ;;  %v1363_v45 = vrot.slane %v1056_v19, %v6130_v3 }
 0x102   :  { %v6541_v49 = vpop.f32.mrf.mxu1  ;;  %v1651_v12 = vpack.c.bf16 %v1599_v44, %v1598_v7  ;;  %v1041_v44 = vrot.slane %v6188_v41, %v6120_v50 }
 0x103   :  { %v1650_v61 = vpack.c.bf16 %v1597_v21, %v1596_v59  ;;  %2235 = vrot.lane.b32.xlu1 %v6428_v42, %s5906_s1  ;;  %2241 = vrot.lane.b32.xlu0 %v6473_v55, %s5906_s1  ;;  %v1367_v21 = vrot.slane %v1058_v13, %v6130_v3  ;;  %v1355_v59 = vrot.slane %v6195_v46, %v6130_v3 }
 0x104   :  { %v6551_v28 = vpop.f32.mrf.mxu1  ;;  %v1059_v55 = vcombine.high %v1055_v33, %v1055_v33  ;;  %v1057_v41 = vcombine.high %v1041_v44, %v1041_v44 }
 0x105   :  { %9196 = vst [vmem:[#allocation20_spill] sm:$0xff] %v6551_v28  ;;  %5454 = vmatprep.mubr.msk.bf16.mxu0 %vm200_vm0, %v1650_v61  ;;  %v1359_v61 = vrot.slane %v6198_v47, %v6130_v3  ;;  %v1600_v46 = vmul.f32 %v1355_v59, %v6551_v28  ;;  %v1371_v59 = vrot.slane %v1041_v44, %v6130_v3 }
 0x106   :  { %v6555_v11 = vpop.f32.mrf.mxu1  ;;  %5455 = vmatmul.mubr.msk.bf16.gmra.mxu0 %vm200_vm0, %v1651_v12 }
 0x107   :  { %2247 = vrot.lane.b32.xlu0 %v6498_v63, %s5906_s1  ;;  %2253 = vrot.lane.b32.xlu1 %v6541_v49, %s5906_s1  ;;  %v1603_v7 = vmul.f32 %v6555_v11, %v1367_v21  ;;  %v1602_v63 = vmul.f32 %v6541_v49, %v1363_v45  ;;  %v1383_v21 = vrot.slane %v1059_v55, %v6130_v3 }
 0x108   :  { %v6571_v13 = vpop.f32.mrf.mxu1 }
 0x109   :  { %9197 = vst [vmem:[#allocation21_spill] sm:$0xff] %v6571_v13  ;;  %v1601_v12 = vmul.f32 %v1359_v61, %v6571_v13  ;;  %v1653_v50 = vpack.c.bf16 %v1603_v7, %v1602_v63  ;;  %v1375_v63 = vrot.slane %v1055_v33, %v6130_v3  ;;  %v1379_v61 = vrot.slane %v1057_v41, %v6130_v3 }
 0x10a   :  { %v6576_v20 = vpop.f32.mrf.mxu1 }
 0x10b   :  { %9198 = vst [vmem:[#allocation22_spill] sm:$0xff] %v6576_v20  ;;  %v1652_v42 = vpack.c.bf16 %v1601_v12, %v1600_v46  ;;  %2243 = vrot.lane.b32.xlu0 %v6525_v6, %s5906_s1  ;;  %2255 = vrot.lane.b32.xlu1 %v6555_v11, %s5906_s1  ;;  %v1606_v44 = vmul.f32 %v6576_v20, %v1379_v61 }
 0x10c   :  { %v6582_v47 = vpop.f32.mrf.mxu1  ;;  %v9206_v61 = vrot.slane %v6287_v54, %v6130_v3 }
 0x10d   :  { %9199 = vst [vmem:[#allocation23_spill] sm:$0xff] %v6582_v47  ;;  %5458 = vmatprep.mubr.msk.bf16.mxu0 %vm200_vm0, %v1652_v42  ;;  %v1604_v55 = vmul.f32 %v1371_v59, %v6582_v47 }
 0x10e   :  { %v6585_v19 = vpop.f32.mrf.mxu1  ;;  %5459 = vmatmul.mubr.msk.bf16.gmra.mxu0 %vm200_vm0, %v1653_v50 }
 0x10f   :  { %9200 = vst [vmem:[#allocation24_spill] sm:$0xff] %v6585_v19  ;;  %2249 = vrot.lane.b32.xlu0 %v6551_v28, %s5906_s1  ;;  %2251 = vrot.lane.b32.xlu1 %v6571_v13, %s5906_s1  ;;  %v1607_v42 = vmul.f32 %v6585_v19, %v1383_v21  ;;  %v115_v13 = vld [vmem:[%s9083_s2 + $0x78] sm:$0xff] }
 0x110   :  { %v6597_v45 = vpop.f32.mrf.mxu1 }
 0x111   :  { %9201 = vst [vmem:[#allocation25_spill] sm:$0xff] %v6597_v45  ;;  %v1605_v7 = vmul.f32 %v1375_v63, %v6597_v45  ;;  %v1655_v33 = vpack.c.bf16 %v1607_v42, %v1606_v44 }
 0x112   :  { %v6602_v46 = vpop.f32.mrf.mxu1 }
 0x113   :  { %9202 = vst [vmem:[#allocation26_spill] sm:$0xff] %v6602_v46  ;;  %v1654_v12 = vpack.c.bf16 %v1605_v7, %v1604_v55  ;;  %2261 = vrot.lane.b32.xlu1 %v6576_v20, %s5906_s1  ;;  %2269 = vrot.lane.b32.xlu0 %v6602_v46, %s5906_s1  ;;  %v1610_v21 = vmul.f32 %v6602_v46, %v6353_v17 }
 0x114   :  { %v6608_v50 = vpop.f32.mrf.mxu1  ;;  %v9207_v17 = vrot.slane %v6315_v24, %v6130_v3 }
 0x115   :  { %9203 = vst [vmem:[#allocation27_spill] sm:$0xff] %v6608_v50  ;;  %5462 = vmatprep.mubr.msk.bf16.mxu0 %vm200_vm0, %v1654_v12  ;;  %v1608_v42 = vmul.f32 %v9206_v61, %v6608_v50 }
 0x116   :  { %v6611_v41 = vpop.f32.mrf.mxu1  ;;  %5463 = vmatmul.mubr.msk.bf16.gmra.mxu0 %vm200_vm0, %v1655_v33 }
 0x117   :  { %9204 = vst [vmem:[#allocation28_spill] sm:$0xff] %v6611_v41  ;;  %v1611_v59 = vmul.f32 %v6611_v41, %v6387_v27  ;;  %2257 = vrot.lane.b32.xlu1 %v6582_v47, %s5906_s1  ;;  %2265 = vrot.lane.b32.xlu0 %v6608_v50, %s5906_s1  ;;  %v6951_v50 = vld [vmem:[%s9083_s2 + $0x38] sm:$0xff] }
 0x118   :  { %v6622_v63 = vpop.f32.mrf.mxu1  ;;  %vm2528_vm10 = vcmp.gt.f32.partialorder %v6951_v50, 0.0 }
 0x119   :  { %9205 = vst [vmem:[#allocation29_spill] sm:$0xff] %v6622_v63  ;;  %v1657_v55 = vpack.c.bf16 %v1611_v59, %v1610_v21  ;;  %v1609_v7 = vmul.f32 %v9207_v17, %v6622_v63  ;;  %v9212_v59 = vrot.slane %v6298_v4, %v6130_v3 }
 0x11a   :  { %v6632_v27 = vpop.f32.mrf.mxu1 }
 0x11b   :  { %9208 = vst [vmem:[#allocation30_spill] sm:$0xff] %v6632_v27  ;;  %v1656_v44 = vpack.c.bf16 %v1609_v7, %v1608_v42  ;;  %2263 = vrot.lane.b32.xlu1 %v6585_v19, %s5906_s1  ;;  %2271 = vrot.lane.b32.xlu0 %v6611_v41, %s5906_s1  ;;  %v1614_v24 = vmul.f32 %v6632_v27, %v6399_v18 }
 0x11c   :  { %v6638_v12 = vpop.f32.mrf.mxu1  ;;  %v9213_v18 = vrot.slane %v6318_v25, %v6130_v3 }
 0x11d   :  { %9209 = vst [vmem:[#allocation31_spill] sm:$0xff] %v6638_v12  ;;  %5466 = vmatprep.mubr.msk.bf16.mxu0 %vm200_vm0, %v1656_v44  ;;  %v1612_v61 = vmul.f32 %v9212_v59, %v6638_v12 }
 0x11e   :  { %v6641_v54 = vpop.f32.mrf.mxu1  ;;  %5467 = vmatmul.mubr.msk.bf16.gmra.mxu0 %vm200_vm0, %v1657_v55 }
 0x11f   :  { %9210 = vst [vmem:[#allocation32_spill] sm:$0xff] %v6641_v54  ;;  %v1615_v33 = vmul.f32 %v6641_v54, %v6410_v38  ;;  %2259 = vrot.lane.b32.xlu1 %v6597_v45, %s5906_s1  ;;  %2277 = vrot.lane.b32.xlu0 %v6632_v27, %s5906_s1 }
 0x120   :  { %v6652_v21 = vpop.f32.mrf.mxu1 }
 0x121   :  { %9211 = vst [vmem:[#allocation33_spill] sm:$0xff] %v6652_v21  ;;  %v1659_v42 = vpack.c.bf16 %v1615_v33, %v1614_v24  ;;  %v1613_v55 = vmul.f32 %v9213_v18, %v6652_v21  ;;  %v9218_v33 = vrot.slane %v6350_v5, %v6130_v3 }
 0x122   :  { %v6662_v38 = vpop.f32.mrf.mxu1 }
 0x123   :  { %9214 = vst [vmem:[#allocation34_spill] sm:$0xff] %v6662_v38  ;;  %v1658_v17 = vpack.c.bf16 %v1613_v55, %v1612_v61  ;;  %2267 = vrot.lane.b32.xlu1 %v6622_v63, %s5906_s1  ;;  %2273 = vrot.lane.b32.xlu0 %v6638_v12, %s5906_s1  ;;  %v1618_v25 = vmul.f32 %v6662_v38, %v6402_v31 }
 0x124   :  { %v6668_v7 = vpop.f32.mrf.mxu1  ;;  %v9219_v31 = vrot.slane %v6363_v58, %v6130_v3 }
 0x125   :  { %9215 = vst [vmem:[#allocation35_spill] sm:$0xff] %v6668_v7  ;;  %5470 = vmatprep.mubr.msk.bf16.mxu0 %vm200_vm0, %v1658_v17  ;;  %v1616_v59 = vmul.f32 %v9218_v33, %v6668_v7 }
 0x126   :  { %v6671_v4 = vpop.f32.mrf.mxu1  ;;  %5471 = vmatmul.mubr.msk.bf16.gmra.mxu0 %vm200_vm0, %v1659_v42 }
 0x127   :  { %9216 = vst [vmem:[#allocation36_spill] sm:$0xff] %v6671_v4  ;;  %v1619_v44 = vmul.f32 %v6671_v4, %v6431_v0  ;;  %2279 = vrot.lane.b32.xlu0 %v6641_v54, %s5906_s1  ;;  %2285 = vrot.lane.b32.xlu1 %v6662_v38, %s5906_s1 }
 0x128   :  { %v6682_v24 = vpop.f32.mrf.mxu1 }
 0x129   :  { %9217 = vst [vmem:[#allocation37_spill] sm:$0xff] %v6682_v24  ;;  %v1661_v61 = vpack.c.bf16 %v1619_v44, %v1618_v25  ;;  %v1617_v42 = vmul.f32 %v9219_v31, %v6682_v24  ;;  %v9224_v44 = vrot.slane %v6360_v14, %v6130_v3 }
 0x12a   :  { %v6692_v0 = vpop.f32.mrf.mxu1 }
 0x12b   :  { %9220 = vst [vmem:[#allocation38_spill] sm:$0xff] %v6692_v0  ;;  %v1660_v18 = vpack.c.bf16 %v1617_v42, %v1616_v59  ;;  %2275 = vrot.lane.b32.xlu0 %v6652_v21, %s5906_s1  ;;  %2287 = vrot.lane.b32.xlu1 %v6671_v4, %s5906_s1  ;;  %v1622_v58 = vmul.f32 %v6692_v0, %v6434_v29 }
 0x12c   :  { %v6698_v55 = vpop.f32.mrf.mxu1  ;;  %v9225_v29 = vrot.slane %v6380_v37, %v6130_v3 }
 0x12d   :  { %9221 = vst [vmem:[#allocation39_spill] sm:$0xff] %v6698_v55  ;;  %5474 = vmatprep.mubr.msk.bf16.mxu0 %vm200_vm0, %v1660_v18  ;;  %v1620_v33 = vmul.f32 %v9224_v44, %v6698_v55 }
 0x12e   :  { %v6701_v5 = vpop.f32.mrf.mxu1  ;;  %5475 = vmatmul.mubr.msk.bf16.gmra.mxu0 %vm200_vm0, %v1661_v61 }
 0x12f   :  { %9222 = vst [vmem:[#allocation40_spill] sm:$0xff] %v6701_v5  ;;  %v1623_v17 = vmul.f32 %v6701_v5, %v6453_v22  ;;  %2281 = vrot.lane.b32.xlu0 %v6668_v7, %s5906_s1  ;;  %2283 = vrot.lane.b32.xlu1 %v6682_v24, %s5906_s1 }
 0x130   :  { %v6712_v25 = vpop.f32.mrf.mxu1 }
 0x131   :  { %9223 = vst [vmem:[#allocation41_spill] sm:$0xff] %v6712_v25  ;;  %v1663_v59 = vpack.c.bf16 %v1623_v17, %v1622_v58  ;;  %v1621_v61 = vmul.f32 %v9225_v29, %v6712_v25  ;;  %v9230_v17 = vrot.slane %v6258_v30, %v6130_v3 }
 0x132   :  { %v6722_v22 = vpop.f32.mrf.mxu1 }
 0x133   :  { %9226 = vst [vmem:[#allocation42_spill] sm:$0xff] %v6722_v22  ;;  %v1662_v31 = vpack.c.bf16 %v1621_v61, %v1620_v33  ;;  %2293 = vrot.lane.b32.xlu1 %v6692_v0, %s5906_s1  ;;  %2301 = vrot.lane.b32.xlu0 %v6722_v22, %s5906_s1  ;;  %v1626_v37 = vmul.f32 %v6722_v22, %v6442_v35 }
 0x134   :  { %v6728_v42 = vpop.f32.mrf.mxu1  ;;  %v9231_v35 = vrot.slane %v6284_v53, %v6130_v3 }
 0x135   :  { %9227 = vst [vmem:[#allocation43_spill] sm:$0xff] %v6728_v42  ;;  %5478 = vmatprep.mubr.msk.bf16.mxu0 %vm200_vm0, %v1662_v31  ;;  %v1624_v44 = vmul.f32 %v9230_v17, %v6728_v42 }
 0x136   :  { %v6731_v14 = vpop.f32.mrf.mxu1  ;;  %5479 = vmatmul.mubr.msk.bf16.gmra.mxu0 %vm200_vm0, %v1663_v59 }
 0x137   :  { %9228 = vst [vmem:[#allocation44_spill] sm:$0xff] %v6731_v14  ;;  %v1627_v18 = vmul.f32 %v6731_v14, %v6476_v10  ;;  %2289 = vrot.lane.b32.xlu1 %v6698_v55, %s5906_s1  ;;  %2297 = vrot.lane.b32.xlu0 %v6728_v42, %s5906_s1 }
 0x138   :  { %v6742_v58 = vpop.f32.mrf.mxu1 }
 0x139   :  { %9229 = vst [vmem:[#allocation45_spill] sm:$0xff] %v6742_v58  ;;  %v1665_v33 = vpack.c.bf16 %v1627_v18, %v1626_v37  ;;  %v1625_v59 = vmul.f32 %v9231_v35, %v6742_v58  ;;  %v9236_v18 = vrot.slane %v6281_v51, %v6130_v3 }
 0x13a   :  { %v6752_v10 = vpop.f32.mrf.mxu1 }
 0x13b   :  { %9232 = vst [vmem:[#allocation46_spill] sm:$0xff] %v6752_v10  ;;  %v1664_v29 = vpack.c.bf16 %v1625_v59, %v1624_v44  ;;  %2295 = vrot.lane.b32.xlu1 %v6701_v5, %s5906_s1  ;;  %2303 = vrot.lane.b32.xlu0 %v6731_v14, %s5906_s1  ;;  %v1630_v53 = vmul.f32 %v6752_v10, %v6479_v15  ;;  %v6889_v14 = vld [vmem:[%s9083_s2 + $0x10] sm:$0xff] }
 0x13c   :  { %v6758_v61 = vpop.f32.mrf.mxu1  ;;  %v9237_v15 = vrot.slane %v6295_v1, %v6130_v3  ;;  %vm2523_vm2 = vcmp.gt.f32.partialorder %v6889_v14, 0.0 }
 0x13d   :  { %9233 = vst [vmem:[#allocation47_spill] sm:$0xff] %v6758_v61  ;;  %5482 = vmatprep.mubr.msk.bf16.mxu0 %vm200_vm0, %v1664_v29  ;;  %v1628_v17 = vmul.f32 %v9236_v18, %v6758_v61 }
 0x13e   :  { %v6761_v30 = vpop.f32.mrf.mxu1  ;;  %5483 = vmatmul.mubr.msk.bf16.gmra.mxu0 %vm200_vm0, %v1665_v33 }
 0x13f   :  { %9234 = vst [vmem:[#allocation48_spill] sm:$0xff] %v6761_v30  ;;  %v1631_v31 = vmul.f32 %v6761_v30, %v6492_v36  ;;  %2291 = vrot.lane.b32.xlu1 %v6712_v25, %s5906_s1  ;;  %2309 = vrot.lane.b32.xlu0 %v6752_v10, %s5906_s1 }
 0x140   :  { %v6772_v37 = vpop.f32.mrf.mxu1 }
 0x141   :  { %9235 = vst [vmem:[#allocation49_spill] sm:$0xff] %v6772_v37  ;;  %v1667_v44 = vpack.c.bf16 %v1631_v31, %v1630_v53  ;;  %v1629_v33 = vmul.f32 %v9237_v15, %v6772_v37  ;;  %v9242_v31 = vrot.slane %v6311_v23, %v6130_v3 }
 0x142   :  { %v6782_v36 = vpop.f32.mrf.mxu1 }
 0x143   :  { %9238 = vst [vmem:[#allocation50_spill] sm:$0xff] %v6782_v36  ;;  %v1666_v35 = vpack.c.bf16 %v1629_v33, %v1628_v17  ;;  %2299 = vrot.lane.b32.xlu1 %v6742_v58, %s5906_s1  ;;  %2305 = vrot.lane.b32.xlu0 %v6758_v61, %s5906_s1  ;;  %v1634_v1 = vmul.f32 %v6782_v36, %v6484_v39 }
 0x144   :  { %v6788_v59 = vpop.f32.mrf.mxu1  ;;  %v9243_v39 = vrot.slane %v6335_v56, %v6130_v3 }
 0x145   :  { %9239 = vst [vmem:[#allocation51_spill] sm:$0xff] %v6788_v59  ;;  %5486 = vmatprep.mubr.msk.bf16.mxu0 %vm200_vm0, %v1666_v35  ;;  %v1632_v18 = vmul.f32 %v9242_v31, %v6788_v59 }
 0x146   :  { %v6791_v51 = vpop.f32.mrf.mxu1  ;;  %5487 = vmatmul.mubr.msk.bf16.gmra.mxu0 %vm200_vm0, %v1667_v44 }
 0x147   :  { %9240 = vst [vmem:[#allocation52_spill] sm:$0xff] %v6791_v51  ;;  %v1635_v29 = vmul.f32 %v6791_v51, %v6516_v62  ;;  %2311 = vrot.lane.b32.xlu0 %v6761_v30, %s5906_s1  ;;  %2317 = vrot.lane.b32.xlu1 %v6782_v36, %s5906_s1 }
 0x148   :  { %v6802_v53 = vpop.f32.mrf.mxu1 }
 0x149   :  { %9241 = vst [vmem:[#allocation53_spill] sm:$0xff] %v6802_v53  ;;  %v1669_v17 = vpack.c.bf16 %v1635_v29, %v1634_v1  ;;  %v1633_v44 = vmul.f32 %v9243_v39, %v6802_v53  ;;  %v9248_v29 = vrot.slane %v6332_v48, %v6130_v3  ;;  %v2206_v39 = vpop.permute.xlu0 %2205 }
 0x14a   :  { %v6812_v62 = vpop.f32.mrf.mxu1 }
 0x14b   :  { %9244 = vst [vmem:[#allocation54_spill] sm:$0xff] %v6812_v62  ;;  %v1668_v15 = vpack.c.bf16 %v1633_v44, %v1632_v18  ;;  %2307 = vrot.lane.b32.xlu0 %v6772_v37, %s5906_s1  ;;  %2319 = vrot.lane.b32.xlu1 %v6791_v51, %s5906_s1  ;;  %v1638_v56 = vmul.f32 %v6812_v62, %v6528_v57 }
 0x14c   :  { %v6818_v33 = vpop.f32.mrf.mxu1  ;;  %v9249_v57 = vrot.slane %v6345_v60, %v6130_v3 }
 0x14d   :  { %9245 = vst [vmem:[#allocation55_spill] sm:$0xff] %v6818_v33  ;;  %5490 = vmatprep.mubr.msk.bf16.mxu0 %vm200_vm0, %v1668_v15  ;;  %v1636_v31 = vmul.f32 %v9248_v29, %v6818_v33  ;;  %v2202_v48 = vpop.permute.xlu0 %2201 }
 0x14e   :  { %v6821_v23 = vpop.f32.mrf.mxu1  ;;  %5491 = vmatmul.mubr.msk.bf16.gmra.mxu0 %vm200_vm0, %v1669_v17 }
 0x14f   :  { %9246 = vst [vmem:[#allocation56_spill] sm:$0xff] %v6821_v23  ;;  %v1639_v35 = vmul.f32 %v6821_v23, %v6531_v40  ;;  %2313 = vrot.lane.b32.xlu0 %v6788_v59, %s5906_s1  ;;  %2315 = vrot.lane.b32.xlu1 %v6802_v53, %s5906_s1 }
 0x150   :  { %v6832_v1 = vpop.f32.mrf.mxu1 }
 0x151   :  { %9247 = vst [vmem:[#allocation57_spill] sm:$0xff] %v6832_v1  ;;  %v1671_v18 = vpack.c.bf16 %v1639_v35, %v1638_v56  ;;  %v1637_v17 = vmul.f32 %v9249_v57, %v6832_v1  ;;  %v2208_v3 = vpop.permute.xlu0 %2207 }
 0x153   :  { %v1670_v40 = vpack.c.bf16 %v1637_v17, %v1636_v31  ;;  %2325 = vrot.lane.b32.xlu1 %v6812_v62, %s5906_s1 }
 0x155   :  { %5494 = vmatprep.mubr.msk.bf16.mxu0 %vm200_vm0, %v1670_v40  ;;  %v6850_v44 = vpop.permute.xlu1 %2221  ;;  %v2204_v15 = vpop.permute.xlu0 %2203 }
 0x156   :  { %5495 = vmatmul.mubr.msk.bf16.gmra.mxu0 %vm200_vm0, %v1671_v18 }
 0x157   :  { %2321 = vrot.lane.b32.xlu1 %v6818_v33, %s5906_s1 }
 0x159   :  { %v6854_v60 = vpop.permute.xlu1 %2217  ;;  %v2214_v35 = vpop.permute.xlu0 %2213 }
 0x15b   :  { %2327 = vrot.lane.b32.xlu1 %v6821_v23, %s5906_s1 }
 0x15d   :  { %v6856_v56 = vpop.permute.xlu1 %2223  ;;  %v2210_v31 = vpop.permute.xlu0 %2209 }
 0x15f   :  { %2323 = vrot.lane.b32.xlu1 %v6832_v1, %s5906_s1 }
 0x161   :  { %v6858_v29 = vpop.permute.xlu1 %2219  ;;  %v2216_v57 = vpop.permute.xlu0 %2215 }
 0x165   :  { %v6860_v18 = vpop.permute.xlu1 %2229  ;;  %v6864_v40 = vpop.permute.xlu0 %2211 }
 0x169   :  { %v6862_v17 = vpop.permute.xlu1 %2225  ;;  %v6868_v1 = vpop.permute.xlu0 %2237 }
 0x16d   :  { %v6866_v23 = vpop.permute.xlu1 %2231  ;;  %v6872_v33 = vpop.permute.xlu0 %2233 }
 0x171   :  { %v6870_v62 = vpop.permute.xlu1 %2227  ;;  %v6876_v53 = vpop.permute.xlu0 %2239 }
 0x175   :  { %v6874_v30 = vpop.permute.xlu1 %2235  ;;  %v6880_v51 = vpop.permute.xlu0 %2245 }
 0x179   :  { %v6878_v10 = vpop.permute.xlu1 %2253  ;;  %v6884_v61 = vpop.permute.xlu0 %2241 }
 0x17d   :  { %v6882_v59 = vpop.permute.xlu1 %2255  ;;  %v6900_v21 = vpop.permute.xlu0 %2247 }
 0x181   :  { %v6891_v5 = vpop.permute.xlu1 %2251 }
 0x19e   :  { %v5436_v36 = vpop.f32.mrf.mxu0 }
 0x19f   :  { %v2075_v37 = vmul.f32 0.35355338, %v5436_v36  ;;  %v6897_v36 = vld [vmem:[%s9083_s2] sm:$0xff] }
 0x1a0   :  { %v1818_v58 = vpop.f32.mrf.mxu0  ;;  %vm2521_vm4 = vcmp.gt.f32.partialorder %v6897_v36, 0.0 }
 0x1a1   :  { %v2395_v25 = vadd.f32 %v2206_v39, %v2075_v37  ;;  %v2073_v42 = vmul.f32 0.35355338, %v1818_v58 }
 0x1a2   :  { %v5437_v22 = vpop.f32.mrf.mxu0 }
 0x1a3   :  { %v2393_v0 = vadd.f32 %v2202_v48, %v2073_v42  ;;  %v2076_v55 = vmul.f32 0.35355338, %v5437_v22  ;;  %v2459_v7 = vadd.f32 %v2395_v25, %v6889_v14  ;;  %v6905_v42 = vld [vmem:[%s9083_s2 + $0x8] sm:$0xff]  ;;  %v6907_v22 = vpop.permute.xlu1 %2261 }
 0x1a4   :  { %v1821_v24 = vpop.f32.mrf.mxu0  ;;  %vm2522_vm5 = vcmp.gt.f32.partialorder %v6905_v42, 0.0 }
 0x1a5   :  { %v2074_v54 = vmul.f32 0.35355338, %v1821_v24  ;;  %2653 = vrot.lane.b32.xlu0 %v2459_v7, %s5907_s13  ;;  %v2396_v25 = vadd.f32 %v2208_v3, %v2076_v55  ;;  %v2457_v39 = vadd.f32 %v2393_v0, %v6897_v36  ;;  %v6913_v7 = vld [vmem:[%s9083_s2 + $0x18] sm:$0xff]  ;;  %v6924_v55 = vld [vmem:[%s9083_s2 + $0x30] sm:$0xff] }
 0x1a6   :  { %v5440_v4 = vpop.f32.mrf.mxu0  ;;  %v162_v36 = vld [vmem:[%s9083_s2 + $0x1f0] sm:$0xff]  ;;  %vm2524_vm6 = vcmp.gt.f32.partialorder %v6913_v7, 0.0  ;;  %vm2527_vm7 = vcmp.gt.f32.partialorder %v6924_v55, 0.0 }
 0x1a7   :  { %v2394_v58 = vadd.f32 %v2204_v15, %v2074_v54  ;;  %v2079_v37 = vmul.f32 0.35355338, %v5440_v4  ;;  %v2460_v54 = vadd.f32 %v2396_v25, %v6913_v7  ;;  %v6919_v4 = vpop.permute.xlu0 %2243  ;;  %v6926_v3 = vpop.permute.xlu1 %2257  ;;  %v6933_v25 = vld [vmem:[%s9083_s2 + $0x20] sm:$0xff] }
 0x1a8   :  { %v1834_v48 = vpop.f32.mrf.mxu0  ;;  %v160_v7 = vld [vmem:[%s9083_s2 + $0x1e0] sm:$0xff]  ;;  %vm2525_vm8 = vcmp.gt.f32.partialorder %v6933_v25, 0.0 }
 0x1a9   :  { %2649 = vrot.lane.b32.xlu0 %v2457_v39, %s5907_s13  ;;  %v2458_v24 = vadd.f32 %v2394_v58, %v6905_v42  ;;  %v2399_v38 = vadd.f32 %v2214_v35, %v2079_v37  ;;  %v2077_v12 = vmul.f32 0.35355338, %v1834_v48 }
 0x1aa   :  { %v5441_v27 = vpop.f32.mrf.mxu0 }
 0x1ab   :  { %2651 = vrot.lane.b32.xlu1 %v2458_v24, %s5907_s13  ;;  %v2080_v15 = vmul.f32 0.35355338, %v5441_v27  ;;  %v2397_v35 = vadd.f32 %v2210_v31, %v2077_v12  ;;  %v2463_v39 = vadd.f32 %v2399_v38, %v6924_v55  ;;  %v6938_v24 = vld [vmem:[%s9083_s2 + $0x50] sm:$0xff]  ;;  %v6942_v27 = vpop.permute.xlu0 %2249 }
 0x1ac   :  { %v1837_v0 = vpop.f32.mrf.mxu0  ;;  %vm2531_vm9 = vcmp.gt.f32.partialorder %v6938_v24, 0.0 }
 0x1ad   :  { %2655 = vrot.lane.b32.xlu0 %v2460_v54, %s5907_s13  ;;  %v2400_v12 = vadd.f32 %v2216_v57, %v2080_v15  ;;  %v2078_v31 = vmul.f32 0.35355338, %v1837_v0  ;;  %v6944_v54 = vpop.permute.xlu1 %2263  ;;  %v2461_v41 = vadd.f32 %v2397_v35, %v6933_v25 }
 0x1ae   :  { %v5444_v58 = vpop.f32.mrf.mxu0 }
 0x1af   :  { %v2083_v37 = vmul.f32 0.35355338, %v5444_v58  ;;  %v2464_v35 = vadd.f32 %v2400_v12, %v6951_v50 }
 0x1b0   :  { %v1850_v48 = vpop.f32.mrf.mxu0 }
 0x1b1   :  { %v2403_v63 = vadd.f32 %v6850_v44, %v2083_v37  ;;  %2661 = vrot.lane.b32.xlu0 %v2463_v39, %s5907_s13  ;;  %v6956_v37 = vld [vmem:[%s9083_s2 + $0x58] sm:$0xff]  ;;  %v2081_v39 = vmul.f32 0.35355338, %v1850_v48 }
 0x1b2   :  { %v5445_v38 = vpop.f32.mrf.mxu0  ;;  %vm2532_vm11 = vcmp.gt.f32.partialorder %v6956_v37, 0.0 }
 0x1b3   :  { %v2084_v58 = vmul.f32 0.35355338, %v5445_v38  ;;  %v2467_v45 = vadd.f32 %v2403_v63, %v6938_v24  ;;  %v2398_v63 = vadd.f32 %v6864_v40, %v2078_v31  ;;  %v6977_v40 = vpop.permute.xlu1 %2259  ;;  %v2401_v12 = vadd.f32 %v6854_v60, %v2081_v39 }
 0x1b4   :  { %v1853_v44 = vpop.f32.mrf.mxu0 }
 0x1b5   :  { %v2404_v57 = vadd.f32 %v6856_v56, %v2084_v58  ;;  %v2082_v0 = vmul.f32 0.35355338, %v1853_v44  ;;  %2657 = vrot.lane.b32.xlu0 %v2461_v41, %s5907_s13  ;;  %2669 = vrot.lane.b32.xlu1 %v2467_v45, %s5907_s13  ;;  %v6968_v56 = vld [vmem:[%s9083_s2 + $0x28] sm:$0xff]  ;;  %v6970_v58 = vpop.permute.xlu0 %2269 }
 0x1b6   :  { %v5448_v15 = vpop.f32.mrf.mxu0  ;;  %v6975_v45 = vld [vmem:[%s9083_s2 + $0x48] sm:$0xff]  ;;  %v2462_v48 = vadd.f32 %v2398_v63, %v6968_v56  ;;  %vm2526_vm12 = vcmp.gt.f32.partialorder %v6968_v56, 0.0 }
 0x1b7   :  { %v2402_v38 = vadd.f32 %v6858_v29, %v2082_v0  ;;  %v2087_v19 = vmul.f32 0.35355338, %v5448_v15  ;;  %v2468_v46 = vadd.f32 %v2404_v57, %v6956_v37  ;;  %v6988_v15 = vld [vmem:[%s9083_s2 + $0x40] sm:$0xff]  ;;  %v6999_v63 = vpop.permute.xlu1 %2267  ;;  %vm2530_vm13 = vcmp.gt.f32.partialorder %v6975_v45, 0.0 }
 0x1b8   :  { %v1866_v41 = vpop.f32.mrf.mxu0  ;;  %vm2529_vm14 = vcmp.gt.f32.partialorder %v6988_v15, 0.0 }
 0x1b9   :  { %2663 = vrot.lane.b32.xlu0 %v2464_v35, %s5907_s13  ;;  %2671 = vrot.lane.b32.xlu1 %v2468_v46, %s5907_s13  ;;  %v2407_v31 = vadd.f32 %v6860_v18, %v2087_v19  ;;  %v2085_v44 = vmul.f32 0.35355338, %v1866_v41  ;;  %v2466_v57 = vadd.f32 %v2402_v38, %v6975_v45  ;;  %v6993_v46 = vld [vmem:[%s9083_s2 + $0x70] sm:$0xff]  ;;  %v6997_v60 = vpop.permute.xlu0 %2265  ;;  %v2465_v38 = vadd.f32 %v2401_v12, %v6988_v15 }
 0x1ba   :  { %v5449_v29 = vpop.f32.mrf.mxu0  ;;  %vm2535_vm15 = vcmp.gt.f32.partialorder %v6993_v46, 0.0 }
 0x1bb   :  { %v2088_v19 = vmul.f32 0.35355338, %v5449_v29  ;;  %v2405_v35 = vadd.f32 %v6862_v17, %v2085_v44  ;;  %v2471_v41 = vadd.f32 %v2407_v31, %v6993_v46  ;;  %v118_v29 = vld [vmem:[%s9083_s2 + $0x90] sm:$0xff] }
 0x1bc   :  { %v1869_v0 = vpop.f32.mrf.mxu0 }
 0x1bd   :  { %2659 = vrot.lane.b32.xlu0 %v2462_v48, %s5907_s13  ;;  %2667 = vrot.lane.b32.xlu1 %v2466_v57, %s5907_s13  ;;  %v7007_v48 = vld [vmem:[%s9083_s2 + $0x60] sm:$0xff]  ;;  %v2408_v17 = vadd.f32 %v6866_v23, %v2088_v19  ;;  %v2086_v12 = vmul.f32 0.35355338, %v1869_v0  ;;  %v7026_v23 = vpop.permute.xlu1 %2285 }
 0x1be   :  { %v5452_v18 = vpop.f32.mrf.mxu0  ;;  %v2469_v28 = vadd.f32 %v2405_v35, %v7007_v48  ;;  %vm2533_vm1 = vcmp.gt.f32.partialorder %v7007_v48, 0.0 }
 0x1bf   :  { %v2091_v39 = vmul.f32 0.35355338, %v5452_v18  ;;  %v2472_v0 = vadd.f32 %v2408_v17, %v115_v13 }
 0x1c0   :  { %v1882_v20 = vpop.f32.mrf.mxu0 }
 0x1c1   :  { %v2411_v57 = vadd.f32 %v6868_v1, %v2091_v39  ;;  %v2089_v47 = vmul.f32 0.35355338, %v1882_v20  ;;  %2665 = vrot.lane.b32.xlu0 %v2465_v38, %s5907_s13  ;;  %2677 = vrot.lane.b32.xlu1 %v2471_v41, %s5907_s13  ;;  %v7021_v1 = vpop.permute.xlu0 %2271  ;;  %v116_v39 = vld [vmem:[%s9083_s2 + $0x80] sm:$0xff] }
 0x1c2   :  { %v5453_v31 = vpop.f32.mrf.mxu0 }
 0x1c3   :  { %v2409_v44 = vadd.f32 %v6872_v33, %v2089_v47  ;;  %v2092_v18 = vmul.f32 0.35355338, %v5453_v31  ;;  %v2475_v6 = vadd.f32 %v2411_v57, %v118_v29  ;;  %v2406_v47 = vadd.f32 %v6870_v62, %v2086_v12  ;;  %v113_v29 = vld [vmem:[%s9083_s2 + $0x68] sm:$0xff]  ;;  %v7042_v62 = vpop.permute.xlu1 %2287 }
 0x1c4   :  { %v1885_v20 = vpop.f32.mrf.mxu0 }
 0x1c5   :  { %2673 = vrot.lane.b32.xlu1 %v2469_v28, %s5907_s13  ;;  %2685 = vrot.lane.b32.xlu0 %v2475_v6, %s5907_s13  ;;  %v2412_v19 = vadd.f32 %v6876_v53, %v2092_v18  ;;  %v2090_v35 = vmul.f32 0.35355338, %v1885_v20  ;;  %v2473_v41 = vadd.f32 %v2409_v44, %v116_v39  ;;  %v119_v28 = vld [vmem:[%s9083_s2 + $0x98] sm:$0xff]  ;;  %v7040_v6 = vpop.permute.xlu0 %2277  ;;  %v2470_v53 = vadd.f32 %v2406_v47, %v113_v29  ;;  %v117_v20 = vld [vmem:[%s9083_s2 + $0x88] sm:$0xff] }
 0x1c6   :  { %v5456_v33 = vpop.f32.mrf.mxu0  ;;  %v122_v39 = vld [vmem:[%s9083_s2 + $0xb0] sm:$0xff] }
 0x1c7   :  { %v2095_v38 = vmul.f32 0.35355338, %v5456_v33  ;;  %v2410_v17 = vadd.f32 %v6874_v30, %v2090_v35  ;;  %v2476_v44 = vadd.f32 %v2412_v19, %v119_v28  ;;  %v126_v29 = vld [vmem:[%s9083_s2 + $0xd0] sm:$0xff] }
 0x1c8   :  { %v1898_v57 = vpop.f32.mrf.mxu0 }
 0x1c9   :  { %2679 = vrot.lane.b32.xlu1 %v2472_v0, %s5907_s13  ;;  %2681 = vrot.lane.b32.xlu0 %v2473_v41, %s5907_s13  ;;  %v2415_v12 = vadd.f32 %v6880_v51, %v2095_v38  ;;  %v2093_v31 = vmul.f32 0.35355338, %v1898_v57  ;;  %v2474_v0 = vadd.f32 %v2410_v17, %v117_v20  ;;  %v7055_v35 = vpop.permute.xlu0 %2273  ;;  %v120_v41 = vld [vmem:[%s9083_s2 + $0xa0] sm:$0xff]  ;;  %v7063_v57 = vpop.permute.xlu1 %2283 }
 0x1ca   :  { %v5457_v13 = vpop.f32.mrf.mxu0 }
 0x1cb   :  { %v2096_v47 = vmul.f32 0.35355338, %v5457_v13  ;;  %v2413_v30 = vadd.f32 %v6884_v61, %v2093_v31  ;;  %v2479_v19 = vadd.f32 %v2415_v12, %v122_v39 }
 0x1cc   :  { %v1901_v18 = vpop.f32.mrf.mxu0 }
 0x1cd   :  { %2675 = vrot.lane.b32.xlu1 %v2470_v53, %s5907_s13  ;;  %2687 = vrot.lane.b32.xlu0 %v2476_v44, %s5907_s13  ;;  %v2416_v61 = vadd.f32 %v6900_v21, %v2096_v47  ;;  %v2094_v13 = vmul.f32 0.35355338, %v1901_v18  ;;  %v2477_v12 = vadd.f32 %v2413_v30, %v120_v41  ;;  %v123_v44 = vld [vmem:[%s9083_s2 + $0xb8] sm:$0xff]  ;;  %v7078_v21 = vpop.permute.xlu0 %2279 }
 0x1ce   :  { %v5460_v33 = vpop.f32.mrf.mxu0 }
 0x1cf   :  { %v2099_v51 = vmul.f32 0.35355338, %v5460_v33  ;;  %v2414_v18 = vadd.f32 %v6919_v4, %v2094_v13  ;;  %v2480_v30 = vadd.f32 %v2416_v61, %v123_v44  ;;  %v124_v44 = vld [vmem:[%s9083_s2 + $0xc0] sm:$0xff] }
 0x1d0   :  { %v1914_v38 = vpop.f32.mrf.mxu0 }
 0x1d1   :  { %v2419_v28 = vadd.f32 %v6878_v10, %v2099_v51  ;;  %2683 = vrot.lane.b32.xlu1 %v2474_v0, %s5907_s13  ;;  %2693 = vrot.lane.b32.xlu0 %v2479_v19, %s5907_s13  ;;  %v127_v10 = vld [vmem:[%s9083_s2 + $0xd8] sm:$0xff]  ;;  %v7081_v51 = vpop.permute.xlu1 %2293  ;;  %v2097_v0 = vmul.f32 0.35355338, %v1914_v38 }
 0x1d2   :  { %v5461_v53 = vpop.f32.mrf.mxu0 }
 0x1d3   :  { %v2100_v17 = vmul.f32 0.35355338, %v5461_v53  ;;  %v2483_v31 = vadd.f32 %v2419_v28, %v126_v29  ;;  %v125_v53 = vld [vmem:[%s9083_s2 + $0xc8] sm:$0xff]  ;;  %v2417_v38 = vadd.f32 %v6942_v27, %v2097_v0  ;;  %v128_v0 = vld [vmem:[%s9083_s2 + $0xe0] sm:$0xff] }
 0x1d4   :  { %v1917_v20 = vpop.f32.mrf.mxu0 }
 0x1d5   :  { %v2420_v39 = vadd.f32 %v6882_v59, %v2100_v17  ;;  %v2098_v33 = vmul.f32 0.35355338, %v1917_v20  ;;  %2689 = vrot.lane.b32.xlu0 %v2477_v12, %s5907_s13  ;;  %2701 = vrot.lane.b32.xlu1 %v2483_v31, %s5907_s13  ;;  %v121_v59 = vld [vmem:[%s9083_s2 + $0xa8] sm:$0xff]  ;;  %v7094_v12 = vpop.permute.xlu0 %2275  ;;  %v130_v20 = vld [vmem:[%s9083_s2 + $0xf0] sm:$0xff] }
 0x1d6   :  { %v5464_v47 = vpop.f32.mrf.mxu0  ;;  %v2478_v61 = vadd.f32 %v2414_v18, %v121_v59  ;;  %v2481_v18 = vadd.f32 %v2417_v38, %v124_v44 }
 0x1d7   :  { %v2418_v19 = vadd.f32 %v6891_v5, %v2098_v33  ;;  %v2103_v41 = vmul.f32 0.35355338, %v5464_v47  ;;  %v2484_v29 = vadd.f32 %v2420_v39, %v127_v10  ;;  %v7102_v10 = vpop.permute.xlu1 %2289 }
 0x1d8   :  { %v1930_v28 = vpop.f32.mrf.mxu0 }
 0x1d9   :  { %2695 = vrot.lane.b32.xlu0 %v2480_v30, %s5907_s13  ;;  %2703 = vrot.lane.b32.xlu1 %v2484_v29, %s5907_s13  ;;  %v2423_v5 = vadd.f32 %v6907_v22, %v2103_v41  ;;  %v2101_v13 = vmul.f32 0.35355338, %v1930_v28  ;;  %v2482_v17 = vadd.f32 %v2418_v19, %v125_v53  ;;  %v134_v19 = vld [vmem:[%s9083_s2 + $0x110] sm:$0xff] }
 0x1da   :  { %v5465_v4 = vpop.f32.mrf.mxu0 }
 0x1db   :  { %v2104_v22 = vmul.f32 0.35355338, %v5465_v4  ;;  %v2421_v39 = vadd.f32 %v6926_v3, %v2101_v13  ;;  %v2487_v47 = vadd.f32 %v2423_v5, %v130_v20  ;;  %v7116_v3 = vpop.permute.xlu0 %2281  ;;  %v7119_v4 = vpop.permute.xlu1 %2295 }
 0x1dc   :  { %v1933_v31 = vpop.f32.mrf.mxu0 }
 0x1dd   :  { %2691 = vrot.lane.b32.xlu0 %v2478_v61, %s5907_s13  ;;  %2699 = vrot.lane.b32.xlu1 %v2482_v17, %s5907_s13  ;;  %v2424_v59 = vadd.f32 %v6944_v54, %v2104_v22  ;;  %v2102_v28 = vmul.f32 0.35355338, %v1933_v31  ;;  %v2485_v5 = vadd.f32 %v2421_v39, %v128_v0  ;;  %v132_v17 = vld [vmem:[%s9083_s2 + $0x100] sm:$0xff] }
 0x1de   :  { %v5468_v27 = vpop.f32.mrf.mxu0 }
 0x1df   :  { %v2107_v33 = vmul.f32 0.35355338, %v5468_v27  ;;  %v2422_v54 = vadd.f32 %v6977_v40, %v2102_v28  ;;  %v7140_v0 = vpop.permute.xlu1 %2291  ;;  %v138_v28 = vld [vmem:[%s9083_s2 + $0x130] sm:$0xff] }
 0x1e0   :  { %v1946_v30 = vpop.f32.mrf.mxu0 }
 0x1e1   :  { %v2427_v41 = vadd.f32 %v6970_v58, %v2107_v33  ;;  %v2105_v29 = vmul.f32 0.35355338, %v1946_v30  ;;  %2697 = vrot.lane.b32.xlu0 %v2481_v18, %s5907_s13  ;;  %2709 = vrot.lane.b32.xlu1 %v2487_v47, %s5907_s13  ;;  %v131_v58 = vld [vmem:[%s9083_s2 + $0xf8] sm:$0xff]  ;;  %v129_v33 = vld [vmem:[%s9083_s2 + $0xe8] sm:$0xff]  ;;  %v7135_v18 = vpop.permute.xlu0 %2301 }
 0x1e2   :  { %v5469_v53 = vpop.f32.mrf.mxu0  ;;  %v135_v47 = vld [vmem:[%s9083_s2 + $0x118] sm:$0xff] }
 0x1e3   :  { %v2425_v61 = vadd.f32 %v6997_v60, %v2105_v29  ;;  %v2108_v38 = vmul.f32 0.35355338, %v5469_v53  ;;  %v2491_v13 = vadd.f32 %v2427_v41, %v134_v19  ;;  %v2488_v60 = vadd.f32 %v2424_v59, %v131_v58 }
 0x1e4   :  { %v1949_v44 = vpop.f32.mrf.mxu0 }
 0x1e5   :  { %2705 = vrot.lane.b32.xlu1 %v2485_v5, %s5907_s13  ;;  %2717 = vrot.lane.b32.xlu0 %v2491_v13, %s5907_s13  ;;  %v2489_v20 = vadd.f32 %v2425_v61, %v132_v17  ;;  %v2428_v22 = vadd.f32 %v7021_v1, %v2108_v38  ;;  %v2106_v27 = vmul.f32 0.35355338, %v1949_v44  ;;  %v2486_v1 = vadd.f32 %v2422_v54, %v129_v33  ;;  %v133_v61 = vld [vmem:[%s9083_s2 + $0x108] sm:$0xff]  ;;  %v7154_v38 = vpop.permute.xlu0 %2297  ;;  %v7156_v13 = vpop.permute.xlu1 %2299  ;;  %v136_v54 = vld [vmem:[%s9083_s2 + $0x120] sm:$0xff] }
 0x1e6   :  { %v5472_v31 = vpop.f32.mrf.mxu0  ;;  %v139_v33 = vld [vmem:[%s9083_s2 + $0x138] sm:$0xff] }
 0x1e7   :  { %v2111_v39 = vmul.f32 0.35355338, %v5472_v31  ;;  %v2492_v19 = vadd.f32 %v2428_v22, %v135_v47  ;;  %v2426_v41 = vadd.f32 %v6999_v63, %v2106_v27  ;;  %v142_v31 = vld [vmem:[%s9083_s2 + $0x150] sm:$0xff] }
 0x1e8   :  { %v1962_v30 = vpop.f32.mrf.mxu0 }
 0x1e9   :  { %2711 = vrot.lane.b32.xlu1 %v2488_v60, %s5907_s13  ;;  %2713 = vrot.lane.b32.xlu0 %v2489_v20, %s5907_s13  ;;  %v2431_v29 = vadd.f32 %v7040_v6, %v2111_v39  ;;  %v2109_v59 = vmul.f32 0.35355338, %v1962_v30  ;;  %v2490_v44 = vadd.f32 %v2426_v41, %v133_v61 }
 0x1ea   :  { %v5473_v40 = vpop.f32.mrf.mxu0 }
 0x1eb   :  { %v2112_v5 = vmul.f32 0.35355338, %v5473_v40  ;;  %v2495_v6 = vadd.f32 %v2431_v29, %v138_v28  ;;  %v2429_v58 = vadd.f32 %v7055_v35, %v2109_v59  ;;  %v7172_v40 = vpop.permute.xlu0 %2303 }
 0x1ec   :  { %v1965_v53 = vpop.f32.mrf.mxu0 }
 0x1ed   :  { %2707 = vrot.lane.b32.xlu1 %v2486_v1, %s5907_s13  ;;  %2719 = vrot.lane.b32.xlu0 %v2492_v19, %s5907_s13  ;;  %v2432_v22 = vadd.f32 %v7078_v21, %v2112_v5  ;;  %v2110_v35 = vmul.f32 0.35355338, %v1965_v53  ;;  %v2493_v39 = vadd.f32 %v2429_v58, %v136_v54  ;;  %v7177_v19 = vpop.permute.xlu1 %2317 }
 0x1ee   :  { %v5476_v63 = vpop.f32.mrf.mxu0 }
 0x1ef   :  { %v2115_v17 = vmul.f32 0.35355338, %v5476_v63  ;;  %v2496_v29 = vadd.f32 %v2432_v22, %v139_v33  ;;  %v2430_v59 = vadd.f32 %v7094_v12, %v2110_v35  ;;  %v7192_v12 = vpop.permute.xlu0 %2309  ;;  %v140_v22 = vld [vmem:[%s9083_s2 + $0x140] sm:$0xff]  ;;  %v146_v35 = vld [vmem:[%s9083_s2 + $0x170] sm:$0xff] }
 0x1f0   :  { %v1978_v60 = vpop.f32.mrf.mxu0 }
 0x1f1   :  { %v2435_v20 = vadd.f32 %v7026_v23, %v2115_v17  ;;  %2715 = vrot.lane.b32.xlu1 %v2490_v44, %s5907_s13  ;;  %2725 = vrot.lane.b32.xlu0 %v2495_v6, %s5907_s13  ;;  %v143_v23 = vld [vmem:[%s9083_s2 + $0x158] sm:$0xff]  ;;  %v2113_v53 = vmul.f32 0.35355338, %v1978_v60  ;;  %v137_v6 = vld [vmem:[%s9083_s2 + $0x128] sm:$0xff]  ;;  %v7194_v54 = vpop.permute.xlu1 %2319 }
 0x1f2   :  { %v5477_v27 = vpop.f32.mrf.mxu0 }
 0x1f3   :  { %v2499_v47 = vadd.f32 %v2435_v20, %v142_v31  ;;  %v2116_v30 = vmul.f32 0.35355338, %v5477_v27  ;;  %v2433_v31 = vadd.f32 %v7116_v3, %v2113_v53 }
 0x1f4   :  { %v1981_v1 = vpop.f32.mrf.mxu0 }
 0x1f5   :  { %v2436_v21 = vadd.f32 %v7042_v62, %v2116_v30  ;;  %v2114_v41 = vmul.f32 0.35355338, %v1981_v1  ;;  %2721 = vrot.lane.b32.xlu0 %v2493_v39, %s5907_s13  ;;  %2733 = vrot.lane.b32.xlu1 %v2499_v47, %s5907_s13  ;;  %v141_v62 = vld [vmem:[%s9083_s2 + $0x148] sm:$0xff]  ;;  %v2497_v47 = vadd.f32 %v2433_v31, %v140_v22  ;;  %v2306_v1 = vpop.permute.xlu0 %2305 }
 0x1f6   :  { %v5480_v28 = vpop.f32.mrf.mxu0 }
 0x1f7   :  { %v2500_v61 = vadd.f32 %v2436_v21, %v143_v23  ;;  %v2434_v5 = vadd.f32 %v7063_v57, %v2114_v41  ;;  %v2119_v63 = vmul.f32 0.35355338, %v5480_v28  ;;  %v2494_v57 = vadd.f32 %v2430_v59, %v137_v6  ;;  %v150_v21 = vld [vmem:[%s9083_s2 + $0x190] sm:$0xff] }
 0x1f8   :  { %v1994_v58 = vpop.f32.mrf.mxu0 }
 0x1f9   :  { %2727 = vrot.lane.b32.xlu0 %v2496_v29, %s5907_s13  ;;  %2735 = vrot.lane.b32.xlu1 %v2500_v61, %s5907_s13  ;;  %v2117_v17 = vmul.f32 0.35355338, %v1994_v58  ;;  %v2498_v60 = vadd.f32 %v2434_v5, %v141_v62  ;;  %v2439_v20 = vadd.f32 %v7081_v51, %v2119_v63  ;;  %v144_v51 = vld [vmem:[%s9083_s2 + $0x160] sm:$0xff]  ;;  %v7213_v29 = vpop.permute.xlu1 %2315  ;;  %v147_v5 = vld [vmem:[%s9083_s2 + $0x178] sm:$0xff] }
 0x1fa   :  { %v5481_v44 = vpop.f32.mrf.mxu0 }
 0x1fb   :  { %v2437_v39 = vadd.f32 %v7102_v10, %v2117_v17  ;;  %v2120_v33 = vmul.f32 0.35355338, %v5481_v44  ;;  %v2503_v30 = vadd.f32 %v2439_v20, %v146_v35  ;;  %v145_v35 = vld [vmem:[%s9083_s2 + $0x168] sm:$0xff] }
 0x1fc   :  { %v1997_v27 = vpop.f32.mrf.mxu0 }
 0x1fd   :  { %2723 = vrot.lane.b32.xlu0 %v2494_v57, %s5907_s13  ;;  %2731 = vrot.lane.b32.xlu1 %v2498_v60, %s5907_s13  ;;  %v2501_v28 = vadd.f32 %v2437_v39, %v144_v51  ;;  %v2440_v53 = vadd.f32 %v7119_v4, %v2120_v33  ;;  %v2118_v63 = vmul.f32 0.35355338, %v1997_v27  ;;  %v7228_v4 = vpop.permute.xlu0 %2311  ;;  %v7230_v31 = vpop.permute.xlu1 %2325  ;;  %v151_v27 = vld [vmem:[%s9083_s2 + $0x198] sm:$0xff] }
 0x1fe   :  { %v5484_v3 = vpop.f32.mrf.mxu0 }
 0x1ff   :  { %v2123_v23 = vmul.f32 0.35355338, %v5484_v3  ;;  %v2504_v44 = vadd.f32 %v2440_v53, %v147_v5  ;;  %v2438_v60 = vadd.f32 %v7140_v0, %v2118_v63  ;;  %v153_v5 = vld [vmem:[%s9083_s2 + $0x1a8] sm:$0xff]  ;;  %v158_v63 = vld [vmem:[%s9083_s2 + $0x1d0] sm:$0xff] }
 0x200   :  { %v2010_v41 = vpop.f32.mrf.mxu0 }
 0x201   :  { %v2443_v59 = vadd.f32 %v7135_v18, %v2123_v23  ;;  %v2121_v10 = vmul.f32 0.35355338, %v2010_v41  ;;  %2729 = vrot.lane.b32.xlu0 %v2497_v47, %s5907_s13  ;;  %2741 = vrot.lane.b32.xlu1 %v2503_v30, %s5907_s13  ;;  %v148_v18 = vld [vmem:[%s9083_s2 + $0x180] sm:$0xff]  ;;  %v2502_v0 = vadd.f32 %v2438_v60, %v145_v35  ;;  %v2308_v51 = vpop.permute.xlu0 %2307  ;;  %v149_v23 = vld [vmem:[%s9083_s2 + $0x188] sm:$0xff] }
 0x202   :  { %v5485_v61 = vpop.f32.mrf.mxu0 }
 0x203   :  { %v2507_v6 = vadd.f32 %v2443_v59, %v150_v21  ;;  %v2441_v62 = vadd.f32 %v7154_v38, %v2121_v10  ;;  %v2124_v58 = vmul.f32 0.35355338, %v5485_v61  ;;  %v152_v21 = vld [vmem:[%s9083_s2 + $0x1a0] sm:$0xff]  ;;  %v7249_v59 = vpop.permute.xlu1 %2321 }
 0x204   :  { %v2013_v17 = vpop.f32.mrf.mxu0 }
 0x205   :  { %2737 = vrot.lane.b32.xlu1 %v2501_v28, %s5907_s13  ;;  %2749 = vrot.lane.b32.xlu0 %v2507_v6, %s5907_s13  ;;  %v2505_v20 = vadd.f32 %v2441_v62, %v148_v18  ;;  %v2444_v38 = vadd.f32 %v7172_v40, %v2124_v58  ;;  %v2122_v22 = vmul.f32 0.35355338, %v2013_v17  ;;  %v2314_v18 = vpop.permute.xlu0 %2313 }
 0x206   :  { %v5488_v57 = vpop.f32.mrf.mxu0 }
 0x207   :  { %v2508_v47 = vadd.f32 %v2444_v38, %v151_v27  ;;  %v2442_v40 = vadd.f32 %v7156_v13, %v2122_v22  ;;  %v2127_v17 = vmul.f32 0.35355338, %v5488_v57  ;;  %v7262_v60 = vpop.permute.xlu1 %2327  ;;  %v156_v27 = vld [vmem:[%s9083_s2 + $0x1c0] sm:$0xff] }
 0x208   :  { %v2026_v39 = vpop.f32.mrf.mxu0 }
 0x209   :  { %v2125_v33 = vmul.f32 0.35355338, %v2026_v39  ;;  %2743 = vrot.lane.b32.xlu1 %v2504_v44, %s5907_s13  ;;  %2745 = vrot.lane.b32.xlu0 %v2505_v20, %s5907_s13  ;;  %v2506_v13 = vadd.f32 %v2442_v40, %v149_v23  ;;  %v2447_v57 = vadd.f32 %v7192_v12, %v2127_v17 }
 0x20a   :  { %v5489_v3 = vpop.f32.mrf.mxu0 }
 0x20b   :  { %v2445_v30 = vadd.f32 %v2306_v1, %v2125_v33 }
 0x20c   :  { %v2029_v41 = vpop.f32.mrf.mxu0 }
 0x20d   :  { %v2126_v10 = vmul.f32 0.35355338, %v2029_v41  ;;  %2739 = vrot.lane.b32.xlu1 %v2502_v0, %s5907_s13  ;;  %2751 = vrot.lane.b32.xlu0 %v2508_v47, %s5907_s13  ;;  %v2509_v1 = vadd.f32 %v2445_v30, %v152_v21  ;;  %v2128_v47 = vmul.f32 0.35355338, %v5489_v3  ;;  %v2324_v3 = vpop.permute.xlu1 %2323 }
 0x20e   :  { %v5492_v28 = vpop.f32.mrf.mxu0 }
 0x20f   :  { %v2446_v53 = vadd.f32 %v2308_v51, %v2126_v10  ;;  %v2131_v61 = vmul.f32 0.35355338, %v5492_v28  ;;  %v157_v10 = vld [vmem:[%s9083_s2 + $0x1c8] sm:$0xff] }
 0x210   :  { %v2042_v6 = vpop.f32.mrf.mxu0 }
 0x211   :  { %v2451_v62 = vadd.f32 %v7177_v19, %v2131_v61  ;;  %v2129_v58 = vmul.f32 0.35355338, %v2042_v6  ;;  %2747 = vrot.lane.b32.xlu1 %v2506_v13, %s5907_s13  ;;  %2753 = vrot.lane.b32.xlu0 %v2509_v1, %s5907_s13  ;;  %v2510_v20 = vadd.f32 %v2446_v53, %v153_v5  ;;  %v159_v19 = vld [vmem:[%s9083_s2 + $0x1d8] sm:$0xff] }
 0x212   :  { %v5493_v44 = vpop.f32.mrf.mxu0  ;;  %v155_v61 = vld [vmem:[%s9083_s2 + $0x1b8] sm:$0xff] }
 0x213   :  { %v2515_v38 = vadd.f32 %v2451_v62, %v158_v63  ;;  %v2449_v22 = vadd.f32 %v2314_v18, %v2129_v58  ;;  %v2132_v35 = vmul.f32 0.35355338, %v5493_v44 }
 0x214   :  { %v2045_v39 = vpop.f32.mrf.mxu0 }
 0x215   :  { %v2452_v33 = vadd.f32 %v7194_v54, %v2132_v35  ;;  %v2130_v0 = vmul.f32 0.35355338, %v2045_v39  ;;  %2755 = vrot.lane.b32.xlu0 %v2510_v20, %s5907_s13  ;;  %2765 = vrot.lane.b32.xlu1 %v2515_v38, %s5907_s13  ;;  %v2513_v30 = vadd.f32 %v2449_v22, %v156_v27  ;;  %v154_v54 = vld [vmem:[%s9083_s2 + $0x1b0] sm:$0xff] }
 0x216   :  { %v5496_v40 = vpop.f32.mrf.mxu0  ;;  %v2511_v53 = vadd.f32 %v2447_v57, %v154_v54 }
 0x217   :  { %v2516_v51 = vadd.f32 %v2452_v33, %v159_v19  ;;  %v2450_v23 = vadd.f32 %v7213_v29, %v2130_v0  ;;  %v2135_v21 = vmul.f32 0.35355338, %v5496_v40  ;;  %v2654_v41 = vpop.permute.xlu0 %2653  ;;  %v2448_v29 = vadd.f32 %v7228_v4, %v2128_v47 }
 0x218   :  { %v7282_v14 = vsel %vm2523_vm2, %v2654_v41, -3.4028235e+38  ;;  %v2058_v12 = vpop.f32.mrf.mxu0 }
 0x219   :  { %v2920_v28 = vsel %vm2905_vm3, %v7282_v14, -inf  ;;  %2761 = vrot.lane.b32.xlu0 %v2513_v30, %s5907_s13  ;;  %2767 = vrot.lane.b32.xlu1 %v2516_v51, %s5907_s13  ;;  %v2514_v5 = vadd.f32 %v2450_v23, %v157_v10  ;;  %v2455_v63 = vadd.f32 %v7230_v31, %v2135_v21  ;;  %v2133_v6 = vmul.f32 0.35355338, %v2058_v12 }
 0x21a   :  { %v2921_v13 = vrot.slane %v2920_v28, 4  ;;  %v5497_v1 = vpop.f32.mrf.mxu0  ;;  %v2512_v31 = vadd.f32 %v2448_v29, %v155_v61  ;;  %v161_v29 = vld [vmem:[%s9083_s2 + $0x1e8] sm:$0xff] }
 0x21b   :  { %v2650_v62 = vpop.permute.xlu0 %2649  ;;  %v2519_v35 = vadd.f32 %v2455_v63, %v162_v36  ;;  %v2453_v27 = vadd.f32 %v7249_v59, %v2133_v6  ;;  %v2136_v41 = vmul.f32 0.35355338, %v5497_v1 }
 0x21c   :  { %v2922_v58 = vmax.f32 %v2920_v28, %v2921_v13  ;;  %v7298_v4 = vsel %vm2521_vm4, %v2650_v62, -3.4028235e+38  ;;  %v2061_v18 = vpop.f32.mrf.mxu0 }
 0x21d   :  { %v2906_v17 = vsel %vm2905_vm3, %v7298_v4, -inf  ;;  %v2652_v44 = vpop.permute.xlu1 %2651  ;;  %2757 = vrot.lane.b32.xlu0 %v2511_v53, %s5907_s13  ;;  %2763 = vrot.lane.b32.xlu1 %v2514_v5, %s5907_s13  ;;  %v2134_v19 = vmul.f32 0.35355338, %v2061_v18  ;;  %v2517_v21 = vadd.f32 %v2453_v27, %v160_v7  ;;  %v2456_v63 = vadd.f32 %v7262_v60, %v2136_v41 }
 0x21e   :  { %v2923_v20 = vrot.slane %v2922_v58, 2  ;;  %v2907_v38 = vrot.slane %v2906_v17, 4  ;;  %v7307_v22 = vsel %vm2522_vm5, %v2652_v44, -3.4028235e+38 }
 0x21f   :  { %v2913_v39 = vsel %vm2905_vm3, %v7307_v22, -inf  ;;  %v2656_v33 = vpop.permute.xlu0 %2655  ;;  %v2454_v54 = vadd.f32 %v2324_v3, %v2134_v19 }
 0x220   :  { %v2924_v0 = vmax.f32 %v2922_v58, %v2923_v20  ;;  %v2908_v57 = vmax.f32 %v2906_v17, %v2907_v38  ;;  %v2914_v47 = vrot.slane %v2913_v39, 4  ;;  %v7315_v40 = vsel %vm2524_vm6, %v2656_v33, -3.4028235e+38  ;;  %v163_v17 = vld [vmem:[%s9083_s2 + $0x1f8] sm:$0xff] }
 0x221   :  { %v2927_v42 = vsel %vm2905_vm3, %v7315_v40, -inf  ;;  %2759 = vrot.lane.b32.xlu0 %v2512_v31, %s5907_s13  ;;  %2773 = vrot.lane.b32.xlu1 %v2519_v35, %s5907_s13  ;;  %v2518_v6 = vadd.f32 %v2454_v54, %v161_v29 }
 0x222   :  { %v2925_v59 = vrot.slane %v2924_v0, 1  ;;  %v2909_v30 = vrot.slane %v2908_v57, 2  ;;  %v2915_v51 = vmax.f32 %v2913_v39, %v2914_v47  ;;  %v2928_v23 = vrot.slane %v2927_v42, 4 }
 0x223   :  { %v2662_v10 = vpop.permute.xlu0 %2661  ;;  %v2520_v39 = vadd.f32 %v2456_v63, %v163_v17 }
 0x224   :  { %v2926_v12 = vmax.f32 %v2924_v0, %v2925_v59  ;;  %v2910_v28 = vmax.f32 %v2908_v57, %v2909_v30  ;;  %v2916_v13 = vrot.slane %v2915_v51, 2  ;;  %v2929_v53 = vmax.f32 %v2927_v42, %v2928_v23 }
 0x225   :  { %v7326_v61 = vsel %vm2527_vm7, %v2662_v10, -3.4028235e+38  ;;  %2769 = vrot.lane.b32.xlu1 %v2517_v21, %s5907_s13 }
 0x226   :  { %v3356_v55 = vsub.f32 %v7282_v14, %v2926_v12  ;;  %v2911_v3 = vrot.slane %v2910_v28, 1  ;;  %v2917_v1 = vmax.f32 %v2915_v51, %v2916_v13  ;;  %v2930_v5 = vrot.slane %v2929_v53, 2 }
 0x227   :  { %v2948_v62 = vsel %vm2905_vm3, %v7326_v61, -inf  ;;  %v2658_v36 = vpop.permute.xlu0 %2657  ;;  %v2670_v58 = vpop.permute.xlu1 %2669 }
 0x228   :  { %v3422_v18 = vmul.f32 1.442695, %v3356_v55  ;;  %v2912_v44 = vmax.f32 %v2910_v28, %v2911_v3  ;;  %v2918_v14 = vrot.slane %v2917_v1, 1  ;;  %v2931_v31 = vmax.f32 %v2929_v53, %v2930_v5 }
 0x229   :  { %v2949_v20 = vrot.slane %v2948_v62, 4  ;;  %v7342_v60 = vsel %vm2525_vm8, %v2658_v36, -3.4028235e+38  ;;  %v7346_v38 = vsel %vm2531_vm9, %v2670_v58, -3.4028235e+38  ;;  %2771 = vrot.lane.b32.xlu1 %v2518_v6, %s5907_s13 }
 0x22a   :  { %5563 = vpow2.f32 %v3422_v18  ;;  %v3354_v35 = vsub.f32 %v7298_v4, %v2912_v44  ;;  %v2919_v27 = vmax.f32 %v2917_v1, %v2918_v14  ;;  %v2932_v19 = vrot.slane %v2931_v31, 1 }
 0x22b   :  { %v2950_v33 = vmax.f32 %v2948_v62, %v2949_v20  ;;  %v2934_v25 = vsel %vm2905_vm3, %v7342_v60, -inf  ;;  %v2976_v24 = vsel %vm2905_vm3, %v7346_v38, -inf  ;;  %v2664_v0 = vpop.permute.xlu0 %2663  ;;  %v2672_v7 = vpop.permute.xlu1 %2671 }
 0x22c   :  { %v3418_v57 = vmul.f32 1.442695, %v3354_v35  ;;  %v3355_v47 = vsub.f32 %v7307_v22, %v2919_v27  ;;  %v2933_v42 = vmax.f32 %v2931_v31, %v2932_v19  ;;  %v2935_v59 = vrot.slane %v2934_v25, 4 }
 0x22d   :  { %v2951_v30 = vrot.slane %v2950_v33, 2  ;;  %v2977_v51 = vrot.slane %v2976_v24, 4  ;;  %v7359_v4 = vsel %vm2528_vm10, %v2664_v0, -3.4028235e+38  ;;  %v7363_v23 = vsel %vm2532_vm11, %v2672_v7, -3.4028235e+38  ;;  %2775 = vrot.lane.b32.xlu1 %v2520_v39, %s5907_s13 }
 0x22e   :  { %5565 = vpow2.f32 %v3418_v57  ;;  %v3420_v21 = vmul.f32 1.442695, %v3355_v47  ;;  %v3357_v41 = vsub.f32 %v7315_v40, %v2933_v42  ;;  %v2936_v54 = vmax.f32 %v2934_v25, %v2935_v59 }
 0x22f   :  { %v2952_v22 = vmax.f32 %v2950_v33, %v2951_v30  ;;  %v2978_v10 = vmax.f32 %v2976_v24, %v2977_v51  ;;  %v2955_v12 = vsel %vm2905_vm3, %v7359_v4, -inf  ;;  %v2983_v50 = vsel %vm2905_vm3, %v7363_v23, -inf  ;;  %v2660_v28 = vpop.permute.xlu0 %2659  ;;  %v2668_v1 = vpop.permute.xlu1 %2667 }
 0x230   :  { %5567 = vpow2.f32 %v3420_v21  ;;  %v3424_v37 = vmul.f32 1.442695, %v3357_v41  ;;  %v2937_v29 = vrot.slane %v2936_v54, 2  ;;  %v2956_v13 = vrot.slane %v2955_v12, 4 }
 0x231   :  { %v2953_v53 = vrot.slane %v2952_v22, 1  ;;  %v2979_v55 = vrot.slane %v2978_v10, 2  ;;  %v2984_v3 = vrot.slane %v2983_v50, 4  ;;  %v7373_v40 = vsel %vm2526_vm12, %v2660_v28, -3.4028235e+38 }
 0x232   :  { %5569 = vpow2.f32 %v3424_v37  ;;  %v2938_v5 = vmax.f32 %v2936_v54, %v2937_v29  ;;  %v2957_v63 = vmax.f32 %v2955_v12, %v2956_v13  ;;  %v2941_v6 = vsel %vm2905_vm3, %v7373_v40, -inf }
 0x233   :  { %v2954_v62 = vmax.f32 %v2952_v22, %v2953_v53  ;;  %v2980_v36 = vmax.f32 %v2978_v10, %v2979_v55  ;;  %v2985_v58 = vmax.f32 %v2983_v50, %v2984_v3  ;;  %v2942_v18 = vrot.slane %v2941_v6, 4  ;;  %v2666_v17 = vpop.permute.xlu0 %2665 }
 0x234   :  { %v2939_v44 = vrot.slane %v2938_v5, 1  ;;  %v2958_v14 = vrot.slane %v2957_v63, 2  ;;  %v7379_v31 = vsel %vm2530_vm13, %v2668_v1, -3.4028235e+38  ;;  %v7383_v56 = vsel %vm2529_vm14, %v2666_v17, -3.4028235e+38 }
 0x235   :  { %v3360_v20 = vsub.f32 %v7326_v61, %v2954_v62  ;;  %v2981_v35 = vrot.slane %v2980_v36, 1  ;;  %v2986_v27 = vrot.slane %v2985_v58, 2  ;;  %v2943_v19 = vmax.f32 %v2941_v6, %v2942_v18 }
 0x236   :  { %v2940_v39 = vmax.f32 %v2938_v5, %v2939_v44  ;;  %v2959_v33 = vmax.f32 %v2957_v63, %v2958_v14  ;;  %v2969_v25 = vsel %vm2905_vm3, %v7379_v31, -inf  ;;  %v2962_v24 = vsel %vm2905_vm3, %v7383_v56, -inf  ;;  %v2678_v5 = vpop.permute.xlu1 %2677 }
 0x237   :  { %v7390_v45 = vpop.eup %5563  ;;  %v3430_v0 = vmul.f32 1.442695, %v3360_v20  ;;  %v2982_v7 = vmax.f32 %v2980_v36, %v2981_v35  ;;  %v2987_v15 = vmax.f32 %v2985_v58, %v2986_v27  ;;  %v2944_v57 = vrot.slane %v2943_v19, 2 }
 0x238   :  { %v3560_v61 = vsel %vm2905_vm3, %v7390_v45, 0.0  ;;  %v3358_v47 = vsub.f32 %v7342_v60, %v2940_v39  ;;  %v2960_v42 = vrot.slane %v2959_v33, 1  ;;  %v2970_v59 = vrot.slane %v2969_v25, 4 }
 0x239   :  { %v3561_v30 = vrot.slane %v3560_v61, 4  ;;  %5571 = vpow2.f32 %v3430_v0  ;;  %v3364_v51 = vsub.f32 %v7346_v38, %v2982_v7  ;;  %v2988_v21 = vrot.slane %v2987_v15, 1 }
 0x23a   :  { %v3426_v41 = vmul.f32 1.442695, %v3358_v47  ;;  %v2961_v54 = vmax.f32 %v2959_v33, %v2960_v42  ;;  %v2945_v22 = vmax.f32 %v2943_v19, %v2944_v57  ;;  %v2971_v10 = vmax.f32 %v2969_v25, %v2970_v59  ;;  %v2674_v47 = vpop.permute.xlu1 %2673 }
 0x23b   :  { %v7397_v12 = vpop.eup %5565  ;;  %v3562_v50 = vadd.f32 %v3561_v30, %v3560_v61  ;;  %v3438_v28 = vmul.f32 1.442695, %v3364_v51  ;;  %v2989_v37 = vmax.f32 %v2987_v15, %v2988_v21  ;;  %v2963_v29 = vrot.slane %v2962_v24, 4 }
 0x23c   :  { %v3546_v60 = vsel %vm2905_vm3, %v7397_v12, 0.0  ;;  %5573 = vpow2.f32 %v3426_v41  ;;  %v3361_v38 = vsub.f32 %v7359_v4, %v2961_v54  ;;  %v2946_v13 = vrot.slane %v2945_v22, 1 }
 0x23d   :  { %v7403_v53 = vpop.eup %5567  ;;  %v3563_v55 = vrot.slane %v3562_v50, 2  ;;  %v3547_v3 = vrot.slane %v3546_v60, 4  ;;  %5575 = vpow2.f32 %v3438_v28  ;;  %v3365_v1 = vsub.f32 %v7363_v23, %v2989_v37 }
 0x23e   :  { %v3553_v63 = vsel %vm2905_vm3, %v7403_v53, 0.0  ;;  %v3432_v6 = vmul.f32 1.442695, %v3361_v38  ;;  %v2947_v62 = vmax.f32 %v2945_v22, %v2946_v13  ;;  %v2972_v36 = vrot.slane %v2971_v10, 2 }
 0x23f   :  { %v7408_v58 = vpop.eup %5569  ;;  %v3564_v18 = vadd.f32 %v3563_v55, %v3562_v50  ;;  %v3548_v17 = vadd.f32 %v3547_v3, %v3546_v60  ;;  %v3554_v4 = vrot.slane %v3553_v63, 4  ;;  %v3440_v44 = vmul.f32 1.442695, %v3365_v1 }
 0x240   :  { %v3567_v14 = vsel %vm2905_vm3, %v7408_v58, 0.0  ;;  %5577 = vpow2.f32 %v3432_v6  ;;  %v3359_v20 = vsub.f32 %v7373_v40, %v2947_v62  ;;  %v2973_v23 = vmax.f32 %v2971_v10, %v2972_v36 }
 0x241   :  { %v3565_v35 = vrot.slane %v3564_v18, 1  ;;  %v3549_v27 = vrot.slane %v3548_v17, 2  ;;  %v3555_v19 = vadd.f32 %v3554_v4, %v3553_v63  ;;  %v3568_v39 = vrot.slane %v3567_v14, 4 }
 0x242   :  { %5579 = vpow2.f32 %v3440_v44  ;;  %v3428_v33 = vmul.f32 1.442695, %v3359_v20  ;;  %v2974_v25 = vrot.slane %v2973_v23, 1  ;;  %v2964_v0 = vmax.f32 %v2962_v24, %v2963_v29 }
 0x243   :  { %v3566_v7 = vadd.f32 %v3565_v35, %v3564_v18  ;;  %v3550_v15 = vadd.f32 %v3549_v27, %v3548_v17  ;;  %v3556_v57 = vrot.slane %v3555_v19, 2  ;;  %v3569_v61 = vadd.f32 %v3568_v39, %v3567_v14 }
 0x244   :  { %5581 = vpow2.f32 %v3428_v33  ;;  %v2975_v42 = vmax.f32 %v2973_v23, %v2974_v25  ;;  %v2965_v59 = vrot.slane %v2964_v0, 2  ;;  %v7415_v40 = vsel %vm2535_vm15, %v2678_v5, -3.4028235e+38 }
 0x245   :  { %v3996_v30 = vmax.f32 %v3566_v7, 1e-30  ;;  %v3551_v51 = vrot.slane %v3550_v15, 1  ;;  %v3557_v21 = vadd.f32 %v3556_v57, %v3555_v19  ;;  %v3570_v41 = vrot.slane %v3569_v61, 2 }
 0x246   :  { %v7417_v54 = vpop.eup %5571  ;;  %v3363_v24 = vsub.f32 %v7379_v31, %v2975_v42  ;;  %v2966_v22 = vmax.f32 %v2964_v0, %v2965_v59  ;;  %v3004_v10 = vsel %vm2905_vm3, %v7415_v40, -inf  ;;  %v7424_v50 = vsel %vm2533_vm1, %v2674_v47, -3.4028235e+38 }
 0x247   :  { %5583 = vrcp.f32 %v3996_v30  ;;  %v3552_v46 = vadd.f32 %v3551_v51, %v3550_v15  ;;  %v3558_v28 = vrot.slane %v3557_v21, 1  ;;  %v3571_v37 = vadd.f32 %v3570_v41, %v3569_v61 }
 0x248   :  { %v3588_v29 = vsel %vm2905_vm3, %v7417_v54, 0.0  ;;  %v3436_v60 = vmul.f32 1.442695, %v3363_v24  ;;  %v2967_v38 = vrot.slane %v2966_v22, 1  ;;  %v3005_v13 = vrot.slane %v3004_v10, 4 }
 0x249   :  { %v7428_v55 = vpop.eup %5573  ;;  %v3994_v31 = vmax.f32 %v3552_v46, 1e-30  ;;  %v3559_v3 = vadd.f32 %v3558_v28, %v3557_v21  ;;  %v3572_v1 = vrot.slane %v3571_v37, 1  ;;  %v3589_v5 = vrot.slane %v3588_v29, 4 }
 0x24a   :  { %v7430_v63 = vpop.eup %5575  ;;  %v3574_v48 = vsel %vm2905_vm3, %v7428_v55, 0.0  ;;  %5585 = vpow2.f32 %v3436_v60  ;;  %v2968_v6 = vmax.f32 %v2966_v22, %v2967_v38  ;;  %v3006_v62 = vmax.f32 %v3004_v10, %v3005_v13 }
 0x24b   :  { %5587 = vrcp.f32 %v3994_v31  ;;  %v3995_v36 = vmax.f32 %v3559_v3, 1e-30  ;;  %v3573_v18 = vadd.f32 %v3572_v1, %v3571_v37  ;;  %v3590_v17 = vadd.f32 %v3589_v5, %v3588_v29 }
 0x24c   :  { %v3575_v4 = vrot.slane %v3574_v48, 4  ;;  %v3616_v44 = vsel %vm2905_vm3, %v7430_v63, 0.0  ;;  %v3362_v14 = vsub.f32 %v7383_v56, %v2968_v6  ;;  %v3007_v20 = vrot.slane %v3006_v62, 2 }
 0x24d   :  { %v7437_v23 = vpop.eup %5577  ;;  %5589 = vrcp.f32 %v3995_v36  ;;  %v3997_v35 = vmax.f32 %v3573_v18, 1e-30  ;;  %v3591_v27 = vrot.slane %v3590_v17, 2  ;;  %v3617_v19 = vrot.slane %v3616_v44, 4 }
 0x24e   :  { %v3576_v39 = vadd.f32 %v3575_v4, %v3574_v48  ;;  %v3595_v33 = vsel %vm2905_vm3, %v7437_v23, 0.0  ;;  %v3434_v25 = vmul.f32 1.442695, %v3362_v14  ;;  %v3008_v0 = vmax.f32 %v3006_v62, %v3007_v20 }
 0x24f   :  { %v7441_v7 = vpop.eup %5579  ;;  %5591 = vrcp.f32 %v3997_v35  ;;  %v3592_v15 = vadd.f32 %v3591_v27, %v3590_v17  ;;  %v3618_v57 = vadd.f32 %v3617_v19, %v3616_v44  ;;  %v3596_v61 = vrot.slane %v3595_v33, 4 }
 0x250   :  { %v3577_v56 = vrot.slane %v3576_v39, 2  ;;  %v3623_v47 = vsel %vm2905_vm3, %v7441_v7, 0.0  ;;  %5593 = vpow2.f32 %v3434_v25  ;;  %v3009_v42 = vrot.slane %v3008_v0, 1 }
 0x251   :  { %v7445_v59 = vpop.eup %5581  ;;  %v3593_v30 = vrot.slane %v3592_v15, 1  ;;  %v3619_v51 = vrot.slane %v3618_v57, 2  ;;  %v3597_v21 = vadd.f32 %v3596_v61, %v3595_v33  ;;  %v3624_v41 = vrot.slane %v3623_v47, 4 }
 0x252   :  { %v3578_v24 = vadd.f32 %v3577_v56, %v3576_v39  ;;  %v3581_v22 = vsel %vm2905_vm3, %v7445_v59, 0.0  ;;  %v3010_v10 = vmax.f32 %v3008_v0, %v3009_v42  ;;  %v7452_v3 = vsel %vm2905_vm3, %v7424_v50, -inf  ;;  %v7469_v42 = vld [vmem:[%s9083_s2 + $0x90] sm:$0xff] }
 0x253   :  { %v3594_v46 = vadd.f32 %v3593_v30, %v3592_v15  ;;  %v3620_v28 = vadd.f32 %v3619_v51, %v3618_v57  ;;  %v3598_v37 = vrot.slane %v3597_v21, 2  ;;  %v3625_v29 = vadd.f32 %v3624_v41, %v3623_v47 }
 0x254   :  { %v5584_v60 = vpop.eup %5583  ;;  %v3579_v38 = vrot.slane %v3578_v24, 1  ;;  %v3582_v13 = vrot.slane %v3581_v22, 4  ;;  %v3368_v31 = vsub.f32 %v7415_v40, %v3010_v10  ;;  %v5819_v40 = vld [vmem:[%s9083_s2 + $0x10] sm:$0xff]  ;;  %vm2539_vm2 = vcmp.gt.f32.partialorder %v7469_v42, 0.0 }
 0x255   :  { %v4124_v1 = vmul.f32 %v5584_v60, %v7390_v45  ;;  %v4000_v5 = vmax.f32 %v3594_v46, 1e-30  ;;  %v3621_v48 = vrot.slane %v3620_v28, 1  ;;  %v3599_v6 = vadd.f32 %v3598_v37, %v3597_v21  ;;  %v5822_v37 = vld [vmem:[%s9083_s2 + $0x8] sm:$0xff] }
 0x256   :  { %v3580_v62 = vadd.f32 %v3579_v38, %v3578_v24  ;;  %v3626_v36 = vrot.slane %v3625_v29, 2  ;;  %v3583_v18 = vadd.f32 %v3582_v13, %v3581_v22  ;;  %v7455_v17 = vmul.f32 1.442695, %v3368_v31 }
 0x257   :  { %v7457_v4 = vpop.eup %5585  ;;  %v4188_v44 = vmul.f32 %v5819_v40, %v4124_v1  ;;  %5595 = vrcp.f32 %v4000_v5  ;;  %v3622_v14 = vadd.f32 %v3621_v48, %v3620_v28  ;;  %v3600_v20 = vrot.slane %v3599_v6, 1 }
 0x258   :  { %v5588_v35 = vpop.eup %5587  ;;  %v3998_v45 = vmax.f32 %v3580_v62, 1e-30  ;;  %v3627_v27 = vadd.f32 %v3626_v36, %v3625_v29  ;;  %v3584_v19 = vrot.slane %v3583_v18, 2  ;;  %v3609_v39 = vsel %vm2905_vm3, %v7457_v4, 0.0 }
 0x259   :  { %v4252_v33 = vmul.f32 %v6128_v2, %v4188_v44  ;;  %v4122_v25 = vmul.f32 %v5588_v35, %v7397_v12  ;;  %v4004_v0 = vmax.f32 %v3622_v14, 1e-30  ;;  %v3601_v15 = vadd.f32 %v3600_v20, %v3599_v6  ;;  %v5821_v2 = vld [vmem:[%s9083_s2] sm:$0xff] }
 0x25a   :  { %v5590_v57 = vpop.eup %5589  ;;  %5597 = vrcp.f32 %v3998_v45  ;;  %v3628_v61 = vrot.slane %v3627_v27, 1  ;;  %v3585_v56 = vadd.f32 %v3584_v19, %v3583_v18  ;;  %v3610_v47 = vrot.slane %v3609_v39, 4  ;;  %v2686_v45 = vpop.permute.xlu0 %2685 }
 0x25b   :  { %v4328_v30 = vsel %vm2905_vm3, %v4252_v33, 0.0  ;;  %v4186_v12 = vmul.f32 %v5821_v2, %v4122_v25  ;;  %v4123_v51 = vmul.f32 %v5590_v57, %v7403_v53  ;;  %5599 = vrcp.f32 %v4004_v0 }
 0x25c   :  { %v5592_v21 = vpop.eup %5591  ;;  %v4329_v41 = vrot.slane %v4328_v30, 4  ;;  %v4001_v24 = vmax.f32 %v3601_v15, 1e-30  ;;  %v3629_v22 = vadd.f32 %v3628_v61, %v3627_v27  ;;  %v3586_v10 = vrot.slane %v3585_v56, 1 }
 0x25d   :  { %v7477_v46 = vpop.eup %5593  ;;  %v4250_v28 = vmul.f32 %v4186_v12, %v6137_v8  ;;  %v4187_v29 = vmul.f32 %v5822_v37, %v4123_v51  ;;  %v4125_v60 = vmul.f32 %v5592_v21, %v7408_v58  ;;  %v3611_v38 = vadd.f32 %v3610_v47, %v3609_v39  ;;  %v5823_v8 = vld [vmem:[%s9083_s2 + $0x18] sm:$0xff]  ;;  %v7515_v21 = vld [vmem:[%s9083_s2 + $0x80] sm:$0xff]  ;;  %v2680_v37 = vpop.permute.xlu1 %2679 }
 0x25e   :  { %v4330_v13 = vadd.f32 %v4329_v41, %v4328_v30  ;;  %5601 = vrcp.f32 %v4001_v24  ;;  %v4005_v53 = vmax.f32 %v3629_v22, 1e-30  ;;  %v3587_v31 = vadd.f32 %v3586_v10, %v3585_v56 }
 0x25f   :  { %v4314_v1 = vsel %vm2905_vm3, %v4250_v28, 0.0  ;;  %v4251_v5 = vmul.f32 %v4187_v29, %v6161_v26  ;;  %v4189_v48 = vmul.f32 %v5823_v8, %v4125_v60  ;;  %v3612_v6 = vrot.slane %v3611_v38, 2  ;;  %v2682_v29 = vpop.permute.xlu0 %2681  ;;  %v5826_v60 = vld [vmem:[%s9083_s2 + $0x30] sm:$0xff] }
 0x260   :  { %v4315_v62 = vrot.slane %v4314_v1, 4  ;;  %5603 = vrcp.f32 %v4005_v53  ;;  %v3999_v36 = vmax.f32 %v3587_v31, 1e-30  ;;  %v2991_v58 = vrot.slane %v7452_v3, 4 }
 0x261   :  { %v4321_v18 = vsel %vm2905_vm3, %v4251_v5, 0.0  ;;  %v4253_v40 = vmul.f32 %v6149_v16, %v4189_v48  ;;  %v3613_v44 = vadd.f32 %v3612_v6, %v3611_v38  ;;  %v3602_v14 = vsel %vm2905_vm3, %v7477_v46, 0.0  ;;  %v5828_v6 = vld [vmem:[%s9083_s2 + $0x50] sm:$0xff] }
 0x262   :  { %v4331_v26 = vrot.slane %v4330_v13, 2  ;;  %v4316_v20 = vadd.f32 %v4315_v62, %v4314_v1  ;;  %v4322_v35 = vrot.slane %v4321_v18, 4  ;;  %5605 = vrcp.f32 %v3999_v36 }
 0x263   :  { %v4335_v27 = vsel %vm2905_vm3, %v4253_v40, 0.0  ;;  %v3614_v19 = vrot.slane %v3613_v44, 1  ;;  %v3603_v39 = vrot.slane %v3602_v14, 4  ;;  %5607 = vpow2.f32 %v7455_v17  ;;  %v7507_v17 = vld [vmem:[%s9083_s2 + $0x78] sm:$0xff] }
 0x264   :  { %v5596_v33 = vpop.eup %5595  ;;  %v4317_v25 = vrot.slane %v4316_v20, 2  ;;  %v4323_v0 = vadd.f32 %v4322_v35, %v4321_v18  ;;  %v4336_v15 = vrot.slane %v4335_v27, 4  ;;  %v2992_v16 = vmax.f32 %v7452_v3, %v2991_v58 }
 0x265   :  { %v4128_v57 = vmul.f32 %v5596_v33, %v7417_v54  ;;  %v3615_v61 = vadd.f32 %v3614_v19, %v3613_v44  ;;  %v3604_v56 = vadd.f32 %v3603_v39, %v3602_v14  ;;  %v7500_v47 = vsel %vm2539_vm2, %v2686_v45, -3.4028235e+38  ;;  %v7551_v19 = vld [vmem:[%s9083_s2 + $0x68] sm:$0xff] }
 0x266   :  { %v7502_v30 = vadd.f32 %v4317_v25, %v4316_v20  ;;  %v2993_v2 = vrot.slane %v2992_v16, 2  ;;  %vm2536_vm4 = vcmp.gt.f32.partialorder %v7507_v17, 0.0  ;;  %v3032_v54 = vsel %vm2905_vm3, %v7500_v47, -inf }
 0x267   :  { %v5598_v12 = vpop.eup %5597  ;;  %v4003_v3 = vmax.f32 %v3615_v61, 1e-30  ;;  %v3605_v51 = vrot.slane %v3604_v56, 2  ;;  %vm2537_vm5 = vcmp.gt.f32.partialorder %v7515_v21, 0.0  ;;  %v7518_v24 = vadd.f32 %v4331_v26, %v4330_v13  ;;  %v5827_v13 = vld [vmem:[%s9083_s2 + $0x20] sm:$0xff] }
 0x268   :  { %v5600_v41 = vpop.eup %5599  ;;  %v4324_v22 = vrot.slane %v4323_v0, 2  ;;  %v7520_v10 = vadd.f32 %v4336_v15, %v4335_v27  ;;  %v4126_v28 = vmul.f32 %v5598_v12, %v7428_v55  ;;  %v4192_v38 = vmul.f32 %v5826_v60, %v4128_v57 }
 0x269   :  { %v4132_v53 = vmul.f32 %v5600_v41, %v7430_v63  ;;  %5609 = vrcp.f32 %v4003_v3  ;;  %v3606_v31 = vadd.f32 %v3605_v51, %v3604_v56  ;;  %v2994_v8 = vmax.f32 %v2992_v16, %v2993_v2  ;;  %v5830_v56 = vld [vmem:[%s9083_s2 + $0x38] sm:$0xff] }
 0x26a   :  { %v4190_v5 = vmul.f32 %v5827_v13, %v4126_v28  ;;  %v3033_v55 = vrot.slane %v3032_v54, 4  ;;  %v7536_v63 = vsel %vm2536_vm4, %v2680_v37, -3.4028235e+38  ;;  %v7540_v58 = vsel %vm2537_vm5, %v2682_v29, -3.4028235e+38  ;;  %v5831_v2 = vld [vmem:[%s9083_s2 + $0x58] sm:$0xff] }
 0x26b   :  { %v5602_v48 = vpop.eup %5601  ;;  %v4196_v62 = vmul.f32 %v5828_v6, %v4132_v53  ;;  %v3607_v36 = vrot.slane %v3606_v31, 1  ;;  %v2995_v44 = vrot.slane %v2994_v8, 1  ;;  %v7544_v20 = vadd.f32 %v4324_v22, %v4323_v0  ;;  %v7573_v51 = vld [vmem:[%s9083_s2 + $0x98] sm:$0xff]  ;;  %v5834_v29 = vld [vmem:[%s9083_s2 + $0x28] sm:$0xff] }
 0x26c   :  { %v4254_v18 = vmul.f32 %v4190_v5, %v6190_v43  ;;  %v4129_v40 = vmul.f32 %v5602_v48, %v7437_v23  ;;  %v3034_v14 = vmax.f32 %v3032_v54, %v3033_v55  ;;  %vm2534_vm6 = vcmp.gt.f32.partialorder %v7551_v19, 0.0  ;;  %v7579_v54 = vld [vmem:[%s9083_s2 + $0x88] sm:$0xff] }
 0x26d   :  { %v5604_v26 = vpop.eup %5603  ;;  %v4260_v45 = vmul.f32 %v6236_v9, %v4196_v62  ;;  %v3608_v27 = vadd.f32 %v3607_v36, %v3606_v31  ;;  %v2996_v39 = vmax.f32 %v2994_v8, %v2995_v44  ;;  %v3011_v33 = vsel %vm2905_vm3, %v7536_v63, -inf  ;;  %v2676_v31 = vpop.permute.xlu1 %2675 }
 0x26e   :  { %v4342_v43 = vsel %vm2905_vm3, %v4254_v18, 0.0  ;;  %v4133_v23 = vmul.f32 %v5604_v26, %v7441_v7  ;;  %v3035_v15 = vrot.slane %v3034_v14, 2  ;;  %v3018_v16 = vsel %vm2905_vm3, %v7540_v58, -inf }
 0x26f   :  { %v5606_v25 = vpop.eup %5605  ;;  %v4384_v0 = vsel %vm2905_vm3, %v4260_v45, 0.0  ;;  %v4002_v9 = vmax.f32 %v3608_v27, 1e-30  ;;  %v4193_v7 = vmul.f32 %v5830_v56, %v4129_v40  ;;  %vm2540_vm7 = vcmp.gt.f32.partialorder %v7573_v51, 0.0 }
 0x270   :  { %v7561_v57 = vpop.eup %5607  ;;  %v4385_v61 = vrot.slane %v4384_v0, 4  ;;  %v4197_v12 = vmul.f32 %v5831_v2, %v4133_v23  ;;  %v4127_v3 = vmul.f32 %v5606_v25, %v7445_v59  ;;  %vm2538_vm8 = vcmp.gt.f32.partialorder %v7579_v54, 0.0  ;;  %v9250_v23 = vld [vmem:[#allocation5_spill] sm:$0xff] }
 0x271   :  { %v4343_v41 = vrot.slane %v4342_v43, 4  ;;  %5611 = vrcp.f32 %v4002_v9  ;;  %v3644_v22 = vsel %vm2905_vm3, %v7561_v57, 0.0  ;;  %v3366_v59 = vsub.f32 %v7424_v50, %v2996_v39 }
 0x272   :  { %v4386_v28 = vadd.f32 %v4385_v61, %v4384_v0  ;;  %v4261_v37 = vmul.f32 %v6261_v32, %v4197_v12  ;;  %v4191_v60 = vmul.f32 %v5834_v29, %v4127_v3  ;;  %v3645_v53 = vrot.slane %v3644_v22, 4 }
 0x273   :  { %v3442_v13 = vmul.f32 1.442695, %v3366_v59  ;;  %v3036_v5 = vmax.f32 %v3034_v14, %v3035_v15  ;;  %v3012_v8 = vrot.slane %v3011_v33, 4  ;;  %v3019_v55 = vrot.slane %v3018_v16, 4  ;;  %v2684_v15 = vpop.permute.xlu1 %2683 }
 0x274   :  { %v7591_v6 = vmul.f32 %v6172_v34, %v4192_v38  ;;  %v4391_v50 = vsel %vm2905_vm3, %v4261_v37, 0.0  ;;  %v3646_v62 = vadd.f32 %v3645_v53, %v3644_v22  ;;  %v4387_v32 = vrot.slane %v4386_v28, 2 }
 0x275   :  { %5613 = vpow2.f32 %v3442_v13  ;;  %v3037_v36 = vrot.slane %v3036_v5, 1  ;;  %v3013_v18 = vmax.f32 %v3011_v33, %v3012_v8  ;;  %v7594_v44 = vadd.f32 %v4343_v41, %v4342_v43  ;;  %v2688_v43 = vpop.permute.xlu0 %2687  ;;  %v9251_v41 = vld [vmem:[#allocation7_spill] sm:$0xff]  ;;  %v7631_v13 = vld [vmem:[%s9083_s2 + $0xa0] sm:$0xff] }
 0x276   :  { %v5610_v40 = vpop.eup %5609  ;;  %v7597_v26 = vmul.f32 %v6205_v52, %v4193_v7  ;;  %v3647_v14 = vrot.slane %v3646_v62, 2  ;;  %v3020_v45 = vmax.f32 %v3018_v16, %v3019_v55  ;;  %v4392_v27 = vrot.slane %v4391_v50, 4  ;;  %v5835_v52 = vld [vmem:[%s9083_s2 + $0x48] sm:$0xff] }
 0x277   :  { %v4255_v39 = vmul.f32 %v4191_v60, %v9250_v23  ;;  %v4131_v34 = vmul.f32 %v5610_v40, %v7457_v4  ;;  %v3038_v38 = vmax.f32 %v3036_v5, %v3037_v36  ;;  %v3014_v0 = vrot.slane %v3013_v18, 2 }
 0x278   :  { %v3648_v25 = vadd.f32 %v3647_v14, %v3646_v62  ;;  %v3021_v9 = vrot.slane %v3020_v45, 2  ;;  %v7603_v33 = vsel %vm2534_vm6, %v2676_v31, -3.4028235e+38  ;;  %v7605_v61 = vadd.f32 %v4387_v32, %v4386_v28  ;;  %v7625_v31 = vld [vmem:[%s9083_s2 + $0xb0] sm:$0xff] }
 0x279   :  { %v4195_v16 = vmul.f32 %v5835_v52, %v4131_v34  ;;  %v3372_v56 = vsub.f32 %v7500_v47, %v3038_v38  ;;  %v2997_v4 = vsel %vm2905_vm3, %v7603_v33, -inf  ;;  %v3015_v2 = vmax.f32 %v3013_v18, %v3014_v0  ;;  %v2694_v14 = vpop.permute.xlu0 %2693 }
 0x27a   :  { %v3649_v7 = vrot.slane %v3648_v25, 1  ;;  %v3022_v12 = vmax.f32 %v3020_v45, %v3021_v9  ;;  %v2998_v3 = vrot.slane %v2997_v4, 4  ;;  %v7616_v28 = vsel %vm2540_vm7, %v2688_v43, -3.4028235e+38 }
 0x27b   :  { %v4259_v22 = vmul.f32 %v4195_v16, %v9251_v41  ;;  %v3454_v59 = vmul.f32 1.442695, %v3372_v56  ;;  %v7620_v37 = vsel %vm2538_vm8, %v2684_v15, -3.4028235e+38  ;;  %v3016_v47 = vrot.slane %v3015_v2, 1  ;;  %v5838_v15 = vld [vmem:[%s9083_s2 + $0x40] sm:$0xff] }
 0x27c   :  { %v3650_v29 = vadd.f32 %v3649_v7, %v3648_v25  ;;  %v3023_v60 = vrot.slane %v3022_v12, 1  ;;  %v2999_v53 = vmax.f32 %v2997_v4, %v2998_v3  ;;  %vm2543_vm9 = vcmp.gt.f32.partialorder %v7625_v31, 0.0 }
 0x27d   :  { %vm2541_vm10 = vcmp.gt.f32.partialorder %v7631_v13, 0.0  ;;  %v4377_v5 = vsel %vm2905_vm3, %v4259_v22, 0.0  ;;  %5615 = vpow2.f32 %v3454_v59  ;;  %v3039_v8 = vsel %vm2905_vm3, %v7616_v28, -inf }
 0x27e   :  { %v3025_v55 = vsel %vm2905_vm3, %v7620_v37, -inf  ;;  %v5612_v62 = vpop.eup %5611  ;;  %v4378_v32 = vrot.slane %v4377_v5, 4  ;;  %v4008_v36 = vmax.f32 %v3650_v29, 1e-30  ;;  %v3017_v18 = vmax.f32 %v3015_v2, %v3016_v47  ;;  %v2690_v29 = vpop.permute.xlu0 %2689 }
 0x27f   :  { %v3024_v40 = vmax.f32 %v3022_v12, %v3023_v60  ;;  %v4130_v45 = vmul.f32 %v5612_v62, %v7477_v46  ;;  %v3000_v23 = vrot.slane %v2999_v53, 2  ;;  %v3040_v34 = vrot.slane %v3039_v8, 4 }
 0x280   :  { %v3026_v38 = vrot.slane %v3025_v55, 4  ;;  %v7640_v25 = vadd.f32 %v4392_v27, %v4391_v50  ;;  %v7643_v0 = vsel %vm2905_vm3, %v4255_v39, 0.0  ;;  %v3369_v9 = vsub.f32 %v7536_v63, %v3017_v18  ;;  %v7655_v63 = vld [vmem:[%s9083_s2 + $0xd0] sm:$0xff] }
 0x281   :  { %v3370_v43 = vsub.f32 %v7540_v58, %v3024_v40  ;;  %v4194_v52 = vmul.f32 %v5838_v15, %v4130_v45  ;;  %v3001_v16 = vmax.f32 %v2999_v53, %v3000_v23  ;;  %v3041_v56 = vmax.f32 %v3039_v8, %v3040_v34  ;;  %v9252_v58 = vld [vmem:[#allocation6_spill] sm:$0xff] }
 0x282   :  { %v3027_v46 = vmax.f32 %v3025_v55, %v3026_v38  ;;  %v7650_v4 = vpop.eup %5613  ;;  %v4379_v7 = vadd.f32 %v4378_v32, %v4377_v5  ;;  %5617 = vrcp.f32 %v4008_v36  ;;  %v3448_v50 = vmul.f32 1.442695, %v3369_v9 }
 0x283   :  { %v3450_v27 = vmul.f32 1.442695, %v3370_v43  ;;  %vm2547_vm11 = vcmp.gt.f32.partialorder %v7655_v63, 0.0  ;;  %v4258_v39 = vmul.f32 %v4194_v52, %v9252_v58  ;;  %v3630_v2 = vsel %vm2905_vm3, %v7650_v4, 0.0 }
 0x284   :  { %v3002_v12 = vrot.slane %v3001_v16, 1  ;;  %v3042_v3 = vrot.slane %v3041_v56, 2  ;;  %v3631_v22 = vrot.slane %v3630_v2, 4  ;;  %5619 = vpow2.f32 %v3448_v50 }
 0x285   :  { %v3028_v59 = vrot.slane %v3027_v46, 2  ;;  %v4370_v47 = vsel %vm2905_vm3, %v4258_v39, 0.0  ;;  %5621 = vpow2.f32 %v3450_v27  ;;  %v4380_v5 = vrot.slane %v4379_v7, 2  ;;  %v2702_v27 = vpop.permute.xlu1 %2701 }
 0x286   :  { %v3003_v60 = vmax.f32 %v3001_v16, %v3002_v12  ;;  %v3043_v53 = vmax.f32 %v3041_v56, %v3042_v3  ;;  %v4371_v8 = vrot.slane %v4370_v47, 4  ;;  %v3632_v55 = vadd.f32 %v3631_v22, %v3630_v2 }
 0x287   :  { %v3029_v62 = vmax.f32 %v3027_v46, %v3028_v59  ;;  %v7666_v18 = vsel %vm2543_vm9, %v2694_v14, -3.4028235e+38  ;;  %v7670_v40 = vsel %vm2541_vm10, %v2690_v29, -3.4028235e+38  ;;  %v7679_v14 = vld [vmem:[%s9083_s2 + $0xb8] sm:$0xff]  ;;  %v7684_v16 = vadd.f32 %v4380_v5, %v4379_v7 }
 0x288   :  { %v3367_v32 = vsub.f32 %v7603_v33, %v3003_v60  ;;  %v3044_v36 = vrot.slane %v3043_v53, 1  ;;  %v4372_v45 = vadd.f32 %v4371_v8, %v4370_v47  ;;  %v3633_v23 = vrot.slane %v3632_v55, 2  ;;  %v7693_v7 = vld [vmem:[%s9083_s2 + $0xd8] sm:$0xff] }
 0x289   :  { %v3030_v34 = vrot.slane %v3029_v62, 1  ;;  %v3060_v38 = vsel %vm2905_vm3, %v7666_v18, -inf  ;;  %v3046_v33 = vsel %vm2905_vm3, %v7670_v40, -inf  ;;  %vm2544_vm12 = vcmp.gt.f32.partialorder %v7679_v14, 0.0  ;;  %9253 = vst [vmem:[#allocation5_spill] sm:$0xff] %v7684_v16 }
 0x28a   :  { %v3444_v9 = vmul.f32 1.442695, %v3367_v32  ;;  %v3045_v43 = vmax.f32 %v3043_v53, %v3044_v36  ;;  %v3061_v15 = vrot.slane %v3060_v38, 4  ;;  %v7682_v52 = vpop.eup %5615  ;;  %v3634_v56 = vadd.f32 %v3633_v23, %v3632_v55 }
 0x28b   :  { %v3031_v46 = vmax.f32 %v3029_v62, %v3030_v34  ;;  %v3047_v50 = vrot.slane %v3046_v33, 4  ;;  %v3672_v58 = vsel %vm2905_vm3, %v7682_v52, 0.0  ;;  %v4373_v12 = vrot.slane %v4372_v45, 2 }
 0x28c   :  { %5623 = vpow2.f32 %v3444_v9  ;;  %v3373_v39 = vsub.f32 %v7616_v28, %v3045_v43  ;;  %v3062_v2 = vmax.f32 %v3060_v38, %v3061_v15  ;;  %v3635_v3 = vrot.slane %v3634_v56, 1 }
 0x28d   :  { %v3673_v22 = vrot.slane %v3672_v58, 4  ;;  %v3371_v59 = vsub.f32 %v7620_v37, %v3031_v46  ;;  %vm2548_vm13 = vcmp.gt.f32.partialorder %v7693_v7, 0.0  ;;  %v3048_v60 = vmax.f32 %v3046_v33, %v3047_v50 }
 0x28e   :  { %v3456_v29 = vmul.f32 1.442695, %v3373_v39  ;;  %v3063_v47 = vrot.slane %v3062_v2, 2  ;;  %v7698_v53 = vsel %vm2547_vm11, %v2702_v27, -3.4028235e+38  ;;  %v3636_v8 = vadd.f32 %v3635_v3, %v3634_v56  ;;  %v2696_v56 = vpop.permute.xlu0 %2695  ;;  %v7718_v39 = vld [vmem:[%s9083_s2 + $0xa8] sm:$0xff] }
 0x28f   :  { %v3674_v37 = vadd.f32 %v3673_v22, %v3672_v58  ;;  %v5618_v55 = vpop.eup %5617  ;;  %v3452_v62 = vmul.f32 1.442695, %v3371_v59  ;;  %v3049_v36 = vrot.slane %v3048_v60, 2  ;;  %v7702_v23 = vadd.f32 %v4373_v12, %v4372_v45 }
 0x290   :  { %5625 = vpow2.f32 %v3456_v29  ;;  %v3064_v32 = vmax.f32 %v3062_v2, %v3063_v47  ;;  %v4006_v34 = vmax.f32 %v3636_v8, 1e-30  ;;  %v3088_v9 = vsel %vm2905_vm3, %v7698_v53, -inf }
 0x291   :  { %v3675_v38 = vrot.slane %v3674_v37, 2  ;;  %v7706_v43 = vpop.eup %5619  ;;  %5627 = vpow2.f32 %v3452_v62  ;;  %v3050_v33 = vmax.f32 %v3048_v60, %v3049_v36  ;;  %v3089_v46 = vrot.slane %v3088_v9, 4  ;;  %v2704_v60 = vpop.permute.xlu1 %2703 }
 0x292   :  { %v3065_v15 = vrot.slane %v3064_v32, 1  ;;  %v7708_v50 = vpop.eup %5621  ;;  %v7711_v27 = vmul.f32 %v5618_v55, %v7561_v57  ;;  %5629 = vrcp.f32 %v4006_v34  ;;  %v3651_v58 = vsel %vm2905_vm3, %v7706_v43, 0.0 }
 0x293   :  { %v3676_v45 = vadd.f32 %v3675_v38, %v3674_v37  ;;  %vm2542_vm14 = vcmp.gt.f32.partialorder %v7718_v39, 0.0  ;;  %v3652_v2 = vrot.slane %v3651_v58, 4  ;;  %v3658_v12 = vsel %vm2905_vm3, %v7708_v50, 0.0 }
 0x294   :  { %v3066_v3 = vmax.f32 %v3064_v32, %v3065_v15  ;;  %v3051_v22 = vrot.slane %v3050_v33, 1  ;;  %v3659_v59 = vrot.slane %v3658_v12, 4  ;;  %v3090_v29 = vmax.f32 %v3088_v9, %v3089_v46 }
 0x295   :  { %v3677_v57 = vrot.slane %v3676_v45, 1  ;;  %v7725_v47 = vsel %vm2544_vm12, %v2696_v56, -3.4028235e+38  ;;  %v3653_v8 = vadd.f32 %v3652_v2, %v3651_v58  ;;  %v7733_v46 = vsel %vm2548_vm13, %v2704_v60, -3.4028235e+38 }
 0x296   :  { %v3376_v37 = vsub.f32 %v7666_v18, %v3066_v3  ;;  %v3052_v55 = vmax.f32 %v3050_v33, %v3051_v22  ;;  %v3067_v62 = vsel %vm2905_vm3, %v7725_v47, -inf  ;;  %v3660_v34 = vadd.f32 %v3659_v59, %v3658_v12  ;;  %v2692_v59 = vpop.permute.xlu0 %2691 }
 0x297   :  { %v3678_v36 = vadd.f32 %v3677_v57, %v3676_v45  ;;  %v3091_v38 = vrot.slane %v3090_v29, 2  ;;  %v3068_v32 = vrot.slane %v3067_v62, 4  ;;  %v3654_v15 = vrot.slane %v3653_v8, 2 }
 0x298   :  { %v3462_v5 = vmul.f32 1.442695, %v3376_v37  ;;  %v3374_v9 = vsub.f32 %v7670_v40, %v3052_v55  ;;  %v3661_v18 = vrot.slane %v3660_v34, 2  ;;  %v3095_v55 = vsel %vm2905_vm3, %v7733_v46, -inf }
 0x299   :  { %v7735_v56 = vpop.eup %5623  ;;  %v4012_v58 = vmax.f32 %v3678_v36, 1e-30  ;;  %v3092_v33 = vmax.f32 %v3090_v29, %v3091_v38  ;;  %v3069_v2 = vmax.f32 %v3067_v62, %v3068_v32  ;;  %v3655_v3 = vadd.f32 %v3654_v15, %v3653_v8 }
 0x29a   :  { %v3637_v45 = vsel %vm2905_vm3, %v7735_v56, 0.0  ;;  %5631 = vpow2.f32 %v3462_v5  ;;  %v3458_v12 = vmul.f32 1.442695, %v3374_v9  ;;  %v3662_v22 = vadd.f32 %v3661_v18, %v3660_v34  ;;  %v7746_v5 = vld [vmem:[%s9083_s2 + $0xc8] sm:$0xff] }
 0x29b   :  { %5633 = vrcp.f32 %v4012_v58  ;;  %v3638_v57 = vrot.slane %v3637_v45, 4  ;;  %v3093_v40 = vrot.slane %v3092_v33, 1  ;;  %v3656_v37 = vrot.slane %v3655_v3, 1 }
 0x29c   :  { %5635 = vpow2.f32 %v3458_v12  ;;  %v3070_v60 = vrot.slane %v3069_v2, 2  ;;  %v3663_v29 = vrot.slane %v3662_v22, 1  ;;  %v3096_v38 = vrot.slane %v3095_v55, 4 }
 0x29d   :  { %v7741_v36 = vpop.eup %5625  ;;  %v3639_v8 = vadd.f32 %v3638_v57, %v3637_v45  ;;  %v3094_v62 = vmax.f32 %v3092_v33, %v3093_v40  ;;  %vm2546_vm15 = vcmp.gt.f32.partialorder %v7746_v5, 0.0  ;;  %v3657_v34 = vadd.f32 %v3656_v37, %v3655_v3 }
 0x29e   :  { %v3679_v32 = vsel %vm2905_vm3, %v7741_v36, 0.0  ;;  %v3071_v15 = vmax.f32 %v3069_v2, %v3070_v60  ;;  %v7753_v9 = vsel %vm2542_vm14, %v2692_v59, -3.4028235e+38  ;;  %v7755_v58 = vpop.eup %5627  ;;  %v3664_v18 = vadd.f32 %v3663_v29, %v3662_v22 }
 0x29f   :  { %v3640_v33 = vrot.slane %v3639_v8, 2  ;;  %v3680_v45 = vrot.slane %v3679_v32, 4  ;;  %v3380_v12 = vsub.f32 %v7698_v53, %v3094_v62  ;;  %v5630_v57 = vpop.eup %5629  ;;  %v4009_v40 = vmax.f32 %v3657_v34, 1e-30  ;;  %v5844_v53 = vld [vmem:[%s9083_s2 + $0x70] sm:$0xff] }
 0x2a0   :  { %v3665_v3 = vsel %vm2905_vm3, %v7755_v58, 0.0  ;;  %v3072_v37 = vrot.slane %v3071_v15, 1  ;;  %v3097_v28 = vmax.f32 %v3095_v55, %v3096_v38  ;;  %v4134_v2 = vmul.f32 %v5630_v57, %v7650_v4 }
 0x2a1   :  { %v4010_v60 = vmax.f32 %v3664_v18, 1e-30  ;;  %v3641_v41 = vadd.f32 %v3640_v33, %v3639_v8  ;;  %v3681_v59 = vadd.f32 %v3680_v45, %v3679_v32  ;;  %5637 = vrcp.f32 %v4009_v40  ;;  %v2700_v18 = vpop.permute.xlu1 %2699 }
 0x2a2   :  { %v3666_v35 = vrot.slane %v3665_v3, 4  ;;  %v3470_v48 = vmul.f32 1.442695, %v3380_v12  ;;  %v3073_v22 = vmax.f32 %v3071_v15, %v3072_v37  ;;  %v4200_v29 = vmul.f32 %v5844_v53, %v7711_v27  ;;  %v5845_v27 = vld [vmem:[%s9083_s2 + $0x60] sm:$0xff] }
 0x2a3   :  { %5639 = vrcp.f32 %v4010_v60  ;;  %v3642_v62 = vrot.slane %v3641_v41, 1  ;;  %v3682_v34 = vrot.slane %v3681_v59, 2  ;;  %v3098_v55 = vrot.slane %v3097_v28, 2 }
 0x2a4   :  { %v3667_v1 = vadd.f32 %v3666_v35, %v3665_v3  ;;  %5641 = vpow2.f32 %v3470_v48  ;;  %v3377_v4 = vsub.f32 %v7725_v47, %v3073_v22  ;;  %v3053_v15 = vsel %vm2905_vm3, %v7753_v9, -inf  ;;  %v9254_v47 = vld [vmem:[#allocation8_spill] sm:$0xff] }
 0x2a5   :  { %v3643_v38 = vadd.f32 %v3642_v62, %v3641_v41  ;;  %v3683_v32 = vadd.f32 %v3682_v34, %v3681_v59  ;;  %v4198_v33 = vmul.f32 %v5845_v27, %v4134_v2  ;;  %v3099_v35 = vmax.f32 %v3097_v28, %v3098_v55  ;;  %v7789_v62 = vld [vmem:[%s9083_s2 + $0xc0] sm:$0xff] }
 0x2a6   :  { %v3668_v45 = vrot.slane %v3667_v1, 2  ;;  %v3464_v12 = vmul.f32 1.442695, %v3377_v4  ;;  %v7775_v57 = vmul.f32 %v9254_v47, %v4200_v29  ;;  %v3054_v3 = vrot.slane %v3053_v15, 4 }
 0x2a7   :  { %v7772_v48 = vpop.eup %5631  ;;  %v4007_v40 = vmax.f32 %v3643_v38, 1e-30  ;;  %v3684_v41 = vrot.slane %v3683_v32, 1  ;;  %v7781_v2 = vsel %vm2546_vm15, %v2700_v18, -3.4028235e+38  ;;  %vm2545_vm1 = vcmp.gt.f32.partialorder %v7789_v62, 0.0 }
 0x2a8   :  { %9255 = vst [vmem:[#allocation7_spill] sm:$0xff] %v7775_v57  ;;  %v5634_v37 = vpop.eup %5633  ;;  %v3669_v60 = vadd.f32 %v3668_v45, %v3667_v1  ;;  %v3700_v59 = vsel %vm2905_vm3, %v7772_v48, 0.0  ;;  %5643 = vpow2.f32 %v3464_v12  ;;  %v9256_v1 = vld [vmem:[#allocation9_spill] sm:$0xff]  ;;  %v3100_v38 = vrot.slane %v3099_v35, 1 }
 0x2a9   :  { %v7783_v22 = vpop.eup %5635  ;;  %v4140_v28 = vmul.f32 %v5634_v37, %v7682_v52  ;;  %5645 = vrcp.f32 %v4007_v40  ;;  %v3685_v53 = vadd.f32 %v3684_v41, %v3683_v32  ;;  %v3701_v29 = vrot.slane %v3700_v59, 4  ;;  %v9257_v41 = vld [vmem:[#allocation12_spill] sm:$0xff] }
 0x2aa   :  { %v4262_v34 = vmul.f32 %v4198_v33, %v9256_v1  ;;  %v3670_v4 = vrot.slane %v3669_v60, 1  ;;  %v3686_v55 = vsel %vm2905_vm3, %v7783_v22, 0.0  ;;  %v3101_v12 = vmax.f32 %v3099_v35, %v3100_v38 }
 0x2ab   :  { %v4204_v18 = vmul.f32 %v7469_v42, %v4140_v28  ;;  %v4013_v52 = vmax.f32 %v3685_v53, 1e-30  ;;  %v3702_v27 = vadd.f32 %v3701_v29, %v3700_v59  ;;  %v3687_v32 = vrot.slane %v3686_v55, 4 }
 0x2ac   :  { %v3671_v45 = vadd.f32 %v3670_v4, %v3669_v60  ;;  %v3055_v47 = vmax.f32 %v3053_v15, %v3054_v3  ;;  %v3081_v40 = vsel %vm2905_vm3, %v7781_v2, -inf  ;;  %v4398_v8 = vsel %vm2905_vm3, %v4262_v34, 0.0 }
 0x2ad   :  { %v4268_v37 = vmul.f32 %v9257_v41, %v4204_v18  ;;  %5647 = vrcp.f32 %v4013_v52  ;;  %v3703_v33 = vrot.slane %v3702_v27, 2  ;;  %v3688_v1 = vadd.f32 %v3687_v32, %v3686_v55  ;;  %v2698_v52 = vpop.permute.xlu0 %2697 }
 0x2ae   :  { %v4011_v57 = vmax.f32 %v3671_v45, 1e-30  ;;  %v3381_v16 = vsub.f32 %v7733_v46, %v3101_v12  ;;  %v3056_v42 = vrot.slane %v3055_v47, 2  ;;  %v5638_v28 = vpop.eup %5637  ;;  %v3082_v15 = vrot.slane %v3081_v40, 4 }
 0x2af   :  { %v4440_v59 = vsel %vm2905_vm3, %v4268_v37, 0.0  ;;  %v3704_v60 = vadd.f32 %v3703_v33, %v3702_v27  ;;  %v3689_v35 = vrot.slane %v3688_v1, 2  ;;  %v4137_v29 = vmul.f32 %v5638_v28, %v7706_v43 }
 0x2b0   :  { %v5640_v3 = vpop.eup %5639  ;;  %v4441_v53 = vrot.slane %v4440_v59, 4  ;;  %5649 = vrcp.f32 %v4011_v57  ;;  %v3472_v4 = vmul.f32 1.442695, %v3381_v16  ;;  %v3057_v46 = vmax.f32 %v3055_v47, %v3056_v42 }
 0x2b1   :  { %v7803_v38 = vpop.eup %5641  ;;  %v4138_v34 = vmul.f32 %v5640_v3, %v7708_v50  ;;  %v3705_v55 = vrot.slane %v3704_v60, 1  ;;  %v3690_v18 = vadd.f32 %v3689_v35, %v3688_v1  ;;  %v4399_v32 = vrot.slane %v4398_v8, 4  ;;  %v9258_v1 = vld [vmem:[#allocation13_spill] sm:$0xff] }
 0x2b2   :  { %v4442_v45 = vadd.f32 %v4441_v53, %v4440_v59  ;;  %v3728_v27 = vsel %vm2905_vm3, %v7803_v38, 0.0  ;;  %5651 = vpow2.f32 %v3472_v4  ;;  %v4201_v16 = vmul.f32 %v7507_v17, %v4137_v29 }
 0x2b3   :  { %v4202_v12 = vmul.f32 %v7515_v21, %v4138_v34  ;;  %v3706_v41 = vadd.f32 %v3705_v55, %v3704_v60  ;;  %v3691_v43 = vrot.slane %v3690_v18, 1  ;;  %v3729_v57 = vrot.slane %v3728_v27, 4 }
 0x2b4   :  { %v3058_v37 = vrot.slane %v3057_v46, 1  ;;  %v3083_v33 = vmax.f32 %v3081_v40, %v3082_v15  ;;  %v7812_v50 = vsel %vm2545_vm1, %v2698_v52, -3.4028235e+38  ;;  %v4443_v21 = vrot.slane %v4442_v45, 2 }
 0x2b5   :  { %v7814_v47 = vpop.eup %5643  ;;  %v4266_v42 = vmul.f32 %v4202_v12, %v9258_v1  ;;  %v4016_v28 = vmax.f32 %v3706_v41, 1e-30  ;;  %v3692_v59 = vadd.f32 %v3691_v43, %v3690_v18  ;;  %v3730_v35 = vadd.f32 %v3729_v57, %v3728_v27 }
 0x2b6   :  { %v5646_v3 = vpop.eup %5645  ;;  %v3707_v60 = vsel %vm2905_vm3, %v7814_v47, 0.0  ;;  %v3059_v53 = vmax.f32 %v3057_v46, %v3058_v37  ;;  %v3084_v17 = vrot.slane %v3083_v33, 2  ;;  %v3074_v12 = vsel %vm2905_vm3, %v7812_v50, -inf }
 0x2b7   :  { %v4426_v40 = vsel %vm2905_vm3, %v4266_v42, 0.0  ;;  %v4135_v15 = vmul.f32 %v5646_v3, %v7735_v56  ;;  %5653 = vrcp.f32 %v4016_v28  ;;  %v4014_v29 = vmax.f32 %v3692_v59, 1e-30  ;;  %v9260_v59 = vld [vmem:[#allocation11_spill] sm:$0xff] }
 0x2b8   :  { %v4427_v4 = vrot.slane %v4426_v40, 4  ;;  %v3731_v34 = vrot.slane %v3730_v35, 2  ;;  %v3708_v55 = vrot.slane %v3707_v60, 4  ;;  %v3375_v52 = vsub.f32 %v7753_v9, %v3059_v53  ;;  %v9261_v53 = vld [vmem:[#allocation10_spill] sm:$0xff] }
 0x2b9   :  { %v4199_v18 = vmul.f32 %v7551_v19, %v4135_v15  ;;  %5655 = vrcp.f32 %v4014_v29  ;;  %v3085_v27 = vmax.f32 %v3083_v33, %v3084_v17  ;;  %v7825_v56 = vadd.f32 %v4399_v32, %v4398_v8 }
 0x2ba   :  { %v5648_v46 = vpop.eup %5647  ;;  %v4428_v41 = vadd.f32 %v4427_v4, %v4426_v40  ;;  %v3732_v43 = vadd.f32 %v3731_v34, %v3730_v35  ;;  %v3709_v57 = vadd.f32 %v3708_v55, %v3707_v60  ;;  %v3460_v37 = vmul.f32 1.442695, %v3375_v52  ;;  %v9264_v4 = vld [vmem:[#allocation14_spill] sm:$0xff] }
 0x2bb   :  { %9259 = vst [vmem:[#allocation6_spill] sm:$0xff] %v7825_v56  ;;  %v4141_v1 = vmul.f32 %v5648_v46, %v7741_v36  ;;  %v3086_v42 = vrot.slane %v3085_v27, 1  ;;  %v3075_v28 = vrot.slane %v3074_v12, 4  ;;  %v4263_v9 = vmul.f32 %v4199_v18, %v9260_v59 }
 0x2bc   :  { %v3733_v3 = vrot.slane %v3732_v43, 1  ;;  %v3710_v19 = vrot.slane %v3709_v57, 2  ;;  %5657 = vpow2.f32 %v3460_v37  ;;  %v7830_v17 = vmul.f32 %v9261_v53, %v4201_v16  ;;  %v2710_v16 = vpop.permute.xlu1 %2709 }
 0x2bd   :  { %v5650_v33 = vpop.eup %5649  ;;  %v4205_v40 = vmul.f32 %v7573_v51, %v4141_v1  ;;  %v3087_v35 = vmax.f32 %v3085_v27, %v3086_v42  ;;  %v3076_v60 = vmax.f32 %v3074_v12, %v3075_v28  ;;  %v7833_v15 = vadd.f32 %v4443_v21, %v4442_v45 }
 0x2be   :  { %9262 = vst [vmem:[#allocation8_spill] sm:$0xff] %v7830_v17  ;;  %v4429_v8 = vrot.slane %v4428_v41, 2  ;;  %v4139_v36 = vmul.f32 %v5650_v33, %v7755_v58  ;;  %v3734_v32 = vadd.f32 %v3733_v3, %v3732_v43  ;;  %v3711_v55 = vadd.f32 %v3710_v19, %v3709_v57  ;;  %v9266_v57 = vld [vmem:[#allocation15_spill] sm:$0xff] }
 0x2bf   :  { %9263 = vst [vmem:[#allocation9_spill] sm:$0xff] %v7833_v15  ;;  %v7836_v29 = vpop.eup %5651  ;;  %v4269_v34 = vmul.f32 %v9264_v4, %v4205_v40  ;;  %v3379_v52 = vsub.f32 %v7781_v2, %v3087_v35  ;;  %v3077_v18 = vrot.slane %v3076_v60, 2  ;;  %v7841_v46 = vsel %vm2905_vm3, %v4263_v9, 0.0 }
 0x2c0   :  { %9265 = vst [vmem:[#allocation12_spill] sm:$0xff] %v7841_v46  ;;  %v4203_v51 = vmul.f32 %v7579_v54, %v4139_v36  ;;  %v4020_v45 = vmax.f32 %v3734_v32, 1e-30  ;;  %v3735_v21 = vsel %vm2905_vm3, %v7836_v29, 0.0  ;;  %v3712_v27 = vrot.slane %v3711_v55, 1  ;;  %v7851_v54 = vld [vmem:[%s9083_s2 + $0xf0] sm:$0xff]  ;;  %v2706_v36 = vpop.permute.xlu1 %2705 }
 0x2c1   :  { %v4447_v58 = vsel %vm2905_vm3, %v4269_v34, 0.0  ;;  %v3736_v12 = vrot.slane %v3735_v21, 4  ;;  %v3468_v43 = vmul.f32 1.442695, %v3379_v52  ;;  %v3078_v2 = vmax.f32 %v3076_v60, %v3077_v18 }
 0x2c2   :  { %v4448_v37 = vrot.slane %v4447_v58, 4  ;;  %v4267_v1 = vmul.f32 %v4203_v51, %v9266_v57  ;;  %5659 = vrcp.f32 %v4020_v45  ;;  %v3713_v42 = vadd.f32 %v3712_v27, %v3711_v55 }
 0x2c3   :  { %v3737_v28 = vadd.f32 %v3736_v12, %v3735_v21  ;;  %5661 = vpow2.f32 %v3468_v43  ;;  %vm2551_vm2 = vcmp.gt.f32.partialorder %v7851_v54, 0.0  ;;  %v7854_v9 = vadd.f32 %v4429_v8, %v4428_v41  ;;  %v7866_v41 = vld [vmem:[%s9083_s2 + $0xe0] sm:$0xff] }
 0x2c4   :  { %v5654_v59 = vpop.eup %5653  ;;  %v4433_v3 = vsel %vm2905_vm3, %v4267_v1, 0.0  ;;  %v3079_v19 = vrot.slane %v3078_v2, 1  ;;  %v7857_v33 = vsel %vm2551_vm2, %v2710_v16, -3.4028235e+38  ;;  %v4017_v35 = vmax.f32 %v3713_v42, 1e-30 }
 0x2c5   :  { %9267 = vst [vmem:[#allocation13_spill] sm:$0xff] %v7854_v9  ;;  %v4434_v53 = vrot.slane %v4433_v3, 4  ;;  %v4144_v40 = vmul.f32 %v5654_v59, %v7772_v48  ;;  %v3738_v60 = vrot.slane %v3737_v28, 2  ;;  %v3116_v55 = vsel %vm2905_vm3, %v7857_v33, -inf }
 0x2c6   :  { %v5656_v32 = vpop.eup %5655  ;;  %v3080_v34 = vmax.f32 %v3078_v2, %v3079_v19  ;;  %vm2549_vm4 = vcmp.gt.f32.partialorder %v7866_v41, 0.0  ;;  %v7869_v8 = vadd.f32 %v4448_v37, %v4447_v58  ;;  %5663 = vrcp.f32 %v4017_v35  ;;  %v9269_v2 = vld [vmem:[#allocation17_spill] sm:$0xff] }
 0x2c7   :  { %v4435_v48 = vadd.f32 %v4434_v53, %v4433_v3  ;;  %v4142_v52 = vmul.f32 %v5656_v32, %v7783_v22  ;;  %v3739_v18 = vadd.f32 %v3738_v60, %v3737_v28  ;;  %v3117_v51 = vrot.slane %v3116_v55, 4  ;;  %v2718_v3 = vpop.permute.xlu0 %2717 }
 0x2c8   :  { %9268 = vst [vmem:[#allocation11_spill] sm:$0xff] %v7869_v8  ;;  %v3378_v16 = vsub.f32 %v7812_v50, %v3080_v34  ;;  %v7873_v45 = vsel %vm2549_vm4, %v2706_v36, -3.4028235e+38  ;;  %v4208_v12 = vmul.f32 %v7625_v31, %v4144_v40  ;;  %v9270_v40 = vld [vmem:[#allocation16_spill] sm:$0xff] }
 0x2c9   :  { %v7875_v21 = vpop.eup %5657  ;;  %v4436_v27 = vrot.slane %v4435_v48, 2  ;;  %v4206_v43 = vmul.f32 %v7631_v13, %v4142_v52  ;;  %v3102_v58 = vsel %vm2905_vm3, %v7873_v45, -inf  ;;  %v3740_v37 = vrot.slane %v3739_v18, 1  ;;  %v7888_v13 = vld [vmem:[%s9083_s2 + $0x110] sm:$0xff] }
 0x2ca   :  { %v3693_v22 = vsel %vm2905_vm3, %v7875_v21, 0.0  ;;  %v3466_v57 = vmul.f32 1.442695, %v3378_v16  ;;  %v3118_v1 = vmax.f32 %v3116_v55, %v3117_v51  ;;  %v3103_v59 = vrot.slane %v3102_v58, 4 }
 0x2cb   :  { %v4270_v42 = vmul.f32 %v4206_v43, %v9269_v2  ;;  %v3694_v28 = vrot.slane %v3693_v22, 4  ;;  %v3741_v19 = vadd.f32 %v3740_v37, %v3739_v18  ;;  %vm2555_vm5 = vcmp.gt.f32.partialorder %v7888_v13, 0.0  ;;  %v7904_v37 = vld [vmem:[%s9083_s2 + $0xf8] sm:$0xff] }
 0x2cc   :  { %5665 = vpow2.f32 %v3466_v57  ;;  %v3119_v31 = vrot.slane %v3118_v1, 2  ;;  %v7893_v35 = vmul.f32 %v9270_v40, %v4208_v12  ;;  %v3104_v36 = vmax.f32 %v3102_v58, %v3103_v59  ;;  %v2712_v12 = vpop.permute.xlu1 %2711 }
 0x2cd   :  { %v3695_v60 = vadd.f32 %v3694_v28, %v3693_v22  ;;  %v7895_v32 = vadd.f32 %v4436_v27, %v4435_v48  ;;  %v4021_v34 = vmax.f32 %v3741_v19, 1e-30  ;;  %v7897_v52 = vsel %vm2555_vm5, %v2718_v3, -3.4028235e+38 }
 0x2ce   :  { %9271 = vst [vmem:[#allocation10_spill] sm:$0xff] %v7893_v35  ;;  %v3120_v55 = vmax.f32 %v3118_v1, %v3119_v31  ;;  %v3105_v51 = vrot.slane %v3104_v36, 2  ;;  %v3144_v43 = vsel %vm2905_vm3, %v7897_v52, -inf  ;;  %vm2552_vm6 = vcmp.gt.f32.partialorder %v7904_v37, 0.0 }
 0x2cf   :  { %9272 = vst [vmem:[#allocation14_spill] sm:$0xff] %v7895_v32  ;;  %v5660_v18 = vpop.eup %5659  ;;  %v3696_v16 = vrot.slane %v3695_v60, 2  ;;  %v4454_v27 = vsel %vm2905_vm3, %v4270_v42, 0.0  ;;  %5667 = vrcp.f32 %v4021_v34  ;;  %v3145_v28 = vrot.slane %v3144_v43, 4 }
 0x2d0   :  { %v7907_v48 = vpop.eup %5661  ;;  %v4148_v58 = vmul.f32 %v5660_v18, %v7803_v38  ;;  %v3121_v22 = vrot.slane %v3120_v55, 1  ;;  %v3106_v2 = vmax.f32 %v3104_v36, %v3105_v51  ;;  %v7914_v31 = vsel %vm2552_vm6, %v2712_v12, -3.4028235e+38 }
 0x2d1   :  { %v3697_v57 = vadd.f32 %v3696_v16, %v3695_v60  ;;  %v3721_v1 = vsel %vm2905_vm3, %v7907_v48, 0.0  ;;  %v3146_v50 = vmax.f32 %v3144_v43, %v3145_v28  ;;  %v3123_v38 = vsel %vm2905_vm3, %v7914_v31, -inf }
 0x2d2   :  { %v4212_v59 = vmul.f32 %v7655_v63, %v4148_v58  ;;  %v3722_v3 = vrot.slane %v3721_v1, 4  ;;  %v3122_v19 = vmax.f32 %v3120_v55, %v3121_v22  ;;  %v3107_v53 = vrot.slane %v3106_v2, 1 }
 0x2d3   :  { %v3698_v40 = vrot.slane %v3697_v57, 1  ;;  %v5664_v42 = vpop.eup %5663  ;;  %v3124_v36 = vrot.slane %v3123_v38, 4  ;;  %v4455_v16 = vrot.slane %v4454_v27, 4  ;;  %v3147_v58 = vrot.slane %v3146_v50, 2 }
 0x2d4   :  { %v4276_v60 = vmul.f32 %v6541_v49, %v4212_v59  ;;  %v3723_v34 = vadd.f32 %v3722_v3, %v3721_v1  ;;  %v3384_v18 = vsub.f32 %v7857_v33, %v3122_v19  ;;  %v3108_v63 = vmax.f32 %v3106_v2, %v3107_v53  ;;  %v2714_v3 = vpop.permute.xlu0 %2713 }
 0x2d5   :  { %v3699_v51 = vadd.f32 %v3698_v40, %v3697_v57  ;;  %v3125_v4 = vmax.f32 %v3123_v38, %v3124_v36  ;;  %v4145_v28 = vmul.f32 %v5664_v42, %v7814_v47  ;;  %v3148_v33 = vmax.f32 %v3146_v50, %v3147_v58  ;;  %v7936_v50 = vld [vmem:[%s9083_s2 + $0x100] sm:$0xff]  ;;  %v2708_v36 = vpop.permute.xlu1 %2707 }
 0x2d6   :  { %v4496_v55 = vsel %vm2905_vm3, %v4276_v60, 0.0  ;;  %v3724_v12 = vrot.slane %v3723_v34, 2  ;;  %v3478_v22 = vmul.f32 1.442695, %v3384_v18  ;;  %v3382_v49 = vsub.f32 %v7873_v45, %v3108_v63  ;;  %v7948_v63 = vld [vmem:[%s9083_s2 + $0xe8] sm:$0xff] }
 0x2d7   :  { %v4015_v35 = vmax.f32 %v3699_v51, 1e-30  ;;  %v3126_v59 = vrot.slane %v3125_v4, 2  ;;  %v7926_v53 = vadd.f32 %v4455_v16, %v4454_v27  ;;  %v4497_v2 = vrot.slane %v4496_v55, 4 }
 0x2d8   :  { %v3725_v1 = vadd.f32 %v3724_v12, %v3723_v34  ;;  %5669 = vpow2.f32 %v3478_v22  ;;  %v3474_v19 = vmul.f32 1.442695, %v3382_v49  ;;  %v3149_v47 = vrot.slane %v3148_v33, 1  ;;  %v2720_v49 = vpop.permute.xlu0 %2719 }
 0x2d9   :  { %v7924_v57 = vpop.eup %5665  ;;  %9273 = vst [vmem:[#allocation15_spill] sm:$0xff] %v7926_v53  ;;  %5671 = vrcp.f32 %v4015_v35  ;;  %v3127_v42 = vmax.f32 %v3125_v4, %v3126_v59  ;;  %v7931_v45 = vmul.f32 %v7679_v14, %v4145_v28  ;;  %vm2553_vm7 = vcmp.gt.f32.partialorder %v7936_v50, 0.0  ;;  %v7958_v59 = vld [vmem:[%s9083_s2 + $0x118] sm:$0xff] }
 0x2da   :  { %v3726_v40 = vrot.slane %v3725_v1, 1  ;;  %v3714_v38 = vsel %vm2905_vm3, %v7924_v57, 0.0  ;;  %5673 = vpow2.f32 %v3474_v19  ;;  %v3150_v27 = vmax.f32 %v3148_v33, %v3149_v47 }
 0x2db   :  { %v3715_v60 = vrot.slane %v3714_v38, 4  ;;  %v3128_v34 = vrot.slane %v3127_v42, 1  ;;  %v7939_v18 = vsel %vm2553_vm7, %v2714_v3, -3.4028235e+38  ;;  %v7941_v4 = vadd.f32 %v4497_v2, %v4496_v55 }
 0x2dc   :  { %v3727_v35 = vadd.f32 %v3726_v40, %v3725_v1  ;;  %v5668_v16 = vpop.eup %5667  ;;  %v3130_v51 = vsel %vm2905_vm3, %v7939_v18, -inf  ;;  %vm2550_vm8 = vcmp.gt.f32.partialorder %v7948_v63, 0.0  ;;  %v3388_v22 = vsub.f32 %v7897_v52, %v3150_v27 }
 0x2dd   :  { %v3716_v14 = vadd.f32 %v3715_v60, %v3714_v38  ;;  %v4149_v58 = vmul.f32 %v5668_v16, %v7836_v29  ;;  %v3129_v28 = vmax.f32 %v3127_v42, %v3128_v34  ;;  %v3131_v1 = vrot.slane %v3130_v51, 4 }
 0x2de   :  { %v4019_v12 = vmax.f32 %v3727_v35, 1e-30  ;;  %v7953_v33 = vsel %vm2550_vm8, %v2708_v36, -3.4028235e+38  ;;  %vm2556_vm9 = vcmp.gt.f32.partialorder %v7958_v59, 0.0  ;;  %v2716_v35 = vpop.permute.xlu1 %2715 }
 0x2df   :  { %v3717_v55 = vrot.slane %v3716_v14, 2  ;;  %v4213_v3 = vmul.f32 %v7693_v7, %v4149_v58  ;;  %v3486_v29 = vmul.f32 1.442695, %v3388_v22  ;;  %v3385_v2 = vsub.f32 %v7914_v31, %v3129_v28  ;;  %v7973_v31 = vld [vmem:[%s9083_s2 + $0x108] sm:$0xff] }
 0x2e0   :  { %5675 = vrcp.f32 %v4019_v12  ;;  %v3132_v19 = vmax.f32 %v3130_v51, %v3131_v1  ;;  %v3109_v40 = vsel %vm2905_vm3, %v7953_v33, -inf  ;;  %v7965_v38 = vsel %vm2556_vm9, %v2720_v49, -3.4028235e+38 }
 0x2e1   :  { %v3718_v52 = vadd.f32 %v3717_v55, %v3716_v14  ;;  %v4277_v47 = vmul.f32 %v6555_v11, %v4213_v3  ;;  %5677 = vpow2.f32 %v3486_v29  ;;  %v3480_v42 = vmul.f32 1.442695, %v3385_v2 }
 0x2e2   :  { %v3110_v60 = vrot.slane %v3109_v40, 4  ;;  %v3133_v34 = vrot.slane %v3132_v19, 2  ;;  %v3151_v7 = vsel %vm2905_vm3, %v7965_v38, -inf  ;;  %vm2554_vm10 = vcmp.gt.f32.partialorder %v7973_v31, 0.0 }
 0x2e3   :  { %v3719_v27 = vrot.slane %v3718_v52, 1  ;;  %v4503_v36 = vsel %vm2905_vm3, %v4277_v47, 0.0  ;;  %5679 = vpow2.f32 %v3480_v42  ;;  %v3152_v16 = vrot.slane %v3151_v7, 4 }
 0x2e4   :  { %v3111_v11 = vmax.f32 %v3109_v40, %v3110_v60  ;;  %v4504_v51 = vrot.slane %v4503_v36, 4  ;;  %v3134_v12 = vmax.f32 %v3132_v19, %v3133_v34  ;;  %v7979_v22 = vsel %vm2554_vm10, %v2716_v35, -3.4028235e+38 }
 0x2e5   :  { %v7977_v14 = vpop.eup %5669  ;;  %v3720_v58 = vadd.f32 %v3719_v27, %v3718_v52  ;;  %v3153_v1 = vmax.f32 %v3151_v7, %v3152_v16  ;;  %v3137_v3 = vsel %vm2905_vm3, %v7979_v22, -inf  ;;  %v4499_v29 = vrot.slane %v7941_v4, 2  ;;  %v9275_v27 = vld [vmem:[#allocation18_spill] sm:$0xff] }
 0x2e6   :  { %v5672_v28 = vpop.eup %5671  ;;  %v3756_v49 = vsel %vm2905_vm3, %v7977_v14, 0.0  ;;  %v3112_v55 = vrot.slane %v3111_v11, 2  ;;  %v7986_v2 = vadd.f32 %v4504_v51, %v4503_v36  ;;  %v3135_v52 = vrot.slane %v3134_v12, 1 }
 0x2e7   :  { %v4018_v40 = vmax.f32 %v3720_v58, 1e-30  ;;  %v3757_v47 = vrot.slane %v3756_v49, 4  ;;  %v7988_v42 = vpop.eup %5673  ;;  %v3154_v60 = vrot.slane %v3153_v1, 2  ;;  %v3138_v35 = vrot.slane %v3137_v3, 4 }
 0x2e8   :  { %9274 = vst [vmem:[#allocation17_spill] sm:$0xff] %v7986_v2  ;;  %v3113_v19 = vmax.f32 %v3111_v11, %v3112_v55  ;;  %v7992_v34 = vmul.f32 %v9275_v27, %v7931_v45  ;;  %v4143_v7 = vmul.f32 %v5672_v28, %v7875_v21  ;;  %v3742_v36 = vsel %vm2905_vm3, %v7988_v42, 0.0 }
 0x2e9   :  { %5681 = vrcp.f32 %v4018_v40  ;;  %v3758_v16 = vadd.f32 %v3757_v47, %v3756_v49  ;;  %v3136_v51 = vmax.f32 %v3134_v12, %v3135_v52  ;;  %v3155_v43 = vmax.f32 %v3153_v1, %v3154_v60 }
 0x2ea   :  { %9276 = vst [vmem:[#allocation16_spill] sm:$0xff] %v7992_v34  ;;  %v3114_v58 = vrot.slane %v3113_v19, 1  ;;  %v7998_v32 = vadd.f32 %v4499_v29, %v7941_v4  ;;  %v3743_v55 = vrot.slane %v3742_v36, 4  ;;  %v3139_v53 = vmax.f32 %v3137_v3, %v3138_v35  ;;  %v8008_v3 = vld [vmem:[%s9083_s2 + $0x130] sm:$0xff] }
 0x2eb   :  { %v3759_v11 = vrot.slane %v3758_v16, 2  ;;  %v3386_v45 = vsub.f32 %v7939_v18, %v3136_v51  ;;  %v3156_v21 = vrot.slane %v3155_v43, 1  ;;  %v4207_v49 = vmul.f32 %v7718_v39, %v4143_v7 }
 0x2ec   :  { %9277 = vst [vmem:[#allocation18_spill] sm:$0xff] %v7998_v32  ;;  %v3115_v27 = vmax.f32 %v3113_v19, %v3114_v58  ;;  %v3744_v47 = vadd.f32 %v3743_v55, %v3742_v36  ;;  %v3140_v12 = vrot.slane %v3139_v53, 2  ;;  %vm2559_vm11 = vcmp.gt.f32.partialorder %v8008_v3, 0.0  ;;  %v9278_v55 = vld [vmem:[#allocation21_spill] sm:$0xff] }
 0x2ed   :  { %v5676_v28 = vpop.eup %5675  ;;  %v3760_v40 = vadd.f32 %v3759_v11, %v3758_v16  ;;  %v3482_v52 = vmul.f32 1.442695, %v3386_v45  ;;  %v3157_v39 = vmax.f32 %v3155_v43, %v3156_v21  ;;  %v2726_v11 = vpop.permute.xlu0 %2725 }
 0x2ee   :  { %v4147_v1 = vmul.f32 %v5676_v28, %v7907_v48  ;;  %v3383_v4 = vsub.f32 %v7953_v33, %v3115_v27  ;;  %v8011_v18 = vpop.eup %5677  ;;  %v3745_v19 = vrot.slane %v3744_v47, 2  ;;  %v3141_v60 = vmax.f32 %v3139_v53, %v3140_v12 }
 0x2ef   :  { %v3761_v29 = vrot.slane %v3760_v40, 1  ;;  %v3784_v48 = vsel %vm2905_vm3, %v8011_v18, 0.0  ;;  %5683 = vpow2.f32 %v3482_v52  ;;  %v3389_v58 = vsub.f32 %v7965_v38, %v3157_v39 }
 0x2f0   :  { %v4211_v35 = vmul.f32 %v7746_v5, %v4147_v1  ;;  %v3476_v33 = vmul.f32 1.442695, %v3383_v4  ;;  %v8016_v7 = vpop.eup %5679  ;;  %v3746_v36 = vadd.f32 %v3745_v19, %v3744_v47  ;;  %v3785_v51 = vrot.slane %v3784_v48, 4 }
 0x2f1   :  { %v3762_v16 = vadd.f32 %v3761_v29, %v3760_v40  ;;  %v3763_v43 = vsel %vm2905_vm3, %v8016_v7, 0.0  ;;  %v3142_v5 = vrot.slane %v3141_v60, 1  ;;  %v3488_v1 = vmul.f32 1.442695, %v3389_v58  ;;  %v2722_v58 = vpop.permute.xlu0 %2721 }
 0x2f2   :  { %v4275_v45 = vmul.f32 %v4211_v35, %v9278_v55  ;;  %5685 = vpow2.f32 %v3476_v33  ;;  %v3747_v27 = vrot.slane %v3746_v36, 1  ;;  %v3786_v21 = vadd.f32 %v3785_v51, %v3784_v48  ;;  %v9279_v48 = vld [vmem:[#allocation19_spill] sm:$0xff] }
 0x2f3   :  { %v4024_v53 = vmax.f32 %v3762_v16, 1e-30  ;;  %v3764_v28 = vrot.slane %v3763_v43, 4  ;;  %v3143_v40 = vmax.f32 %v3141_v60, %v3142_v5  ;;  %v8025_v47 = vsel %vm2559_vm11, %v2726_v11, -3.4028235e+38 }
 0x2f4   :  { %v4489_v12 = vsel %vm2905_vm3, %v4275_v45, 0.0  ;;  %v3748_v52 = vadd.f32 %v3747_v27, %v3746_v36  ;;  %v3787_v4 = vrot.slane %v3786_v21, 2  ;;  %v3172_v35 = vsel %vm2905_vm3, %v8025_v47, -inf  ;;  %v8035_v36 = vld [vmem:[%s9083_s2 + $0x120] sm:$0xff]  ;;  %v2734_v27 = vpop.permute.xlu1 %2733 }
 0x2f5   :  { %v4490_v38 = vrot.slane %v4489_v12, 4  ;;  %5687 = vrcp.f32 %v4024_v53  ;;  %v3765_v19 = vadd.f32 %v3764_v28, %v3763_v43  ;;  %v3387_v39 = vsub.f32 %v7979_v22, %v3143_v40  ;;  %v9281_v28 = vld [vmem:[#allocation20_spill] sm:$0xff] }
 0x2f6   :  { %v5682_v29 = vpop.eup %5681  ;;  %5689 = vpow2.f32 %v3488_v1  ;;  %v4271_v33 = vmul.f32 %v4207_v49, %v9279_v48  ;;  %v4022_v16 = vmax.f32 %v3748_v52, 1e-30  ;;  %v3788_v51 = vadd.f32 %v3787_v4, %v3786_v21  ;;  %v8050_v4 = vld [vmem:[%s9083_s2 + $0x150] sm:$0xff] }
 0x2f7   :  { %v4146_v60 = vmul.f32 %v5682_v29, %v7924_v57  ;;  %v3766_v11 = vrot.slane %v3765_v19, 2  ;;  %v3484_v55 = vmul.f32 1.442695, %v3387_v39  ;;  %v3173_v45 = vrot.slane %v3172_v35, 4 }
 0x2f8   :  { %vm2557_vm12 = vcmp.gt.f32.partialorder %v8035_v36, 0.0  ;;  %v4491_v22 = vadd.f32 %v4490_v38, %v4489_v12  ;;  %5691 = vrcp.f32 %v4022_v16  ;;  %v3789_v49 = vrot.slane %v3788_v51, 1 }
 0x2f9   :  { %v4210_v43 = vmul.f32 %v7789_v62, %v4146_v60  ;;  %v3767_v5 = vadd.f32 %v3766_v11, %v3765_v19  ;;  %5693 = vpow2.f32 %v3484_v55  ;;  %v3174_v57 = vmax.f32 %v3172_v35, %v3173_v45 }
 0x2fa   :  { %v8039_v53 = vsel %vm2557_vm12, %v2722_v58, -3.4028235e+38  ;;  %v8042_v21 = vsel %vm2905_vm3, %v4271_v33, 0.0  ;;  %v3790_v40 = vadd.f32 %v3789_v49, %v3788_v51  ;;  %vm2563_vm13 = vcmp.gt.f32.partialorder %v8050_v4, 0.0 }
 0x2fb   :  { %9280 = vst [vmem:[#allocation21_spill] sm:$0xff] %v8042_v21  ;;  %v4274_v1 = vmul.f32 %v4210_v43, %v9281_v28  ;;  %v3158_v52 = vsel %vm2905_vm3, %v8039_v53, -inf  ;;  %v3768_v12 = vrot.slane %v3767_v5, 1  ;;  %v3175_v38 = vrot.slane %v3174_v57, 2 }
 0x2fc   :  { %v3159_v62 = vrot.slane %v3158_v52, 4  ;;  %v8053_v29 = vpop.eup %5683  ;;  %v4492_v19 = vrot.slane %v4491_v22, 2  ;;  %v4028_v35 = vmax.f32 %v3790_v40, 1e-30  ;;  %v8056_v48 = vsel %vm2563_vm13, %v2734_v27, -3.4028235e+38 }
 0x2fd   :  { %v4482_v39 = vsel %vm2905_vm3, %v4274_v1, 0.0  ;;  %v3769_v60 = vadd.f32 %v3768_v12, %v3767_v5  ;;  %v3770_v16 = vsel %vm2905_vm3, %v8053_v29, 0.0  ;;  %v3176_v51 = vmax.f32 %v3174_v57, %v3175_v38 }
 0x2fe   :  { %v4483_v33 = vrot.slane %v4482_v39, 4  ;;  %5695 = vrcp.f32 %v4028_v35  ;;  %v3771_v11 = vrot.slane %v3770_v16, 4  ;;  %v3160_v55 = vmax.f32 %v3158_v52, %v3159_v62 }
 0x2ff   :  { %v8060_v58 = vpop.eup %5685  ;;  %v3200_v45 = vsel %vm2905_vm3, %v8056_v48, -inf  ;;  %v4025_v49 = vmax.f32 %v3769_v60, 1e-30  ;;  %v3177_v28 = vrot.slane %v3176_v51, 1  ;;  %v8070_v2 = vadd.f32 %v4492_v19, %v4491_v22 }
 0x300   :  { %v4484_v43 = vadd.f32 %v4483_v33, %v4482_v39  ;;  %v3749_v27 = vsel %vm2905_vm3, %v8060_v58, 0.0  ;;  %v3772_v1 = vadd.f32 %v3771_v11, %v3770_v16  ;;  %v3161_v40 = vrot.slane %v3160_v55, 2 }
 0x301   :  { %v3750_v5 = vrot.slane %v3749_v27, 4  ;;  %v3201_v12 = vrot.slane %v3200_v45, 4  ;;  %5697 = vrcp.f32 %v4025_v49  ;;  %v3178_v35 = vmax.f32 %v3176_v51, %v3177_v28  ;;  %9282 = vst [vmem:[#allocation19_spill] sm:$0xff] %v8070_v2  ;;  %v8078_v51 = vld [vmem:[%s9083_s2 + $0x138] sm:$0xff] }
 0x302   :  { %v5688_v15 = vpop.eup %5687  ;;  %v4485_v38 = vrot.slane %v4484_v43, 2  ;;  %v3773_v39 = vrot.slane %v3772_v1, 2  ;;  %v3162_v60 = vmax.f32 %v3160_v55, %v3161_v40  ;;  %vm2560_vm14 = vcmp.gt.f32.partialorder %v8078_v51, 0.0 }
 0x303   :  { %v8067_v52 = vpop.eup %5689  ;;  %v4152_v62 = vmul.f32 %v5688_v15, %v7977_v14  ;;  %v3751_v33 = vadd.f32 %v3750_v5, %v3749_v27  ;;  %v3392_v11 = vsub.f32 %v8025_v47, %v3178_v35  ;;  %v3202_v32 = vmax.f32 %v3200_v45, %v3201_v12 }
 0x304   :  { %v3791_v16 = vsel %vm2905_vm3, %v8067_v52, 0.0  ;;  %v3774_v34 = vadd.f32 %v3773_v39, %v3772_v1  ;;  %v8081_v14 = vadd.f32 %v4485_v38, %v4484_v43  ;;  %v3163_v19 = vrot.slane %v3162_v60, 1  ;;  %v2728_v1 = vpop.permute.xlu0 %2727 }
 0x305   :  { %v3752_v57 = vrot.slane %v3751_v33, 2  ;;  %v3792_v21 = vrot.slane %v3791_v16, 4  ;;  %v5692_v15 = vpop.eup %5691  ;;  %v3494_v22 = vmul.f32 1.442695, %v3392_v11  ;;  %v3203_v55 = vrot.slane %v3202_v32, 2 }
 0x306   :  { %9283 = vst [vmem:[#allocation20_spill] sm:$0xff] %v8081_v14  ;;  %v8083_v49 = vpop.eup %5693  ;;  %v4216_v47 = vmul.f32 %v7851_v54, %v4152_v62  ;;  %v4150_v45 = vmul.f32 %v5692_v15, %v7988_v42  ;;  %v3775_v27 = vrot.slane %v3774_v34, 1  ;;  %v3164_v12 = vmax.f32 %v3162_v60, %v3163_v19 }
 0x307   :  { %v3753_v28 = vadd.f32 %v3752_v57, %v3751_v33  ;;  %v3793_v5 = vadd.f32 %v3792_v21, %v3791_v16  ;;  %v3777_v40 = vsel %vm2905_vm3, %v8083_v49, 0.0  ;;  %5699 = vpow2.f32 %v3494_v22  ;;  %v9284_v57 = vld [vmem:[#allocation23_spill] sm:$0xff] }
 0x308   :  { %v4214_v43 = vmul.f32 %v7866_v41, %v4150_v45  ;;  %v3776_v38 = vadd.f32 %v3775_v27, %v3774_v34  ;;  %v3778_v39 = vrot.slane %v3777_v40, 4  ;;  %v3390_v8 = vsub.f32 %v8039_v53, %v3164_v12  ;;  %v9285_v12 = vld [vmem:[#allocation22_spill] sm:$0xff] }
 0x309   :  { %v3754_v35 = vrot.slane %v3753_v28, 1  ;;  %v3794_v11 = vrot.slane %v3793_v5, 2  ;;  %v3204_v54 = vmax.f32 %v3202_v32, %v3203_v55  ;;  %v8093_v42 = vsel %vm2560_vm14, %v2728_v1, -3.4028235e+38 }
 0x30a   :  { %v4278_v21 = vmul.f32 %v4214_v43, %v9284_v57  ;;  %v4026_v62 = vmax.f32 %v3776_v38, 1e-30  ;;  %v3779_v16 = vadd.f32 %v3778_v39, %v3777_v40  ;;  %v3490_v22 = vmul.f32 1.442695, %v3390_v8  ;;  %v2736_v40 = vpop.permute.xlu1 %2735  ;;  %v9287_v39 = vld [vmem:[#allocation26_spill] sm:$0xff] }
 0x30b   :  { %v3755_v33 = vadd.f32 %v3754_v35, %v3753_v28  ;;  %v5696_v15 = vpop.eup %5695  ;;  %v3795_v60 = vadd.f32 %v3794_v11, %v3793_v5  ;;  %v3205_v41 = vrot.slane %v3204_v54, 1  ;;  %v3179_v34 = vsel %vm2905_vm3, %v8093_v42, -inf }
 0x30c   :  { %v4156_v32 = vmul.f32 %v5696_v15, %v8011_v18  ;;  %5701 = vrcp.f32 %v4026_v62  ;;  %v3780_v27 = vrot.slane %v3779_v16, 2  ;;  %v3180_v5 = vrot.slane %v3179_v34, 4 }
 0x30d   :  { %v4023_v53 = vmax.f32 %v3755_v33, 1e-30  ;;  %v3796_v45 = vrot.slane %v3795_v60, 1  ;;  %5703 = vpow2.f32 %v3490_v22  ;;  %v3206_v8 = vmax.f32 %v3204_v54, %v3205_v41  ;;  %v2724_v22 = vpop.permute.xlu0 %2723 }
 0x30e   :  { %v5698_v28 = vpop.eup %5697  ;;  %v4220_v1 = vmul.f32 %v7888_v13, %v4156_v32  ;;  %v8103_v43 = vmul.f32 %v9285_v12, %v4216_v47  ;;  %v4510_v38 = vsel %vm2905_vm3, %v4278_v21, 0.0  ;;  %v3781_v35 = vadd.f32 %v3780_v27, %v3779_v16  ;;  %v8111_v13 = vld [vmem:[%s9083_s2 + $0x158] sm:$0xff]  ;;  %v8125_v27 = vld [vmem:[%s9083_s2 + $0x128] sm:$0xff] }
 0x30f   :  { %5705 = vrcp.f32 %v4023_v53  ;;  %v3797_v18 = vadd.f32 %v3796_v45, %v3795_v60  ;;  %v3396_v57 = vsub.f32 %v8056_v48, %v3206_v8  ;;  %v3181_v62 = vmax.f32 %v3179_v34, %v3180_v5 }
 0x310   :  { %9286 = vst [vmem:[#allocation23_spill] sm:$0xff] %v8103_v43  ;;  %v4284_v11 = vmul.f32 %v9287_v39, %v4220_v1  ;;  %vm2564_vm15 = vcmp.gt.f32.partialorder %v8111_v13, 0.0  ;;  %v4153_v54 = vmul.f32 %v5698_v28, %v8016_v7  ;;  %v3782_v33 = vrot.slane %v3781_v35, 1 }
 0x311   :  { %v4029_v47 = vmax.f32 %v3797_v18, 1e-30  ;;  %v8115_v15 = vsel %vm2564_vm15, %v2736_v40, -3.4028235e+38  ;;  %v3502_v16 = vmul.f32 1.442695, %v3396_v57  ;;  %v2732_v40 = vpop.permute.xlu1 %2731 }
 0x312   :  { %v4552_v21 = vsel %vm2905_vm3, %v4284_v11, 0.0  ;;  %v3182_v60 = vrot.slane %v3181_v62, 2  ;;  %v3207_v48 = vsel %vm2905_vm3, %v8115_v15, -inf  ;;  %v4511_v41 = vrot.slane %v4510_v38, 4 }
 0x313   :  { %v4553_v34 = vrot.slane %v4552_v21, 4  ;;  %5707 = vrcp.f32 %v4029_v47  ;;  %v3783_v32 = vadd.f32 %v3782_v33, %v3781_v35  ;;  %v3208_v45 = vrot.slane %v3207_v48, 4 }
 0x314   :  { %v8120_v53 = vpop.eup %5699  ;;  %5709 = vpow2.f32 %v3502_v16  ;;  %v3183_v7 = vmax.f32 %v3181_v62, %v3182_v60  ;;  %vm2558_vm1 = vcmp.gt.f32.partialorder %v8125_v27, 0.0  ;;  %v4217_v28 = vmul.f32 %v7904_v37, %v4153_v54  ;;  %v8140_v37 = vld [vmem:[%s9083_s2 + $0x148] sm:$0xff] }
 0x315   :  { %v4027_v1 = vmax.f32 %v3783_v32, 1e-30  ;;  %v3812_v8 = vsel %vm2905_vm3, %v8120_v53, 0.0  ;;  %v8131_v5 = vsel %vm2558_vm1, %v2724_v22, -3.4028235e+38  ;;  %v3209_v35 = vmax.f32 %v3207_v48, %v3208_v45  ;;  %v9289_v48 = vld [vmem:[#allocation24_spill] sm:$0xff] }
 0x316   :  { %v3813_v12 = vrot.slane %v3812_v8, 4  ;;  %v3184_v18 = vrot.slane %v3183_v7, 1  ;;  %v3165_v39 = vsel %vm2905_vm3, %v8131_v5, -inf  ;;  %v8135_v11 = vadd.f32 %v4553_v34, %v4552_v21 }
 0x317   :  { %5711 = vrcp.f32 %v4027_v1  ;;  %v3166_v57 = vrot.slane %v3165_v39, 4  ;;  %vm2562_vm2 = vcmp.gt.f32.partialorder %v8140_v37, 0.0  ;;  %v3210_v47 = vrot.slane %v3209_v35, 2 }
 0x318   :  { %v3814_v62 = vadd.f32 %v3813_v12, %v3812_v8  ;;  %v3185_v54 = vmax.f32 %v3183_v7, %v3184_v18  ;;  %v8143_v33 = vsel %vm2562_vm2, %v2732_v40, -3.4028235e+38  ;;  %v8145_v60 = vadd.f32 %v4511_v41, %v4510_v38 }
 0x319   :  { %v5702_v16 = vpop.eup %5701  ;;  %v8148_v21 = vmul.f32 %v9289_v48, %v4217_v28  ;;  %v3167_v22 = vmax.f32 %v3165_v39, %v3166_v57  ;;  %v3193_v34 = vsel %vm2905_vm3, %v8143_v33, -inf  ;;  %v3211_v8 = vmax.f32 %v3209_v35, %v3210_v47  ;;  %v2730_v35 = vpop.permute.xlu0 %2729 }
 0x31a   :  { %9288 = vst [vmem:[#allocation22_spill] sm:$0xff] %v8145_v60  ;;  %v8152_v32 = vpop.eup %5703  ;;  %v4154_v45 = vmul.f32 %v5702_v16, %v8053_v29  ;;  %v3815_v1 = vrot.slane %v3814_v62, 2  ;;  %v3393_v7 = vsub.f32 %v8093_v42, %v3185_v54  ;;  %v4555_v12 = vrot.slane %v8135_v11, 2  ;;  %v8164_v42 = vld [vmem:[%s9083_s2 + $0x140] sm:$0xff]  ;;  %v9291_v54 = vld [vmem:[#allocation27_spill] sm:$0xff] }
 0x31b   :  { %9290 = vst [vmem:[#allocation26_spill] sm:$0xff] %v8148_v21  ;;  %v3798_v38 = vsel %vm2905_vm3, %v8152_v32, 0.0  ;;  %v3168_v41 = vrot.slane %v3167_v22, 2  ;;  %v3194_v28 = vrot.slane %v3193_v34, 4  ;;  %v3212_v29 = vrot.slane %v3211_v8, 1 }
 0x31c   :  { %v5706_v40 = vpop.eup %5705  ;;  %v4218_v18 = vmul.f32 %v7936_v50, %v4154_v45  ;;  %v3816_v57 = vadd.f32 %v3815_v1, %v3814_v62  ;;  %v3799_v48 = vrot.slane %v3798_v38, 4  ;;  %v3496_v19 = vmul.f32 1.442695, %v3393_v7 }
 0x31d   :  { %v4151_v39 = vmul.f32 %v5706_v40, %v8060_v58  ;;  %v3169_v16 = vmax.f32 %v3167_v22, %v3168_v41  ;;  %vm2561_vm4 = vcmp.gt.f32.partialorder %v8164_v42, 0.0  ;;  %v3195_v50 = vmax.f32 %v3193_v34, %v3194_v28 }
 0x31e   :  { %v4282_v47 = vmul.f32 %v4218_v18, %v9291_v54  ;;  %v3817_v55 = vrot.slane %v3816_v57, 1  ;;  %v3800_v21 = vadd.f32 %v3799_v48, %v3798_v38  ;;  %5713 = vpow2.f32 %v3496_v19  ;;  %v9292_v48 = vld [vmem:[#allocation25_spill] sm:$0xff] }
 0x31f   :  { %v4215_v58 = vmul.f32 %v7948_v63, %v4151_v39  ;;  %v3213_v62 = vmax.f32 %v3211_v8, %v3212_v29  ;;  %v3170_v45 = vrot.slane %v3169_v16, 1  ;;  %v8170_v41 = vsel %vm2561_vm4, %v2730_v35, -3.4028235e+38 }
 0x320   :  { %v5708_v1 = vpop.eup %5707  ;;  %v4538_v22 = vsel %vm2905_vm3, %v4282_v47, 0.0  ;;  %v3818_v7 = vadd.f32 %v3817_v55, %v3816_v57  ;;  %v3801_v40 = vrot.slane %v3800_v21, 2  ;;  %v3196_v8 = vrot.slane %v3195_v50, 2 }
 0x321   :  { %v8172_v43 = vpop.eup %5709  ;;  %v4539_v60 = vrot.slane %v4538_v22, 4  ;;  %v4157_v18 = vmul.f32 %v5708_v1, %v8067_v52  ;;  %v3397_v38 = vsub.f32 %v8115_v15, %v3213_v62  ;;  %v3171_v34 = vmax.f32 %v3169_v16, %v3170_v45  ;;  %v2742_v15 = vpop.permute.xlu1 %2741  ;;  %v9293_v62 = vld [vmem:[#allocation28_spill] sm:$0xff] }
 0x322   :  { %v4032_v28 = vmax.f32 %v3818_v7, 1e-30  ;;  %v3802_v63 = vadd.f32 %v3801_v40, %v3800_v21  ;;  %v3840_v19 = vsel %vm2905_vm3, %v8172_v43, 0.0  ;;  %v4279_v55 = vmul.f32 %v4215_v58, %v9292_v48 }
 0x323   :  { %v4540_v39 = vadd.f32 %v4539_v60, %v4538_v22  ;;  %v4221_v57 = vmul.f32 %v7958_v59, %v4157_v18  ;;  %v3841_v29 = vrot.slane %v3840_v19, 4  ;;  %v3504_v47 = vmul.f32 1.442695, %v3397_v38 }
 0x324   :  { %v5712_v35 = vpop.eup %5711  ;;  %5715 = vrcp.f32 %v4032_v28  ;;  %v3803_v54 = vrot.slane %v3802_v63, 1  ;;  %v3391_v52 = vsub.f32 %v8131_v5, %v3171_v34  ;;  %v3197_v58 = vmax.f32 %v3195_v50, %v3196_v8 }
 0x325   :  { %v4541_v16 = vrot.slane %v4540_v39, 2  ;;  %v4285_v21 = vmul.f32 %v9293_v62, %v4221_v57  ;;  %v4155_v45 = vmul.f32 %v5712_v35, %v8083_v49  ;;  %v3842_v1 = vadd.f32 %v3841_v29, %v3840_v19  ;;  %v9296_v49 = vld [vmem:[#allocation29_spill] sm:$0xff] }
 0x326   :  { %v3804_v7 = vadd.f32 %v3803_v54, %v3802_v63  ;;  %5717 = vpow2.f32 %v3504_v47  ;;  %v3492_v60 = vmul.f32 1.442695, %v3391_v52  ;;  %v8184_v59 = vadd.f32 %v4555_v12, %v8135_v11  ;;  %v8206_v29 = vld [vmem:[%s9083_s2 + $0x160] sm:$0xff] }
 0x327   :  { %v4559_v22 = vsel %vm2905_vm3, %v4285_v21, 0.0  ;;  %v4219_v40 = vmul.f32 %v7973_v31, %v4155_v45  ;;  %v3843_v18 = vrot.slane %v3842_v1, 2  ;;  %v3198_v34 = vrot.slane %v3197_v58, 1  ;;  %v2738_v31 = vpop.permute.xlu1 %2737 }
 0x328   :  { %9294 = vst [vmem:[#allocation24_spill] sm:$0xff] %v8184_v59  ;;  %v4560_v5 = vrot.slane %v4559_v22, 4  ;;  %v4030_v38 = vmax.f32 %v3804_v7, 1e-30  ;;  %5719 = vpow2.f32 %v3492_v60  ;;  %v8189_v28 = vsel %vm2905_vm3, %v4279_v55, 0.0  ;;  %v8200_v55 = vld [vmem:[%s9083_s2 + $0x170] sm:$0xff] }
 0x329   :  { %9295 = vst [vmem:[#allocation27_spill] sm:$0xff] %v8189_v28  ;;  %v4283_v63 = vmul.f32 %v4219_v40, %v9296_v49  ;;  %v3844_v19 = vadd.f32 %v3843_v18, %v3842_v1  ;;  %v3186_v50 = vsel %vm2905_vm3, %v8170_v41, -inf  ;;  %v8194_v11 = vadd.f32 %v4541_v16, %v4540_v39  ;;  %v2750_v40 = vpop.permute.xlu0 %2749 }
 0x32a   :  { %5721 = vrcp.f32 %v4030_v38  ;;  %v3199_v12 = vmax.f32 %v3197_v58, %v3198_v34  ;;  %v3187_v8 = vrot.slane %v3186_v50, 4  ;;  %vm2567_vm5 = vcmp.gt.f32.partialorder %v8200_v55, 0.0 }
 0x32b   :  { %9297 = vst [vmem:[#allocation25_spill] sm:$0xff] %v8194_v11  ;;  %v4545_v48 = vsel %vm2905_vm3, %v4283_v63, 0.0  ;;  %v3845_v57 = vrot.slane %v3844_v19, 1  ;;  %vm2565_vm6 = vcmp.gt.f32.partialorder %v8206_v29, 0.0  ;;  %v8209_v39 = vpop.eup %5713  ;;  %v8211_v35 = vadd.f32 %v4560_v5, %v4559_v22  ;;  %v8227_v5 = vld [vmem:[%s9083_s2 + $0x190] sm:$0xff] }
 0x32c   :  { %v4546_v54 = vrot.slane %v4545_v48, 4  ;;  %v3395_v47 = vsub.f32 %v8143_v33, %v3199_v12  ;;  %v3188_v52 = vmax.f32 %v3186_v50, %v3187_v8  ;;  %v3819_v62 = vsel %vm2905_vm3, %v8209_v39, 0.0 }
 0x32d   :  { %9298 = vst [vmem:[#allocation28_spill] sm:$0xff] %v8211_v35  ;;  %v3846_v16 = vadd.f32 %v3845_v57, %v3844_v19  ;;  %v8216_v21 = vsel %vm2567_vm5, %v2742_v15, -3.4028235e+38  ;;  %v8218_v45 = vsel %vm2565_vm6, %v2738_v31, -3.4028235e+38  ;;  %v3820_v7 = vrot.slane %v3819_v62, 4 }
 0x32e   :  { %v4547_v1 = vadd.f32 %v4546_v54, %v4545_v48  ;;  %v3500_v60 = vmul.f32 1.442695, %v3395_v47  ;;  %v3189_v58 = vrot.slane %v3188_v52, 2  ;;  %v3228_v22 = vsel %vm2905_vm3, %v8216_v21, -inf }
 0x32f   :  { %v4036_v18 = vmax.f32 %v3846_v16, 1e-30  ;;  %v3214_v33 = vsel %vm2905_vm3, %v8218_v45, -inf  ;;  %vm2571_vm7 = vcmp.gt.f32.partialorder %v8227_v5, 0.0  ;;  %v3821_v38 = vadd.f32 %v3820_v7, %v3819_v62 }
 0x330   :  { %v4548_v15 = vrot.slane %v4547_v1, 2  ;;  %5723 = vpow2.f32 %v3500_v60  ;;  %v3190_v34 = vmax.f32 %v3188_v52, %v3189_v58  ;;  %v3229_v63 = vrot.slane %v3228_v22, 4 }
 0x331   :  { %v5716_v49 = vpop.eup %5715  ;;  %5725 = vrcp.f32 %v4036_v18  ;;  %v3215_v19 = vrot.slane %v3214_v33, 4  ;;  %v8230_v50 = vsel %vm2571_vm7, %v2750_v40, -3.4028235e+38  ;;  %v3822_v31 = vrot.slane %v3821_v38, 2 }
 0x332   :  { %v3191_v48 = vrot.slane %v3190_v34, 1  ;;  %v3230_v47 = vmax.f32 %v3228_v22, %v3229_v63  ;;  %v3256_v52 = vsel %vm2905_vm3, %v8230_v50, -inf  ;;  %v8239_v62 = vadd.f32 %v4548_v15, %v4547_v1  ;;  %v8251_v1 = vld [vmem:[%s9083_s2 + $0x178] sm:$0xff] }
 0x333   :  { %v8234_v57 = vpop.eup %5717  ;;  %v3216_v16 = vmax.f32 %v3214_v33, %v3215_v19  ;;  %v4160_v7 = vmul.f32 %v5716_v49, %v8120_v53  ;;  %v3823_v60 = vadd.f32 %v3822_v31, %v3821_v38  ;;  %v3257_v33 = vrot.slane %v3256_v52, 4 }
 0x334   :  { %9299 = vst [vmem:[#allocation29_spill] sm:$0xff] %v8239_v62  ;;  %v3847_v58 = vsel %vm2905_vm3, %v8234_v57, 0.0  ;;  %v3192_v12 = vmax.f32 %v3190_v34, %v3191_v48  ;;  %v3231_v8 = vrot.slane %v3230_v47, 2  ;;  %vm2568_vm8 = vcmp.gt.f32.partialorder %v8251_v1, 0.0 }
 0x335   :  { %v8244_v40 = vpop.eup %5719  ;;  %v3848_v18 = vrot.slane %v3847_v58, 4  ;;  %v3217_v11 = vrot.slane %v3216_v16, 2  ;;  %v3824_v54 = vrot.slane %v3823_v60, 1  ;;  %v3258_v48 = vmax.f32 %v3256_v52, %v3257_v33 }
 0x336   :  { %v3805_v22 = vsel %vm2905_vm3, %v8244_v40, 0.0  ;;  %v3394_v49 = vsub.f32 %v8170_v41, %v3192_v12  ;;  %v3232_v34 = vmax.f32 %v3230_v47, %v3231_v8 }
 0x337   :  { %v5722_v53 = vpop.eup %5721  ;;  %v3849_v15 = vadd.f32 %v3848_v18, %v3847_v58  ;;  %v3806_v38 = vrot.slane %v3805_v22, 4  ;;  %v3825_v19 = vadd.f32 %v3824_v54, %v3823_v60  ;;  %v3218_v31 = vmax.f32 %v3216_v16, %v3217_v11  ;;  %v2744_v11 = vpop.permute.xlu1 %2743  ;;  %v9300_v54 = vld [vmem:[#allocation31_spill] sm:$0xff] }
 0x338   :  { %v4158_v63 = vmul.f32 %v5722_v53, %v8152_v32  ;;  %v3498_v28 = vmul.f32 1.442695, %v3394_v49  ;;  %v3233_v2 = vrot.slane %v3232_v34, 1  ;;  %v3259_v46 = vrot.slane %v3258_v48, 2 }
 0x339   :  { %v3850_v35 = vrot.slane %v3849_v15, 2  ;;  %v3807_v59 = vadd.f32 %v3806_v38, %v3805_v22  ;;  %v4033_v9 = vmax.f32 %v3825_v19, 1e-30  ;;  %v3219_v17 = vrot.slane %v3218_v31, 1 }
 0x33a   :  { %v4222_v14 = vmul.f32 %v8035_v36, %v4158_v63  ;;  %5727 = vpow2.f32 %v3498_v28  ;;  %v3234_v18 = vmax.f32 %v3232_v34, %v3233_v2  ;;  %v3260_v12 = vmax.f32 %v3258_v48, %v3259_v46  ;;  %v9301_v34 = vld [vmem:[#allocation34_spill] sm:$0xff] }
 0x33b   :  { %v3851_v56 = vadd.f32 %v3850_v35, %v3849_v15  ;;  %v3808_v58 = vrot.slane %v3807_v59, 2  ;;  %5729 = vrcp.f32 %v4033_v9  ;;  %v3220_v32 = vmax.f32 %v3218_v31, %v3219_v17 }
 0x33c   :  { %v4286_v47 = vmul.f32 %v4222_v14, %v9300_v54  ;;  %v3400_v36 = vsub.f32 %v8216_v21, %v3234_v18  ;;  %v8263_v35 = vmul.f32 %v8008_v3, %v4160_v7  ;;  %v3261_v17 = vrot.slane %v3260_v12, 1 }
 0x33d   :  { %v8258_v8 = vpop.eup %5723  ;;  %v3852_v16 = vrot.slane %v3851_v56, 1  ;;  %v3809_v52 = vadd.f32 %v3808_v58, %v3807_v59  ;;  %v3398_v9 = vsub.f32 %v8218_v45, %v3220_v32  ;;  %v8271_v14 = vsel %vm2568_vm8, %v2744_v11, -3.4028235e+38  ;;  %v2746_v59 = vpop.permute.xlu0 %2745 }
 0x33e   :  { %v5726_v60 = vpop.eup %5725  ;;  %v3833_v2 = vsel %vm2905_vm3, %v8258_v8, 0.0  ;;  %v3510_v33 = vmul.f32 1.442695, %v3400_v36  ;;  %v3262_v3 = vmax.f32 %v3260_v12, %v3261_v17  ;;  %v4566_v7 = vsel %vm2905_vm3, %v4286_v47, 0.0  ;;  %v2740_v12 = vpop.permute.xlu1 %2739 }
 0x33f   :  { %v4164_v46 = vmul.f32 %v5726_v60, %v8172_v43  ;;  %v3853_v28 = vadd.f32 %v3852_v16, %v3851_v56  ;;  %v3810_v22 = vrot.slane %v3809_v52, 1  ;;  %v3834_v21 = vrot.slane %v3833_v2, 4  ;;  %v8293_v60 = vld [vmem:[%s9083_s2 + $0x168] sm:$0xff] }
 0x340   :  { %v3506_v53 = vmul.f32 1.442695, %v3398_v9  ;;  %5731 = vpow2.f32 %v3510_v33  ;;  %v3404_v56 = vsub.f32 %v8230_v50, %v3262_v3  ;;  %v3235_v43 = vsel %vm2905_vm3, %v8271_v14, -inf }
 0x341   :  { %v4228_v15 = vmul.f32 %v8050_v4, %v4164_v46  ;;  %v4037_v38 = vmax.f32 %v3853_v28, 1e-30  ;;  %v3811_v45 = vadd.f32 %v3810_v22, %v3809_v52  ;;  %v3835_v49 = vadd.f32 %v3834_v21, %v3833_v2  ;;  %v8282_v4 = vld [vmem:[%s9083_s2 + $0x180] sm:$0xff]  ;;  %v2752_v11 = vpop.permute.xlu0 %2751  ;;  %v8299_v2 = vld [vmem:[%s9083_s2 + $0x198] sm:$0xff] }
 0x342   :  { %v3236_v31 = vrot.slane %v3235_v43, 4  ;;  %v3518_v58 = vmul.f32 1.442695, %v3404_v56  ;;  %vm2569_vm9 = vcmp.gt.f32.partialorder %v8282_v4, 0.0  ;;  %vm2566_vm10 = vcmp.gt.f32.partialorder %v8293_v60, 0.0 }
 0x343   :  { %v4292_v63 = vmul.f32 %v9301_v34, %v4228_v15  ;;  %5733 = vrcp.f32 %v4037_v38  ;;  %v4031_v19 = vmax.f32 %v3811_v45, 1e-30  ;;  %v3836_v48 = vrot.slane %v3835_v49, 2 }
 0x344   :  { %5735 = vpow2.f32 %v3506_v53  ;;  %v3237_v18 = vmax.f32 %v3235_v43, %v3236_v31  ;;  %v8286_v32 = vsel %vm2569_vm9, %v2746_v59, -3.4028235e+38  ;;  %vm2572_vm11 = vcmp.gt.f32.partialorder %v8299_v2, 0.0 }
 0x345   :  { %v4608_v50 = vsel %vm2905_vm3, %v4292_v63, 0.0  ;;  %5737 = vrcp.f32 %v4031_v19  ;;  %v3837_v47 = vadd.f32 %v3836_v48, %v3835_v49  ;;  %v3242_v16 = vsel %vm2905_vm3, %v8286_v32, -inf  ;;  %v9302_v19 = vld [vmem:[#allocation30_spill] sm:$0xff] }
 0x346   :  { %v4609_v54 = vrot.slane %v4608_v50, 4  ;;  %5739 = vpow2.f32 %v3518_v58  ;;  %v3238_v52 = vrot.slane %v3237_v18, 2  ;;  %v3243_v36 = vrot.slane %v3242_v16, 4 }
 0x347   :  { %v8302_v9 = vpop.eup %5727  ;;  %v3838_v46 = vrot.slane %v3837_v47, 1  ;;  %v8304_v28 = vsel %vm2566_vm10, %v2740_v12, -3.4028235e+38  ;;  %v8306_v22 = vsel %vm2572_vm11, %v2752_v11, -3.4028235e+38  ;;  %v4567_v15 = vrot.slane %v4566_v7, 4 }
 0x348   :  { %v4610_v17 = vadd.f32 %v4609_v54, %v4608_v50  ;;  %v5730_v59 = vpop.eup %5729  ;;  %v3826_v21 = vsel %vm2905_vm3, %v8302_v9, 0.0  ;;  %v3239_v33 = vmax.f32 %v3237_v18, %v3238_v52  ;;  %v3244_v53 = vmax.f32 %v3242_v16, %v3243_v36 }
 0x349   :  { %v3221_v3 = vsel %vm2905_vm3, %v8304_v28, -inf  ;;  %v3839_v45 = vadd.f32 %v3838_v46, %v3837_v47  ;;  %v3827_v49 = vrot.slane %v3826_v21, 4  ;;  %v3263_v63 = vsel %vm2905_vm3, %v8306_v22, -inf }
 0x34a   :  { %v4611_v38 = vrot.slane %v4610_v17, 2  ;;  %v3240_v56 = vrot.slane %v3239_v33, 1  ;;  %v3245_v43 = vrot.slane %v3244_v53, 2  ;;  %v3222_v34 = vrot.slane %v3221_v3, 4 }
 0x34b   :  { %v8316_v31 = vmul.f32 %v9302_v19, %v8263_v35  ;;  %v4161_v48 = vmul.f32 %v5730_v59, %v8209_v39  ;;  %v4035_v58 = vmax.f32 %v3839_v45, 1e-30  ;;  %v3828_v50 = vadd.f32 %v3827_v49, %v3826_v21  ;;  %v8329_v39 = vld [vmem:[%s9083_s2 + $0x188] sm:$0xff]  ;;  %v2748_v59 = vpop.permute.xlu1 %2747 }
 0x34c   :  { %v3241_v18 = vmax.f32 %v3239_v33, %v3240_v56  ;;  %v3246_v12 = vmax.f32 %v3244_v53, %v3245_v43  ;;  %v3223_v11 = vmax.f32 %v3221_v3, %v3222_v34  ;;  %v3264_v54 = vrot.slane %v3263_v63, 4 }
 0x34d   :  { %9303 = vst [vmem:[#allocation31_spill] sm:$0xff] %v8316_v31  ;;  %v8319_v47 = vadd.f32 %v4567_v15, %v4566_v7  ;;  %v8321_v16 = vadd.f32 %v4611_v38, %v4610_v17  ;;  %5741 = vrcp.f32 %v4035_v58  ;;  %v3829_v52 = vrot.slane %v3828_v50, 2  ;;  %v8323_v36 = vpop.eup %5731 }
 0x34e   :  { %v3401_v46 = vsub.f32 %v8271_v14, %v3241_v18  ;;  %v3247_v35 = vrot.slane %v3246_v12, 1  ;;  %v3224_v19 = vrot.slane %v3223_v11, 2  ;;  %vm2570_vm12 = vcmp.gt.f32.partialorder %v8329_v39, 0.0 }
 0x34f   :  { %9304 = vst [vmem:[#allocation34_spill] sm:$0xff] %v8321_v16  ;;  %v4225_v17 = vmul.f32 %v8078_v51, %v4161_v48  ;;  %v3830_v21 = vadd.f32 %v3829_v52, %v3828_v50  ;;  %v3868_v33 = vsel %vm2905_vm3, %v8323_v36, 0.0  ;;  %v3265_v53 = vmax.f32 %v3263_v63, %v3264_v54 }
 0x350   :  { %v5734_v7 = vpop.eup %5733  ;;  %v3869_v15 = vrot.slane %v3868_v33, 4  ;;  %v3512_v38 = vmul.f32 1.442695, %v3401_v46  ;;  %v3248_v45 = vmax.f32 %v3246_v12, %v3247_v35  ;;  %v3225_v34 = vmax.f32 %v3223_v11, %v3224_v19  ;;  %v9305_v11 = vld [vmem:[#allocation36_spill] sm:$0xff] }
 0x351   :  { %v8335_v3 = vpop.eup %5735  ;;  %v4165_v14 = vmul.f32 %v5734_v7, %v8234_v57  ;;  %v3831_v56 = vrot.slane %v3830_v21, 1  ;;  %v8342_v51 = vsel %vm2570_vm12, %v2748_v59, -3.4028235e+38  ;;  %vm4958_vm9 = vcmask 1041409  }
 0x352   :  { %v5738_v49 = vpop.eup %5737  ;;  %v3854_v43 = vsel %vm2905_vm3, %v8335_v3, 0.0  ;;  %v3870_v57 = vadd.f32 %v3869_v15, %v3868_v33  ;;  %5743 = vpow2.f32 %v3512_v38  ;;  %v3402_v54 = vsub.f32 %v8286_v32, %v3248_v45 }
 0x353   :  { %v8344_v48 = vpop.eup %5739  ;;  %v4229_v63 = vmul.f32 %v8111_v13, %v4165_v14  ;;  %v4159_v58 = vmul.f32 %v5738_v49, %v8244_v40  ;;  %v3855_v50 = vrot.slane %v3854_v43, 4  ;;  %v3832_v18 = vadd.f32 %v3831_v56, %v3830_v21  ;;  %v9306_v49 = vld [vmem:[#allocation33_spill] sm:$0xff]  ;;  %v9307_v56 = vld [vmem:[#allocation32_spill] sm:$0xff] }
 0x354   :  { %v3896_v12 = vsel %vm2905_vm3, %v8344_v48, 0.0  ;;  %v3871_v35 = vrot.slane %v3870_v57, 2  ;;  %v3514_v13 = vmul.f32 1.442695, %v3402_v54  ;;  %v3226_v14 = vrot.slane %v3225_v34, 1 }
 0x355   :  { %v4293_v52 = vmul.f32 %v9305_v11, %v4229_v63  ;;  %v4223_v46 = vmul.f32 %v8125_v27, %v4159_v58  ;;  %v3856_v19 = vadd.f32 %v3855_v50, %v3854_v43  ;;  %v4034_v59 = vmax.f32 %v3832_v18, 1e-30  ;;  %v2754_v58 = vpop.permute.xlu0 %2753 }
 0x356   :  { %v3897_v7 = vrot.slane %v3896_v12, 4  ;;  %v3872_v21 = vadd.f32 %v3871_v35, %v3870_v57  ;;  %v3266_v15 = vrot.slane %v3265_v53, 2  ;;  %v3227_v45 = vmax.f32 %v3225_v34, %v3226_v14  ;;  %v8365_v57 = vld [vmem:[%s9083_s2 + $0x1a0] sm:$0xff] }
 0x357   :  { %v8354_v40 = vsel %vm2905_vm3, %v4293_v52, 0.0  ;;  %v3857_v33 = vrot.slane %v3856_v19, 2  ;;  %v4287_v38 = vmul.f32 %v4223_v46, %v9306_v49  ;;  %5745 = vrcp.f32 %v4034_v59 }
 0x358   :  { %v3898_v32 = vadd.f32 %v3897_v7, %v3896_v12  ;;  %v8358_v63 = vmul.f32 %v9307_v56, %v4225_v17  ;;  %v3873_v27 = vrot.slane %v3872_v21, 1  ;;  %5747 = vpow2.f32 %v3514_v13 }
 0x359   :  { %v3858_v43 = vadd.f32 %v3857_v33, %v3856_v19  ;;  %v4616_v50 = vrot.slane %v8354_v40, 4  ;;  %v3399_v54 = vsub.f32 %v8304_v28, %v3227_v45  ;;  %vm2573_vm13 = vcmp.gt.f32.partialorder %v8365_v57, 0.0  ;;  %v2756_v45 = vpop.permute.xlu0 %2755 }
 0x35a   :  { %9308 = vst [vmem:[#allocation30_spill] sm:$0xff] %v8358_v63  ;;  %v3899_v18 = vrot.slane %v3898_v32, 2  ;;  %v5742_v34 = vpop.eup %5741  ;;  %v3874_v12 = vadd.f32 %v3873_v27, %v3872_v21  ;;  %v3267_v11 = vmax.f32 %v3265_v53, %v3266_v15  ;;  %v3249_v52 = vsel %vm2905_vm3, %v8342_v51, -inf }
 0x35b   :  { %v3859_v17 = vrot.slane %v3858_v43, 1  ;;  %v8371_v46 = vsel %vm2905_vm3, %v4287_v38, 0.0  ;;  %v4163_v35 = vmul.f32 %v5742_v34, %v8258_v8  ;;  %v3508_v19 = vmul.f32 1.442695, %v3399_v54  ;;  %v9310_v8 = vld [vmem:[#allocation37_spill] sm:$0xff] }
 0x35c   :  { %9309 = vst [vmem:[#allocation36_spill] sm:$0xff] %v8371_v46  ;;  %v3900_v28 = vadd.f32 %v3899_v18, %v3898_v32  ;;  %v4040_v59 = vmax.f32 %v3874_v12, 1e-30  ;;  %v3268_v13 = vrot.slane %v3267_v11, 1  ;;  %v3250_v14 = vrot.slane %v3249_v52, 4 }
 0x35d   :  { %v3860_v7 = vadd.f32 %v3859_v17, %v3858_v43  ;;  %v4227_v33 = vmul.f32 %v8140_v37, %v4163_v35  ;;  %5749 = vpow2.f32 %v3508_v19  ;;  %v8377_v53 = vsel %vm2573_vm13, %v2754_v58, -3.4028235e+38  ;;  %v8385_v37 = vld [vmem:[%s9083_s2 + $0x1a8] sm:$0xff] }
 0x35e   :  { %v3901_v49 = vrot.slane %v3900_v28, 1  ;;  %5751 = vrcp.f32 %v4040_v59  ;;  %v3269_v15 = vmax.f32 %v3267_v11, %v3268_v13  ;;  %v3251_v38 = vmax.f32 %v3249_v52, %v3250_v14  ;;  %v2766_v59 = vpop.permute.xlu1 %2765  ;;  %v8401_v13 = vld [vmem:[%s9083_s2 + $0x1d0] sm:$0xff] }
 0x35f   :  { %v4038_v21 = vmax.f32 %v3860_v7, 1e-30  ;;  %v4291_v32 = vmul.f32 %v4227_v33, %v9310_v8  ;;  %v3270_v27 = vsel %vm2905_vm3, %v8377_v53, -inf  ;;  %vm2574_vm14 = vcmp.gt.f32.partialorder %v8385_v37, 0.0  ;;  %v8388_v43 = vpop.eup %5743 }
 0x360   :  { %v3902_v56 = vadd.f32 %v3901_v49, %v3900_v28  ;;  %v3405_v58 = vsub.f32 %v8306_v22, %v3269_v15  ;;  %v3252_v18 = vrot.slane %v3251_v38, 2  ;;  %v3271_v54 = vrot.slane %v3270_v27, 4 }
 0x361   :  { %5753 = vrcp.f32 %v4038_v21  ;;  %v4601_v34 = vsel %vm2905_vm3, %v4291_v32, 0.0  ;;  %v3875_v17 = vsel %vm2905_vm3, %v8388_v43, 0.0  ;;  %v8394_v11 = vsel %vm2574_vm14, %v2756_v45, -3.4028235e+38 }
 0x362   :  { %v4044_v12 = vmax.f32 %v3902_v56, 1e-30  ;;  %v4602_v52 = vrot.slane %v4601_v34, 4  ;;  %v3876_v35 = vrot.slane %v3875_v17, 4  ;;  %v3520_v28 = vmul.f32 1.442695, %v3405_v58 }
 0x363   :  { %v3253_v19 = vmax.f32 %v3251_v38, %v3252_v18  ;;  %v3272_v7 = vmax.f32 %v3270_v27, %v3271_v54  ;;  %v3277_v22 = vsel %vm2905_vm3, %v8394_v11, -inf  ;;  %vm2579_vm15 = vcmp.gt.f32.partialorder %v8401_v13, 0.0 }
 0x364   :  { %5755 = vrcp.f32 %v4044_v12  ;;  %v5746_v14 = vpop.eup %5745  ;;  %v4603_v33 = vadd.f32 %v4602_v52, %v4601_v34  ;;  %v3877_v49 = vadd.f32 %v3876_v35, %v3875_v17  ;;  %v3278_v8 = vrot.slane %v3277_v22, 4 }
 0x365   :  { %5757 = vpow2.f32 %v3520_v28  ;;  %v3254_v21 = vrot.slane %v3253_v19, 1  ;;  %v8404_v15 = vpop.eup %5747  ;;  %v4162_v38 = vmul.f32 %v5746_v14, %v8302_v9  ;;  %v3273_v45 = vrot.slane %v3272_v7, 2 }
 0x366   :  { %v8407_v32 = vsel %vm2579_vm15, %v2766_v59, -3.4028235e+38  ;;  %v4604_v56 = vrot.slane %v4603_v33, 2  ;;  %v3878_v27 = vrot.slane %v3877_v49, 2  ;;  %v3882_v58 = vsel %vm2905_vm3, %v8404_v15, 0.0  ;;  %v9311_v59 = vld [vmem:[#allocation35_spill] sm:$0xff] }
 0x367   :  { %v3255_v18 = vmax.f32 %v3253_v19, %v3254_v21  ;;  %v4226_v54 = vmul.f32 %v8164_v42, %v4162_v38  ;;  %v3883_v34 = vrot.slane %v3882_v58, 4  ;;  %v3274_v12 = vmax.f32 %v3272_v7, %v3273_v45 }
 0x368   :  { %v3279_v17 = vmax.f32 %v3277_v22, %v3278_v8  ;;  %v8415_v52 = vadd.f32 %v4616_v50, %v8354_v40  ;;  %v3879_v35 = vadd.f32 %v3878_v27, %v3877_v49  ;;  %v8422_v42 = vadd.f32 %v4604_v56, %v4603_v33 }
 0x369   :  { %v3403_v28 = vsub.f32 %v8342_v51, %v3255_v18  ;;  %v4290_v14 = vmul.f32 %v4226_v54, %v9311_v59  ;;  %v3884_v41 = vadd.f32 %v3883_v34, %v3882_v58  ;;  %v3275_v16 = vrot.slane %v3274_v12, 1 }
 0x36a   :  { %v3280_v19 = vrot.slane %v3279_v17, 2  ;;  %v8420_v21 = vpop.eup %5749  ;;  %v3880_v7 = vrot.slane %v3879_v35, 1  ;;  %v3312_v40 = vsel %vm2905_vm3, %v8407_v32, -inf  ;;  %vm4960_vm10 = vcmask 1042434  }
 0x36b   :  { %v3516_v22 = vmul.f32 1.442695, %v3403_v28  ;;  %v5752_v50 = vpop.eup %5751  ;;  %v4594_v38 = vsel %vm2905_vm3, %v4290_v14, 0.0  ;;  %v3885_v49 = vrot.slane %v3884_v41, 2  ;;  %v3861_v51 = vsel %vm2905_vm3, %v8420_v21, 0.0 }
 0x36c   :  { %v3276_v45 = vmax.f32 %v3274_v12, %v3275_v16  ;;  %v4595_v8 = vrot.slane %v4594_v38, 4  ;;  %v4168_v27 = vmul.f32 %v5752_v50, %v8323_v36  ;;  %v3881_v58 = vadd.f32 %v3880_v7, %v3879_v35  ;;  %v9312_v7 = vld [vmem:[#allocation39_spill] sm:$0xff] }
 0x36d   :  { %v3862_v18 = vrot.slane %v3861_v51, 4  ;;  %v3886_v56 = vadd.f32 %v3885_v49, %v3884_v41  ;;  %5759 = vpow2.f32 %v3516_v22  ;;  %v3281_v34 = vmax.f32 %v3279_v17, %v3280_v19  ;;  %v2762_v49 = vpop.permute.xlu0 %2761 }
 0x36e   :  { %v5754_v33 = vpop.eup %5753  ;;  %v3406_v54 = vsub.f32 %v8377_v53, %v3276_v45  ;;  %v4596_v28 = vadd.f32 %v4595_v8, %v4594_v38  ;;  %v4041_v14 = vmax.f32 %v3881_v58, 1e-30  ;;  %v3313_v9 = vrot.slane %v3312_v40, 4 }
 0x36f   :  { %v4166_v59 = vmul.f32 %v5754_v33, %v8335_v3  ;;  %v3887_v63 = vrot.slane %v3886_v56, 1  ;;  %v3863_v62 = vadd.f32 %v3862_v18, %v3861_v51  ;;  %v3282_v16 = vrot.slane %v3281_v34, 1  ;;  %v9315_v18 = vld [vmem:[#allocation42_spill] sm:$0xff] }
 0x370   :  { %v3522_v31 = vmul.f32 1.442695, %v3406_v54  ;;  %v4597_v46 = vrot.slane %v4596_v28, 2  ;;  %v4232_v36 = vmul.f32 %v8200_v55, %v4168_v27  ;;  %5761 = vrcp.f32 %v4041_v14 }
 0x371   :  { %v5756_v12 = vpop.eup %5755  ;;  %v4230_v35 = vmul.f32 %v8206_v29, %v4166_v59  ;;  %v3888_v17 = vadd.f32 %v3887_v63, %v3886_v56  ;;  %v3864_v19 = vrot.slane %v3863_v62, 2  ;;  %v3283_v38 = vmax.f32 %v3281_v34, %v3282_v16  ;;  %v2768_v16 = vpop.permute.xlu1 %2767 }
 0x372   :  { %v8434_v41 = vpop.eup %5757  ;;  %v4172_v53 = vmul.f32 %v5756_v12, %v8344_v48  ;;  %5763 = vpow2.f32 %v3522_v31  ;;  %v9313_v48 = vld [vmem:[#allocation38_spill] sm:$0xff]  ;;  %v3314_v27 = vmax.f32 %v3312_v40, %v3313_v9  ;;  %v8447_v58 = vadd.f32 %v4597_v46, %v4596_v28  ;;  %v2758_v12 = vpop.permute.xlu0 %2757 }
 0x373   :  { %v4294_v22 = vmul.f32 %v4230_v35, %v9312_v7  ;;  %v3903_v50 = vsel %vm2905_vm3, %v8434_v41, 0.0  ;;  %v4042_v29 = vmax.f32 %v3888_v17, 1e-30  ;;  %v3865_v51 = vadd.f32 %v3864_v19, %v3863_v62  ;;  %v8453_v62 = vld [vmem:[%s9083_s2 + $0x1c0] sm:$0xff]  ;;  %v8473_v17 = vld [vmem:[%s9083_s2 + $0x1b0] sm:$0xff] }
 0x374   :  { %v4236_v55 = vmul.f32 %v8227_v5, %v4172_v53  ;;  %v3904_v45 = vrot.slane %v3903_v50, 4  ;;  %v8444_v63 = vmul.f32 %v9313_v48, %v4232_v36  ;;  %v3407_v31 = vsub.f32 %v8394_v11, %v3283_v38  ;;  %v8467_v53 = vld [vmem:[%s9083_s2 + $0x1d8] sm:$0xff] }
 0x375   :  { %5765 = vrcp.f32 %v4042_v29  ;;  %v3866_v56 = vrot.slane %v3865_v51, 1  ;;  %v3315_v5 = vrot.slane %v3314_v27, 2  ;;  %vm2577_vm1 = vcmp.gt.f32.partialorder %v8453_v62, 0.0 }
 0x376   :  { %9314 = vst [vmem:[#allocation33_spill] sm:$0xff] %v8444_v63  ;;  %v4300_v33 = vmul.f32 %v9315_v18, %v4236_v55  ;;  %v3905_v54 = vadd.f32 %v3904_v45, %v3903_v50  ;;  %v3524_v34 = vmul.f32 1.442695, %v3407_v31  ;;  %v8457_v59 = vsel %vm2905_vm3, %v4294_v22, 0.0 }
 0x377   :  { %v3867_v11 = vadd.f32 %v3866_v56, %v3865_v51  ;;  %v8460_v9 = vsel %vm2577_vm1, %v2762_v49, -3.4028235e+38  ;;  %v3316_v14 = vmax.f32 %v3314_v27, %v3315_v5  ;;  %vm2580_vm2 = vcmp.gt.f32.partialorder %v8467_v53, 0.0 }
 0x378   :  { %v4664_v46 = vsel %vm2905_vm3, %v4300_v33, 0.0  ;;  %v3906_v28 = vrot.slane %v3905_v54, 2  ;;  %5767 = vpow2.f32 %v3524_v34  ;;  %v3298_v35 = vsel %vm2905_vm3, %v8460_v9, -inf }
 0x379   :  { %v4665_v40 = vrot.slane %v4664_v46, 4  ;;  %v4039_v36 = vmax.f32 %v3867_v11, 1e-30  ;;  %vm2575_vm4 = vcmp.gt.f32.partialorder %v8473_v17, 0.0  ;;  %v3317_v50 = vrot.slane %v3316_v14, 1 }
 0x37a   :  { %v8476_v19 = vpop.eup %5759  ;;  %v3907_v22 = vadd.f32 %v3906_v28, %v3905_v54  ;;  %v3299_v38 = vrot.slane %v3298_v35, 4  ;;  %v8482_v55 = vsel %vm2580_vm2, %v2768_v16, -3.4028235e+38  ;;  %v8484_v29 = vsel %vm2575_vm4, %v2758_v12, -3.4028235e+38 }
 0x37b   :  { %v8478_v7 = vadd.f32 %v4665_v40, %v4664_v46  ;;  %5769 = vrcp.f32 %v4039_v36  ;;  %v3889_v49 = vsel %vm2905_vm3, %v8476_v19, 0.0  ;;  %v3318_v31 = vmax.f32 %v3316_v14, %v3317_v50 }
 0x37c   :  { %v3908_v45 = vrot.slane %v3907_v22, 1  ;;  %v3890_v48 = vrot.slane %v3889_v49, 4  ;;  %v3300_v56 = vmax.f32 %v3298_v35, %v3299_v38  ;;  %v3319_v54 = vsel %vm2905_vm3, %v8482_v55, -inf  ;;  %v8502_v38 = vld [vmem:[%s9083_s2 + $0x1c8] sm:$0xff] }
 0x37d   :  { %v5762_v27 = vpop.eup %5761  ;;  %v3284_v40 = vsel %vm2905_vm3, %v8484_v29, -inf  ;;  %v3412_v14 = vsub.f32 %v8407_v32, %v3318_v31  ;;  %v3320_v12 = vrot.slane %v3319_v54, 4  ;;  %vm2578_vm5 = vcmp.gt.f32.partialorder %v8502_v38, 0.0 }
 0x37e   :  { %v4169_v5 = vmul.f32 %v5762_v27, %v8388_v43  ;;  %v3909_v46 = vadd.f32 %v3908_v45, %v3907_v22  ;;  %v3891_v11 = vadd.f32 %v3890_v48, %v3889_v49  ;;  %v3301_v16 = vrot.slane %v3300_v56, 2  ;;  %v2764_v48 = vpop.permute.xlu1 %2763 }
 0x37f   :  { %v8491_v34 = vpop.eup %5763  ;;  %v3534_v43 = vmul.f32 1.442695, %v3412_v14  ;;  %v3321_v49 = vmax.f32 %v3319_v54, %v3320_v12  ;;  %v3285_v45 = vrot.slane %v3284_v40, 4  ;;  %vm4962_vm11 = vcmask 1043459  }
 0x380   :  { %v3910_v28 = vsel %vm2905_vm3, %v8491_v34, 0.0  ;;  %v4045_v36 = vmax.f32 %v3909_v46, 1e-30  ;;  %v3892_v35 = vrot.slane %v3891_v11, 2  ;;  %v3302_v22 = vmax.f32 %v3300_v56, %v3301_v16 }
 0x381   :  { %v3911_v50 = vrot.slane %v3910_v28, 4  ;;  %v8506_v32 = vmul.f32 %v8251_v1, %v4169_v5  ;;  %v3322_v51 = vrot.slane %v3321_v49, 2  ;;  %v3286_v63 = vmax.f32 %v3284_v40, %v3285_v45  ;;  %v9316_v40 = vld [vmem:[#allocation43_spill] sm:$0xff] }
 0x382   :  { %v5766_v27 = vpop.eup %5765  ;;  %5771 = vrcp.f32 %v4045_v36  ;;  %v3893_v31 = vadd.f32 %v3892_v35, %v3891_v11  ;;  %v3303_v8 = vrot.slane %v3302_v22, 1  ;;  %v8511_v56 = vsel %vm2578_vm5, %v2764_v48, -3.4028235e+38 }
 0x383   :  { %v3912_v46 = vadd.f32 %v3911_v50, %v3910_v28  ;;  %v4170_v3 = vmul.f32 %v5766_v27, %v8404_v15  ;;  %5773 = vpow2.f32 %v3534_v43  ;;  %v3323_v14 = vmax.f32 %v3321_v49, %v3322_v51 }
 0x384   :  { %v3894_v33 = vrot.slane %v3893_v31, 1  ;;  %v3304_v5 = vmax.f32 %v3302_v22, %v3303_v8  ;;  %v3305_v11 = vsel %vm2905_vm3, %v8511_v56, -inf  ;;  %v3287_v12 = vrot.slane %v3286_v63, 2 }
 0x385   :  { %v3913_v18 = vrot.slane %v3912_v46, 2  ;;  %v8513_v54 = vpop.eup %5767  ;;  %v4234_v1 = vmul.f32 %v8282_v4, %v4170_v3  ;;  %v3324_v43 = vrot.slane %v3323_v14, 1  ;;  %v3306_v8 = vrot.slane %v3305_v11, 4 }
 0x386   :  { %v3895_v15 = vadd.f32 %v3894_v33, %v3893_v31  ;;  %v3917_v16 = vsel %vm2905_vm3, %v8513_v54, 0.0  ;;  %v3410_v50 = vsub.f32 %v8460_v9, %v3304_v5  ;;  %v3288_v3 = vmax.f32 %v3286_v63, %v3287_v12 }
 0x387   :  { %v3914_v28 = vadd.f32 %v3913_v18, %v3912_v46  ;;  %v4298_v36 = vmul.f32 %v4234_v1, %v9316_v40  ;;  %v3918_v35 = vrot.slane %v3917_v16, 4  ;;  %v3325_v31 = vmax.f32 %v3323_v14, %v3324_v43  ;;  %v2760_v40 = vpop.permute.xlu0 %2759  ;;  %v2774_v14 = vpop.permute.xlu1 %2773 }
 0x388   :  { %v5770_v45 = vpop.eup %5769  ;;  %v4043_v48 = vmax.f32 %v3895_v15, 1e-30  ;;  %v3530_v22 = vmul.f32 1.442695, %v3410_v50  ;;  %v3289_v9 = vrot.slane %v3288_v3, 1  ;;  %v3307_v12 = vmax.f32 %v3305_v11, %v3306_v8 }
 0x389   :  { %v3915_v4 = vrot.slane %v3914_v28, 1  ;;  %v4650_v51 = vsel %vm2905_vm3, %v4298_v36, 0.0  ;;  %v4167_v33 = vmul.f32 %v5770_v45, %v8420_v21  ;;  %v3919_v18 = vadd.f32 %v3918_v35, %v3917_v16 }
 0x38a   :  { %v4651_v49 = vrot.slane %v4650_v51, 4  ;;  %5775 = vrcp.f32 %v4043_v48  ;;  %v3413_v63 = vsub.f32 %v8482_v55, %v3325_v31  ;;  %v9317_v21 = vrot.slane %v8457_v59, 4 }
 0x38b   :  { %v3916_v27 = vadd.f32 %v3915_v4, %v3914_v28  ;;  %v4231_v46 = vmul.f32 %v8293_v60, %v4167_v33  ;;  %v3920_v1 = vrot.slane %v3919_v18, 2  ;;  %5777 = vpow2.f32 %v3530_v22  ;;  %v8534_v60 = vld [vmem:[%s9083_s2 + $0x1b8] sm:$0xff]  ;;  %v9318_v28 = vld [vmem:[#allocation41_spill] sm:$0xff] }
 0x38c   :  { %v4652_v5 = vadd.f32 %v4651_v49, %v4650_v51  ;;  %v8529_v16 = vadd.f32 %v9317_v21, %v8457_v59  ;;  %v3290_v35 = vmax.f32 %v3288_v3, %v3289_v9  ;;  %vm2576_vm6 = vcmp.gt.f32.partialorder %v8534_v60, 0.0  ;;  %v9321_v51 = vld [vmem:[#allocation40_spill] sm:$0xff] }
 0x38d   :  { %v4046_v15 = vmax.f32 %v3916_v27, 1e-30  ;;  %v3921_v36 = vadd.f32 %v3920_v1, %v3919_v18  ;;  %v4295_v50 = vmul.f32 %v4231_v46, %v9318_v28  ;;  %v3536_v55 = vmul.f32 1.442695, %v3413_v63  ;;  %v2770_v63 = vpop.permute.xlu1 %2769 }
 0x38e   :  { %v3308_v11 = vrot.slane %v3307_v12, 2  ;;  %v9319_v59 = vrot.slane %v8478_v7, 2  ;;  %v3408_v4 = vsub.f32 %v8484_v29, %v3290_v35  ;;  %v8544_v3 = vsel %vm2576_vm6, %v2760_v40, -3.4028235e+38  ;;  %v9322_v40 = vld [vmem:[#allocation44_spill] sm:$0xff] }
 0x38f   :  { %5779 = vrcp.f32 %v4046_v15  ;;  %v5772_v43 = vpop.eup %5771  ;;  %v3922_v48 = vrot.slane %v3921_v36, 1  ;;  %v8550_v33 = vmul.f32 %v9321_v51, %v8506_v32  ;;  %v4653_v18 = vrot.slane %v4652_v5, 2 }
 0x390   :  { %v8541_v45 = vadd.f32 %v9319_v59, %v8478_v7  ;;  %v8546_v8 = vpop.eup %5773  ;;  %v4173_v22 = vmul.f32 %v5772_v43, %v8434_v41  ;;  %5781 = vpow2.f32 %v3536_v55  ;;  %v3526_v27 = vmul.f32 1.442695, %v3408_v4 }
 0x391   :  { %v3923_v49 = vadd.f32 %v3922_v48, %v3921_v36  ;;  %v3952_v7 = vsel %vm2905_vm3, %v8546_v8, 0.0  ;;  %v3309_v31 = vmax.f32 %v3307_v12, %v3308_v11  ;;  %v8556_v29 = vsel %vm2905_vm3, %v4295_v50, 0.0  ;;  %v8565_v12 = vld [vmem:[%s9083_s2 + $0x1f0] sm:$0xff] }
 0x392   :  { %9320 = vst [vmem:[#allocation32_spill] sm:$0xff] %v8541_v45  ;;  %v4237_v46 = vmul.f32 %v8299_v2, %v4173_v22  ;;  %v3953_v1 = vrot.slane %v3952_v7, 4  ;;  %v3291_v32 = vsel %vm2905_vm3, %v8544_v3, -inf  ;;  %5783 = vpow2.f32 %v3526_v27  ;;  %v8571_v2 = vld [vmem:[%s9083_s2 + $0x1e0] sm:$0xff] }
 0x393   :  { %v4047_v9 = vmax.f32 %v3923_v49, 1e-30  ;;  %v3310_v15 = vrot.slane %v3309_v31, 1  ;;  %v3292_v41 = vrot.slane %v3291_v32, 4  ;;  %vm2583_vm7 = vcmp.gt.f32.partialorder %v8565_v12, 0.0 }
 0x394   :  { %v4301_v21 = vmul.f32 %v9322_v40, %v4237_v46  ;;  %v3954_v36 = vadd.f32 %v3953_v1, %v3952_v7  ;;  %vm2581_vm8 = vcmp.gt.f32.partialorder %v8571_v2, 0.0  ;;  %v8574_v50 = vsel %vm2583_vm7, %v2774_v14, -3.4028235e+38 }
 0x395   :  { %5785 = vrcp.f32 %v4047_v9  ;;  %v3311_v35 = vmax.f32 %v3309_v31, %v3310_v15  ;;  %v3293_v28 = vmax.f32 %v3291_v32, %v3292_v41  ;;  %v3340_v43 = vsel %vm2905_vm3, %v8574_v50, -inf }
 0x396   :  { %v4671_v55 = vsel %vm2905_vm3, %v4301_v21, 0.0  ;;  %v3955_v11 = vrot.slane %v3954_v36, 2  ;;  %v8579_v59 = vsel %vm2581_vm8, %v2770_v63, -3.4028235e+38  ;;  %v8581_v4 = vadd.f32 %v4653_v18, %v4652_v5 }
 0x397   :  { %v5776_v48 = vpop.eup %5775  ;;  %v3411_v51 = vsub.f32 %v8511_v56, %v3311_v35  ;;  %v3294_v22 = vrot.slane %v3293_v28, 2  ;;  %v3341_v49 = vrot.slane %v3340_v43, 4  ;;  %v3326_v46 = vsel %vm2905_vm3, %v8579_v59, -inf }
 0x398   :  { %v8584_v7 = vpop.eup %5777  ;;  %v4171_v27 = vmul.f32 %v5776_v48, %v8476_v19  ;;  %v3956_v31 = vadd.f32 %v3955_v11, %v3954_v36  ;;  %v4672_v1 = vrot.slane %v4671_v55, 4  ;;  %v3327_v21 = vrot.slane %v3326_v46, 4  ;;  %v9323_v36 = vld [vmem:[#allocation45_spill] sm:$0xff] }
 0x399   :  { %v3938_v32 = vsel %vm2905_vm3, %v8584_v7, 0.0  ;;  %v3532_v5 = vmul.f32 1.442695, %v3411_v51  ;;  %v3295_v18 = vmax.f32 %v3293_v28, %v3294_v22  ;;  %v3342_v41 = vmax.f32 %v3340_v43, %v3341_v49 }
 0x39a   :  { %v4235_v56 = vmul.f32 %v8329_v39, %v4171_v27  ;;  %v3957_v9 = vrot.slane %v3956_v31, 1  ;;  %v3939_v15 = vrot.slane %v3938_v32, 4  ;;  %v8598_v28 = vadd.f32 %v4672_v1, %v4671_v55  ;;  %v9324_v55 = vld [vmem:[#allocation47_spill] sm:$0xff] }
 0x39b   :  { %5787 = vpow2.f32 %v3532_v5  ;;  %v3296_v19 = vrot.slane %v3295_v18, 1  ;;  %v3343_v51 = vrot.slane %v3342_v41, 2  ;;  %v3328_v22 = vmax.f32 %v3326_v46, %v3327_v21 }
 0x39c   :  { %v5780_v63 = vpop.eup %5779  ;;  %v4299_v35 = vmul.f32 %v4235_v56, %v9323_v36  ;;  %v3958_v48 = vadd.f32 %v3957_v9, %v3956_v31  ;;  %v3940_v14 = vadd.f32 %v3939_v15, %v3938_v32  ;;  %vm4964_vm12 = vcmask 1044484  }
 0x39d   :  { %v4174_v11 = vmul.f32 %v5780_v63, %v8491_v34  ;;  %v8596_v45 = vpop.eup %5781  ;;  %v3297_v39 = vmax.f32 %v3295_v18, %v3296_v19  ;;  %v3344_v31 = vmax.f32 %v3342_v41, %v3343_v51  ;;  %vm4966_vm13 = vcmask 1045509  }
 0x39e   :  { %v4657_v43 = vsel %vm2905_vm3, %v4299_v35, 0.0  ;;  %v4052_v27 = vmax.f32 %v3958_v48, 1e-30  ;;  %v3941_v5 = vrot.slane %v3940_v14, 2  ;;  %v3959_v56 = vsel %vm2905_vm3, %v8596_v45, 0.0 }
 0x39f   :  { %v4238_v49 = vmul.f32 %v8365_v57, %v4174_v11  ;;  %v4658_v40 = vrot.slane %v4657_v43, 4  ;;  %v3409_v34 = vsub.f32 %v8544_v3, %v3297_v39  ;;  %v8605_v32 = vpop.eup %5783  ;;  %v3960_v46 = vrot.slane %v3959_v56, 4 }
 0x3a0   :  { %5789 = vrcp.f32 %v4052_v27  ;;  %v3942_v18 = vadd.f32 %v3941_v5, %v3940_v14  ;;  %v3924_v57 = vsel %vm2905_vm3, %v8605_v32, 0.0  ;;  %v3345_v63 = vrot.slane %v3344_v31, 1  ;;  %v5561_v14 = vld [vmem:[%s9086_s5 + $0x8] sm:$0xff]  }
 0x3a1   :  { %v4302_v1 = vmul.f32 %v4238_v49, %v9324_v55  ;;  %v4659_v9 = vadd.f32 %v4658_v40, %v4657_v43  ;;  %v3528_v15 = vmul.f32 1.442695, %v3409_v34  ;;  %v3961_v35 = vadd.f32 %v3960_v46, %v3959_v56  ;;  %5498 = vmatprep.subr.bf16.mxu1 %v5561_v14 }
 0x3a2   :  { %v5786_v19 = vpop.eup %5785  ;;  %v3943_v36 = vrot.slane %v3942_v18, 1  ;;  %v3925_v3 = vrot.slane %v3924_v57, 4  ;;  %v3346_v43 = vmax.f32 %v3344_v31, %v3345_v63  ;;  %v3329_v5 = vrot.slane %v3328_v22, 2  ;;  %5499 = vmatpush3.bf16.msra.mxu1 %v5561_v14 }
 0x3a3   :  { %v4678_v21 = vsel %vm2905_vm3, %v4302_v1, 0.0  ;;  %v4660_v41 = vrot.slane %v4659_v9, 2  ;;  %v4175_v48 = vmul.f32 %v5786_v19, %v8513_v54  ;;  %5791 = vpow2.f32 %v3528_v15 }
 0x3a4   :  { %v4679_v11 = vrot.slane %v4678_v21, 4  ;;  %v3944_v40 = vadd.f32 %v3943_v36, %v3942_v18  ;;  %v3962_v39 = vrot.slane %v3961_v35, 2  ;;  %v3926_v51 = vadd.f32 %v3925_v3, %v3924_v57 }
 0x3a5   :  { %v8615_v49 = vadd.f32 %v4660_v41, %v4659_v9  ;;  %v4239_v27 = vmul.f32 %v8385_v37, %v4175_v48  ;;  %v9325_v56 = vrot.slane %v7502_v30, 1  ;;  %v3416_v46 = vsub.f32 %v8574_v50, %v3346_v43  ;;  %v9327_v50 = vld [vmem:[#allocation49_spill] sm:$0xff] }
 0x3a6   :  { %v4050_v54 = vmax.f32 %v3944_v40, 1e-30  ;;  %v3963_v55 = vadd.f32 %v3962_v39, %v3961_v35  ;;  %v3927_v1 = vrot.slane %v3926_v51, 2  ;;  %v4674_v18 = vrot.slane %v8598_v28, 2 }
 0x3a7   :  { %v8621_v34 = vadd.f32 %v9325_v56, %v7502_v30  ;;  %v8625_v31 = vadd.f32 %v4679_v11, %v4678_v21  ;;  %v3330_v9 = vmax.f32 %v3328_v22, %v3329_v5  ;;  %v9326_v37 = vrot.slane %v7544_v20, 1 }
 0x3a8   :  { %v8632_v15 = vpop.eup %5787  ;;  %5793 = vrcp.f32 %v4050_v54  ;;  %v3964_v30 = vrot.slane %v3963_v55, 1  ;;  %v3928_v63 = vadd.f32 %v3927_v1, %v3926_v51  ;;  %v3542_v19 = vmul.f32 1.442695, %v3416_v46 }
 0x3a9   :  { %v8630_v57 = vadd.f32 %v9326_v37, %v7544_v20  ;;  %v4303_v35 = vmul.f32 %v4239_v27, %v9327_v50  ;;  %v3945_v21 = vsel %vm2905_vm3, %v8632_v15, 0.0  ;;  %v3331_v3 = vrot.slane %v3330_v9, 1 }
 0x3aa   :  { %v3965_v22 = vadd.f32 %v3964_v30, %v3963_v55  ;;  %v3929_v41 = vrot.slane %v3928_v63, 1  ;;  %v3946_v11 = vrot.slane %v3945_v21, 4  ;;  %v4333_v20 = vrot.slane %v7518_v24, 1 }
 0x3ab   :  { %5795 = vpow2.f32 %v3542_v19  ;;  %v3332_v48 = vmax.f32 %v3330_v9, %v3331_v3  ;;  %v9328_v14 = vrot.slane %v7520_v10, 2  ;;  %v4345_v39 = vrot.slane %v7594_v44, 2 }
 0x3ac   :  { %v4053_v51 = vmax.f32 %v3965_v22, 1e-30  ;;  %v3930_v43 = vadd.f32 %v3929_v41, %v3928_v63  ;;  %v3947_v27 = vadd.f32 %v3946_v11, %v3945_v21  ;;  %v9329_v5 = vrot.slane %v7643_v0, 4  ;;  %v9330_v22 = vld [vmem:[#allocation50_spill] sm:$0xff] }
 0x3ad   :  { %v4339_v40 = vadd.f32 %v9328_v14, %v7520_v10  ;;  %v5790_v54 = vpop.eup %5789  ;;  %v8647_v55 = vsel %vm2905_vm3, %v4303_v35, 0.0  ;;  %v3414_v1 = vsub.f32 %v8579_v59, %v3332_v48  ;;  %v4346_v46 = vadd.f32 %v4345_v39, %v7594_v44 }
 0x3ae   :  { %v4351_v56 = vadd.f32 %v9329_v5, %v7643_v0  ;;  %v4356_v10 = vsel %vm2905_vm3, %v7591_v6, 0.0  ;;  %v4180_v9 = vmul.f32 %v5790_v54, %v8546_v8  ;;  %5797 = vrcp.f32 %v4053_v51 }
 0x3af   :  { %v4048_v37 = vmax.f32 %v3930_v43, 1e-30  ;;  %v3948_v30 = vrot.slane %v3947_v27, 2  ;;  %v3538_v63 = vmul.f32 1.442695, %v3414_v1  ;;  %v4340_v19 = vrot.slane %v4339_v40, 1 }
 0x3b0   :  { %v4347_v50 = vrot.slane %v4346_v46, 1  ;;  %v4352_v0 = vrot.slane %v4351_v56, 2  ;;  %v8654_v21 = vpop.eup %5791  ;;  %v4244_v35 = vmul.f32 %v8401_v13, %v4180_v9  ;;  %v4357_v3 = vrot.slane %v4356_v10, 4 }
 0x3b1   :  { %5799 = vrcp.f32 %v4048_v37  ;;  %v3949_v59 = vadd.f32 %v3948_v30, %v3947_v27  ;;  %v3931_v44 = vsel %vm2905_vm3, %v8654_v21, 0.0  ;;  %v8660_v6 = vadd.f32 %v4333_v20, %v7518_v24 }
 0x3b2   :  { %5801 = vpow2.f32 %v3538_v63  ;;  %v4353_v8 = vadd.f32 %v4352_v0, %v4351_v56  ;;  %v4308_v41 = vmul.f32 %v9330_v22, %v4244_v35  ;;  %v3932_v48 = vrot.slane %v3931_v44, 4 }
 0x3b3   :  { %v3950_v11 = vrot.slane %v3949_v59, 1  ;;  %v4358_v14 = vadd.f32 %v4357_v3, %v4356_v10  ;;  %v4686_v39 = vrot.slane %v8647_v55, 4  ;;  %v8664_v51 = vadd.f32 %v4340_v19, %v4339_v40 }
 0x3b4   :  { %v8666_v13 = vadd.f32 %v4347_v50, %v4346_v46  ;;  %v4363_v43 = vsel %vm2905_vm3, %v7597_v26, 0.0  ;;  %v4720_v27 = vsel %vm2905_vm3, %v4308_v41, 0.0  ;;  %v3933_v24 = vadd.f32 %v3932_v48, %v3931_v44  ;;  %v9333_v44 = vld [vmem:[#allocation5_spill] sm:$0xff] }
 0x3b5   :  { %v3951_v5 = vadd.f32 %v3950_v11, %v3949_v59  ;;  %v4359_v20 = vrot.slane %v4358_v14, 2  ;;  %v5794_v56 = vpop.eup %5793  ;;  %v4721_v54 = vrot.slane %v4720_v27, 4  ;;  %v4354_v1 = vrot.slane %v4353_v8, 1 }
 0x3b6   :  { %v4364_v9 = vrot.slane %v4363_v43, 4  ;;  %v4389_v10 = vrot.slane %v7605_v61, 1  ;;  %v4178_v37 = vmul.f32 %v5794_v56, %v8584_v7  ;;  %v3934_v30 = vrot.slane %v3933_v24, 2 }
 0x3b7   :  { %v4051_v40 = vmax.f32 %v3951_v5, 1e-30  ;;  %v4360_v46 = vadd.f32 %v4359_v20, %v4358_v14  ;;  %v4722_v63 = vadd.f32 %v4721_v54, %v4720_v27  ;;  %v9331_v26 = vrot.slane %v7702_v23, 1 }
 0x3b8   :  { %v4365_v19 = vadd.f32 %v4364_v9, %v4363_v43  ;;  %v9332_v0 = vrot.slane %v7640_v25, 2  ;;  %v8681_v59 = vpop.eup %5795  ;;  %v4242_v3 = vmul.f32 %v8453_v62, %v4178_v37  ;;  %v3935_v7 = vadd.f32 %v3934_v30, %v3933_v24  ;;  %v9335_v43 = vld [vmem:[#allocation51_spill] sm:$0xff]  ;;  %v9336_v9 = vld [vmem:[#allocation6_spill] sm:$0xff] }
 0x3b9   :  { %v8676_v50 = vadd.f32 %v9331_v26, %v7702_v23  ;;  %5803 = vrcp.f32 %v4051_v40  ;;  %v9334_v22 = vrot.slane %v9333_v44, 1  ;;  %v3980_v11 = vsel %vm2905_vm3, %v8681_v59, 0.0 }
 0x3ba   :  { %v4395_v35 = vadd.f32 %v9332_v0, %v7640_v25  ;;  %v8691_v23 = vadd.f32 %v4354_v1, %v4353_v8  ;;  %v4361_v48 = vrot.slane %v4360_v46, 1  ;;  %v4366_v14 = vrot.slane %v4365_v19, 2 }
 0x3bb   :  { %v8687_v41 = vadd.f32 %v9334_v22, %v9333_v44  ;;  %v4306_v25 = vmul.f32 %v4242_v3, %v9335_v43  ;;  %v3936_v27 = vrot.slane %v3935_v7, 1  ;;  %v3981_v5 = vrot.slane %v3980_v11, 4  ;;  %v5798_v24 = vpop.eup %5797 }
 0x3bc   :  { %v8695_v62 = vadd.f32 %v4389_v10, %v7605_v61  ;;  %v4723_v20 = vrot.slane %v4722_v63, 2  ;;  %v4367_v56 = vadd.f32 %v4366_v14, %v4365_v19  ;;  %v4396_v54 = vrot.slane %v4395_v35, 1  ;;  %v9337_v61 = vld [vmem:[#allocation12_spill] sm:$0xff] }
 0x3bd   :  { %v4401_v37 = vrot.slane %v9336_v9, 2  ;;  %v4706_v40 = vsel %vm2905_vm3, %v4306_v25, 0.0  ;;  %v4181_v8 = vmul.f32 %v5798_v24, %v8596_v45  ;;  %v3937_v1 = vadd.f32 %v3936_v27, %v3935_v7  ;;  %v9339_v27 = vld [vmem:[#allocation52_spill] sm:$0xff] }
 0x3be   :  { %v3982_v30 = vadd.f32 %v3981_v5, %v3980_v11  ;;  %v5800_v26 = vpop.eup %5799  ;;  %v4707_v0 = vrot.slane %v4706_v40, 4  ;;  %v8700_v3 = vadd.f32 %v4361_v48, %v4360_v46  ;;  %v9338_v10 = vrot.slane %v9337_v61, 4 }
 0x3bf   :  { %v4402_v44 = vadd.f32 %v4401_v37, %v9336_v9  ;;  %v8706_v19 = vpop.eup %5801  ;;  %v4245_v14 = vmul.f32 %v8467_v53, %v4181_v8  ;;  %v4176_v43 = vmul.f32 %v5800_v26, %v8605_v32  ;;  %v4049_v25 = vmax.f32 %v3937_v1, 1e-30 }
 0x3c0   :  { %v4407_v22 = vadd.f32 %v9338_v10, %v9337_v61  ;;  %v3983_v45 = vrot.slane %v3982_v30, 2  ;;  %v8710_v7 = vadd.f32 %v4723_v20, %v4722_v63  ;;  %v4708_v11 = vadd.f32 %v4707_v0, %v4706_v40  ;;  %v9340_v40 = vld [vmem:[#allocation7_spill] sm:$0xff] }
 0x3c1   :  { %v3966_v46 = vsel %vm2905_vm3, %v8706_v19, 0.0  ;;  %v8714_v48 = vadd.f32 %v4396_v54, %v4395_v35  ;;  %v4309_v5 = vmul.f32 %v9339_v27, %v4245_v14  ;;  %5805 = vrcp.f32 %v4049_v25  ;;  %v9341_v25 = vld [vmem:[#allocation8_spill] sm:$0xff] }
 0x3c2   :  { %v3984_v24 = vadd.f32 %v3983_v45, %v3982_v30  ;;  %v4368_v9 = vrot.slane %v4367_v56, 1  ;;  %v4709_v37 = vrot.slane %v4708_v11, 2  ;;  %v3967_v61 = vrot.slane %v3966_v46, 4 }
 0x3c3   :  { %v4403_v53 = vrot.slane %v4402_v44, 1  ;;  %v4408_v8 = vrot.slane %v4407_v22, 2  ;;  %v4727_v32 = vsel %vm2905_vm3, %v4309_v5, 0.0  ;;  %v4240_v63 = vmul.f32 %v8473_v17, %v4176_v43 }
 0x3c4   :  { %v3985_v20 = vrot.slane %v3984_v24, 1  ;;  %v4412_v1 = vsel %vm2905_vm3, %v9340_v40, 0.0  ;;  %v8721_v26 = vadd.f32 %v4709_v37, %v4708_v11  ;;  %v4728_v35 = vrot.slane %v4727_v32, 4 }
 0x3c5   :  { %v3968_v54 = vadd.f32 %v3967_v61, %v3966_v46  ;;  %v4409_v0 = vadd.f32 %v4408_v8, %v4407_v22  ;;  %v8723_v30 = vadd.f32 %v4368_v9, %v4367_v56  ;;  %v4413_v14 = vrot.slane %v4412_v1, 4  ;;  %v9342_v56 = vld [vmem:[#allocation46_spill] sm:$0xff] }
 0x3c6   :  { %v3986_v10 = vadd.f32 %v3985_v20, %v3984_v24  ;;  %v4419_v45 = vsel %vm2905_vm3, %v9341_v25, 0.0  ;;  %v5804_v27 = vpop.eup %5803  ;;  %v8727_v5 = vadd.f32 %v4728_v35, %v4727_v32  ;;  %v8729_v43 = vadd.f32 %v4403_v53, %v4402_v44  ;;  %v9343_v35 = vld [vmem:[#allocation53_spill] sm:$0xff] }
 0x3c7   :  { %v3969_v17 = vrot.slane %v3968_v54, 2  ;;  %v4410_v36 = vrot.slane %v4409_v0, 1  ;;  %v4179_v11 = vmul.f32 %v5804_v27, %v8632_v15  ;;  %v4414_v40 = vadd.f32 %v4413_v14, %v4412_v1 }
 0x3c8   :  { %v4056_v37 = vmax.f32 %v3986_v10, 1e-30  ;;  %v4420_v46 = vrot.slane %v4419_v45, 4  ;;  %v4711_v22 = vrot.slane %v8721_v26, 1  ;;  %v8734_v24 = vmul.f32 %v9342_v56, %v4240_v63 }
 0x3c9   :  { %v3970_v9 = vadd.f32 %v3969_v17, %v3968_v54  ;;  %v4762_v61 = vpack.c.bf16 %v8621_v34, %v8621_v34  ;;  %v4243_v8 = vmul.f32 %v8502_v38, %v4179_v11  ;;  %v4415_v44 = vrot.slane %v4414_v40, 2 }
 0x3ca   :  { %5807 = vrcp.f32 %v4056_v37  ;;  %v4421_v53 = vadd.f32 %v4420_v46, %v4419_v45  ;;  %v4411_v20 = vadd.f32 %v4410_v36, %v4409_v0  ;;  %v4763_v1 = vpack.c.bf16 %v8630_v57, %v8630_v57 }
 0x3cb   :  { %v3971_v15 = vrot.slane %v3970_v9, 1  ;;  %v4307_v10 = vmul.f32 %v4243_v8, %v9343_v35  ;;  %v4416_v63 = vadd.f32 %v4415_v44, %v4414_v40  ;;  %v4764_v54 = vpack.c.bf16 %v8660_v6, %v8660_v6 }
 0x3cc   :  { %v4422_v14 = vrot.slane %v4421_v53, 2  ;;  %v4765_v38 = vpack.c.bf16 %v8664_v51, %v8664_v51  ;;  %v4766_v25 = vpack.c.bf16 %v8666_v13, %v8666_v13  ;;  %v4767_v36 = vpack.c.bf16 %v8691_v23, %v8691_v23 }
 0x3cd   :  { %v3972_v34 = vadd.f32 %v3971_v15, %v3970_v9  ;;  %v4713_v0 = vsel %vm2905_vm3, %v4307_v10, 0.0  ;;  %v4417_v57 = vrot.slane %v4416_v63, 1  ;;  %v4768_v27 = vpack.c.bf16 %v8700_v3, %v8700_v3 }
 0x3ce   :  { %v4423_v45 = vadd.f32 %v4422_v14, %v4421_v53  ;;  %v5806_v17 = vpop.eup %5805  ;;  %v4714_v11 = vrot.slane %v4713_v0, 4  ;;  %v4769_v37 = vpack.c.bf16 %v8723_v30, %v8723_v30  ;;  %v4770_v51 = vpack.c.bf16 %v8676_v50, %v8676_v50 }
 0x3cf   :  { %v4054_v6 = vmax.f32 %v3972_v34, 1e-30  ;;  %v4177_v13 = vmul.f32 %v5806_v17, %v8654_v21  ;;  %v4418_v40 = vadd.f32 %v4417_v57, %v4416_v63  ;;  %v4771_v46 = vpack.c.bf16 %v8687_v41, %v8687_v41  ;;  %v9344_v41 = vld [vmem:[#allocation48_spill] sm:$0xff]  ;;  %v2772_v34 = vpop.permute.xlu1 %2771 }
 0x3d0   :  { %v4424_v23 = vrot.slane %v4423_v45, 1  ;;  %v4715_v56 = vadd.f32 %v4714_v11, %v4713_v0  ;;  %v4772_v3 = vpack.c.bf16 %v8695_v62, %v8695_v62  ;;  %v4773_v9 = vpack.c.bf16 %v8714_v48, %v8714_v48 }
 0x3d1   :  { %5809 = vrcp.f32 %v4054_v6  ;;  %v4241_v30 = vmul.f32 %v8534_v60, %v4177_v13  ;;  %v4774_v50 = vpack.c.bf16 %v8729_v43, %v8729_v43  ;;  %v4775_v21 = vpack.c.bf16 %v4411_v20, %v4411_v20 }
 0x3d2   :  { %v4425_v8 = vadd.f32 %v4424_v23, %v4423_v45  ;;  %v4716_v44 = vrot.slane %v4715_v56, 2  ;;  %v4776_v53 = vpack.c.bf16 %v4418_v40, %v4418_v40  ;;  %v4894_v15 = vunpack.c.l.b16 %v4762_v61  ;;  %v5562_v61 = vld [vmem:[%s9086_s5] sm:$0xff]  }
 0x3d3   :  { %v4895_v35 = vunpack.c.l.b16 %v4763_v1  ;;  %v8769_v10 = vmul.f32 %v9344_v41, %v4241_v30  ;;  %v4896_v63 = vunpack.c.l.b16 %v4764_v54  ;;  %v4897_v14 = vunpack.c.l.b16 %v4765_v38  ;;  %5500 = vmatprep.subr.bf16.mxu1 %v5562_v61  ;;  %v2776_v40 = vpop.permute.xlu1 %2775 }
 0x3d4   :  { %v4898_v62 = vunpack.c.l.b16 %v4766_v25  ;;  %v8771_v0 = vadd.f32 %v4716_v44, %v4715_v56  ;;  %v4777_v48 = vpack.c.bf16 %v4425_v8, %v4425_v8  ;;  %v4899_v60 = vunpack.c.l.b16 %v4767_v36  ;;  %5501 = vmatpush3.bf16.msra.mxu1 %v5562_v61  ;;  %v8787_v56 = vld [vmem:[%s9083_s2 + $0x1e8] sm:$0xff] }
 0x3d5   :  { %v4900_v57 = vunpack.c.l.b16 %v4768_v27  ;;  %v4901_v45 = vunpack.c.l.b16 %v4769_v37  ;;  %v4902_v17 = vunpack.c.l.b16 %v4770_v51  ;;  %v4903_v43 = vunpack.c.l.b16 %v4771_v46 }
 0x3d6   :  { %v4904_v20 = vunpack.c.l.b16 %v4772_v3  ;;  %v4905_v11 = vunpack.c.l.b16 %v4773_v9  ;;  %v4906_v6 = vunpack.c.l.b16 %v4774_v50  ;;  %v4907_v54 = vunpack.c.l.b16 %v4775_v21 }
 0x3d7   :  { %v5808_v1 = vpop.eup %5807  ;;  %v4959_v25 = vsel %vm4958_vm9, %v4895_v35, %v4894_v15  ;;  %v4908_v36 = vunpack.c.l.b16 %v4776_v53  ;;  %vm4968_vm14 = vcmask 1046534   ;;  %v4972_v13 = vsel %vm4958_vm9, %v4903_v43, %v4902_v17 }
 0x3d8   :  { %v4961_v27 = vsel %vm4960_vm10, %v4896_v63, %v4959_v25  ;;  %v4184_v37 = vmul.f32 %v5808_v1, %v8681_v59  ;;  %v4973_v46 = vsel %vm4960_vm10, %v4904_v20, %v4972_v13  ;;  %vm2582_vm15 = vcmp.gt.f32.partialorder %v8787_v56, 0.0  ;;  %v8793_v59 = vld [vmem:[%s9083_s2 + $0x1f8] sm:$0xff]  ;;  %s5908_s2 = smov 96  }
 0x3d9   :  { %v4963_v51 = vsel %vm4962_vm11, %v4897_v14, %v4961_v27  ;;  %vm2584_vm1 = vcmp.gt.f32.partialorder %v8793_v59, 0.0  ;;  %vm4970_vm2 = vcmask 1047559   ;;  %v4974_v9 = vsel %vm4962_vm11, %v4905_v11, %v4973_v46 }
 0x3da   :  { %v4965_v23 = vsel %vm4964_vm12, %v4898_v62, %v4963_v51  ;;  %v8798_v30 = vsel %vm2582_vm15, %v2772_v34, -3.4028235e+38  ;;  %v4975_v50 = vsel %vm4964_vm12, %v4906_v6, %v4974_v9  ;;  %v8804_v44 = vsel %vm2584_vm1, %v2776_v40, -3.4028235e+38  ;;  %v9347_v6 = vld [vmem:[#allocation11_spill] sm:$0xff]  ;;  %v9351_v51 = vld [vmem:[#allocation21_spill] sm:$0xff] }
 0x3db   :  { %v4967_v3 = vsel %vm4966_vm13, %v4899_v60, %v4965_v23  ;;  %v3333_v21 = vsel %vm2905_vm3, %v8798_v30, -inf  ;;  %v4909_v15 = vunpack.c.l.b16 %v4777_v48  ;;  %v4976_v35 = vsel %vm4966_vm13, %v4907_v54, %v4975_v50  ;;  %v9345_v48 = vld [vmem:[#allocation13_spill] sm:$0xff]  ;;  %v9353_v23 = vld [vmem:[#allocation55_spill] sm:$0xff]  ;;  %v9354_v9 = vld [vmem:[#allocation10_spill] sm:$0xff] }
 0x3dc   :  { %v4969_v8 = vsel %vm4968_vm14, %v4900_v57, %v4967_v3  ;;  %v3334_v41 = vrot.slane %v3333_v21, 4  ;;  %v3347_v63 = vsel %vm2905_vm3, %v8804_v44, -inf  ;;  %v8810_v14 = vmul.f32 %v8565_v12, %v4184_v37 }
 0x3dd   :  { %v4977_v34 = vsel %vm4968_vm14, %v4908_v36, %v4976_v35  ;;  %v3348_v60 = vrot.slane %v3347_v63, 4  ;;  %v4971_v57 = vsel %vm4970_vm2, %v4901_v45, %v4969_v8  ;;  %v9346_v20 = vrot.slane %v9345_v48, 1  ;;  %v9349_v36 = vld [vmem:[#allocation9_spill] sm:$0xff]  ;;  %v9350_v45 = vld [vmem:[#allocation15_spill] sm:$0xff] }
 0x3de   :  { %v5810_v53 = vpop.eup %5809  ;;  %v4978_v17 = vsel %vm4970_vm2, %v4909_v15, %v4977_v34  ;;  %v3335_v43 = vmax.f32 %v3333_v21, %v3334_v41  ;;  %v4445_v27 = vrot.slane %v9349_v36, 1  ;;  %v4457_v37 = vrot.slane %v9350_v45, 2 }
 0x3df   :  { %v4182_v62 = vmul.f32 %v5810_v53, %v8706_v19  ;;  %v8819_v61 = vadd.f32 %v9346_v20, %v9345_v48  ;;  %v5021_v11 = vpack.c.b16 %v4978_v17, %v4971_v57  ;;  %v3349_v12 = vmax.f32 %v3347_v63, %v3348_v60  ;;  %v9355_v63 = vld [vmem:[#allocation14_spill] sm:$0xff]  ;;  %v9357_v60 = vld [vmem:[#allocation16_spill] sm:$0xff] }
 0x3e0   :  { %v9348_v19 = vrot.slane %v9347_v6, 2  ;;  %v3336_v25 = vrot.slane %v3335_v43, 2  ;;  %v9352_v13 = vrot.slane %v9351_v51, 4  ;;  %v4468_v8 = vsel %vm2905_vm3, %v9354_v9, 0.0  ;;  %v9362_v9 = vld [vmem:[#allocation18_spill] sm:$0xff] }
 0x3e1   :  { %v4246_v1 = vmul.f32 %v8571_v2, %v4182_v62  ;;  %5025 = vrot.lane.b32.xlu0 %v5021_v11, %s5908_s2  ;;  %v3350_v2 = vrot.slane %v3349_v12, 2  ;;  %v4458_v21 = vadd.f32 %v4457_v37, %v9350_v45  ;;  %v4469_v15 = vrot.slane %v4468_v8, 4  ;;  %v9358_v37 = vld [vmem:[#allocation20_spill] sm:$0xff] }
 0x3e2   :  { %v4451_v54 = vadd.f32 %v9348_v19, %v9347_v6  ;;  %v4463_v40 = vadd.f32 %v9352_v13, %v9351_v51  ;;  %v3337_v50 = vmax.f32 %v3335_v43, %v3336_v25  ;;  %v9356_v62 = vrot.slane %v9355_v63, 1 }
 0x3e3   :  { %v4310_v46 = vmul.f32 %v4246_v1, %v9353_v23  ;;  %v3351_v41 = vmax.f32 %v3349_v12, %v3350_v2  ;;  %v4475_v57 = vsel %vm2905_vm3, %v9357_v60, 0.0  ;;  %v8846_v48 = vadd.f32 %v4445_v27, %v9349_v36  ;;  %v9360_v2 = vld [vmem:[#allocation19_spill] sm:$0xff] }
 0x3e4   :  { %v4452_v3 = vrot.slane %v4451_v54, 1  ;;  %v4464_v53 = vrot.slane %v4463_v40, 2  ;;  %v8841_v34 = vadd.f32 %v9356_v62, %v9355_v63  ;;  %v3338_v17 = vrot.slane %v3337_v50, 1 }
 0x3e5   :  { %v8836_v35 = vsel %vm2905_vm3, %v4310_v46, 0.0  ;;  %v4459_v43 = vrot.slane %v4458_v21, 1  ;;  %v3352_v1 = vrot.slane %v3351_v41, 1  ;;  %v4470_v6 = vadd.f32 %v4469_v15, %v4468_v8 }
 0x3e6   :  { %v4465_v20 = vadd.f32 %v4464_v53, %v4463_v40  ;;  %v8848_v11 = vadd.f32 %v4452_v3, %v4451_v54  ;;  %v4476_v19 = vrot.slane %v4475_v57, 4  ;;  %v4735_v12 = vrot.slane %v8836_v35, 4  ;;  %v9363_v53 = vld [vmem:[#allocation17_spill] sm:$0xff] }
 0x3e7   :  { %v3339_v25 = vmax.f32 %v3337_v50, %v3338_v17  ;;  %v9359_v51 = vrot.slane %v9358_v37, 1  ;;  %v3353_v23 = vmax.f32 %v3351_v41, %v3352_v1  ;;  %v4460_v46 = vadd.f32 %v4459_v43, %v4458_v21  ;;  %v9365_v41 = vld [vmem:[#allocation22_spill] sm:$0xff] }
 0x3e8   :  { %v4466_v45 = vrot.slane %v4465_v20, 1  ;;  %v4471_v36 = vrot.slane %v4470_v6, 2  ;;  %v4477_v27 = vadd.f32 %v4476_v19, %v4475_v57  ;;  %v9361_v54 = vrot.slane %v9360_v2, 1 }
 0x3e9   :  { %v8854_v13 = vadd.f32 %v9359_v51, %v9358_v37  ;;  %v3415_v40 = vsub.f32 %v8798_v30, %v3339_v25  ;;  %v4501_v8 = vrot.slane %v9362_v9, 1  ;;  %v9364_v50 = vrot.slane %v9363_v53, 2  ;;  %v9366_v30 = vld [vmem:[#allocation27_spill] sm:$0xff] }
 0x3ea   :  { %v4495_v3 = vadd.f32 %v9361_v54, %v9360_v2  ;;  %v3417_v63 = vsub.f32 %v8804_v44, %v3353_v23  ;;  %v4472_v62 = vadd.f32 %v4471_v36, %v4470_v6  ;;  %v4478_v60 = vrot.slane %v4477_v27, 2  ;;  %v9368_v6 = vld [vmem:[#allocation23_spill] sm:$0xff] }
 0x3eb   :  { %v4507_v15 = vadd.f32 %v9364_v50, %v9363_v53  ;;  %v4513_v21 = vrot.slane %v9365_v41, 2  ;;  %v3540_v17 = vmul.f32 1.442695, %v3415_v40  ;;  %v4467_v57 = vadd.f32 %v4466_v45, %v4465_v20 }
 0x3ec   :  { %v9367_v1 = vrot.slane %v9366_v30, 4  ;;  %v3544_v25 = vmul.f32 1.442695, %v3417_v63  ;;  %v4473_v37 = vrot.slane %v4472_v62, 1  ;;  %v4479_v51 = vadd.f32 %v4478_v60, %v4477_v27 }
 0x3ed   :  { %v4508_v43 = vrot.slane %v4507_v15, 1  ;;  %v4514_v2 = vadd.f32 %v4513_v21, %v9365_v41  ;;  %5811 = vpow2.f32 %v3540_v17  ;;  %v4502_v54 = vadd.f32 %v4501_v8, %v9362_v9 }
 0x3ee   :  { %v4519_v19 = vadd.f32 %v9367_v1, %v9366_v30  ;;  %v4524_v23 = vsel %vm2905_vm3, %v9368_v6, 0.0  ;;  %5813 = vpow2.f32 %v3544_v25  ;;  %v4480_v36 = vrot.slane %v4479_v51, 1  ;;  %v9369_v30 = vld [vmem:[#allocation26_spill] sm:$0xff] }
 0x3ef   :  { %v4509_v20 = vadd.f32 %v4508_v43, %v4507_v15  ;;  %v4515_v45 = vrot.slane %v4514_v2, 1  ;;  %v4474_v40 = vadd.f32 %v4473_v37, %v4472_v62  ;;  %v4525_v50 = vrot.slane %v4524_v23, 4 }
 0x3f0   :  { %v4520_v44 = vrot.slane %v4519_v19, 2  ;;  %v4531_v63 = vsel %vm2905_vm3, %v9369_v30, 0.0  ;;  %v4481_v27 = vadd.f32 %v4480_v36, %v4479_v51  ;;  %v4778_v9 = vpack.c.bf16 %v8819_v61, %v8819_v61 }
 0x3f1   :  { %v4516_v60 = vadd.f32 %v4515_v45, %v4514_v2  ;;  %v4532_v41 = vrot.slane %v4531_v63, 4  ;;  %v4526_v21 = vadd.f32 %v4525_v50, %v4524_v23  ;;  %v4779_v17 = vpack.c.bf16 %v8841_v34, %v8841_v34 }
 0x3f2   :  { %v4521_v53 = vadd.f32 %v4520_v44, %v4519_v19  ;;  %v4780_v15 = vpack.c.bf16 %v8846_v48, %v8846_v48  ;;  %v4781_v43 = vpack.c.bf16 %v8848_v11, %v8848_v11  ;;  %v4782_v1 = vpack.c.bf16 %v4460_v46, %v4460_v46 }
 0x3f3   :  { %v4533_v62 = vadd.f32 %v4532_v41, %v4531_v63  ;;  %v4783_v19 = vpack.c.bf16 %v4467_v57, %v4467_v57  ;;  %v4527_v37 = vrot.slane %v4526_v21, 2  ;;  %v4784_v51 = vpack.c.bf16 %v4474_v40, %v4474_v40 }
 0x3f4   :  { %v4522_v8 = vrot.slane %v4521_v53, 1  ;;  %v4785_v2 = vpack.c.bf16 %v4481_v27, %v4481_v27  ;;  %v4786_v61 = vpack.c.bf16 %v8854_v13, %v8854_v13  ;;  %v4787_v6 = vpack.c.bf16 %v4495_v3, %v4495_v3 }
 0x3f5   :  { %v4534_v44 = vrot.slane %v4533_v62, 2  ;;  %v4788_v23 = vpack.c.bf16 %v4502_v54, %v4502_v54  ;;  %v4528_v34 = vadd.f32 %v4527_v37, %v4526_v21  ;;  %v4789_v36 = vpack.c.bf16 %v4509_v20, %v4509_v20 }
 0x3f6   :  { %v4523_v25 = vadd.f32 %v4522_v8, %v4521_v53  ;;  %v4790_v45 = vpack.c.bf16 %v4516_v60, %v4516_v60  ;;  %v4910_v30 = vunpack.c.l.b16 %v4778_v9  ;;  %v4911_v63 = vunpack.c.l.b16 %v4779_v17 }
 0x3f7   :  { %v4535_v50 = vadd.f32 %v4534_v44, %v4533_v62  ;;  %v4912_v11 = vunpack.c.l.b16 %v4780_v15  ;;  %v4529_v46 = vrot.slane %v4528_v34, 1  ;;  %v4913_v57 = vunpack.c.l.b16 %v4781_v43 }
 0x3f8   :  { %v4791_v48 = vpack.c.bf16 %v4523_v25, %v4523_v25  ;;  %v4914_v53 = vunpack.c.l.b16 %v4782_v1  ;;  %v4915_v41 = vunpack.c.l.b16 %v4783_v19  ;;  %v4916_v27 = vunpack.c.l.b16 %v4784_v51 }
 0x3f9   :  { %v4536_v40 = vrot.slane %v4535_v50, 1  ;;  %v4918_v8 = vunpack.c.l.b16 %v4786_v61  ;;  %v4919_v38 = vunpack.c.l.b16 %v4787_v6  ;;  %v4530_v32 = vadd.f32 %v4529_v46, %v4528_v34 }
 0x3fa   :  { %v4920_v13 = vunpack.c.l.b16 %v4788_v23  ;;  %v4921_v3 = vunpack.c.l.b16 %v4789_v36  ;;  %v4922_v54 = vunpack.c.l.b16 %v4790_v45  ;;  %v8885_v21 = vpop.eup %5811  ;;  %v4923_v60 = vunpack.c.l.b16 %v4791_v48 }
 0x3fb   :  { %v4537_v20 = vadd.f32 %v4536_v40, %v4535_v50  ;;  %v4979_v9 = vsel %vm4958_vm9, %v4911_v63, %v4910_v30  ;;  %v4986_v17 = vsel %vm4958_vm9, %v4919_v38, %v4918_v8  ;;  %v8889_v15 = vpop.eup %5813  ;;  %v3973_v62 = vsel %vm2905_vm3, %v8885_v21, 0.0  ;;  %v9371_v8 = vld [vmem:[#allocation24_spill] sm:$0xff] }
 0x3fc   :  { %v4792_v43 = vpack.c.bf16 %v4530_v32, %v4530_v32  ;;  %v4980_v1 = vsel %vm4960_vm10, %v4912_v11, %v4979_v9  ;;  %v4987_v19 = vsel %vm4960_vm10, %v4920_v13, %v4986_v17  ;;  %v3974_v25 = vrot.slane %v3973_v62, 4  ;;  %v9370_v11 = vld [vmem:[#allocation54_spill] sm:$0xff] }
 0x3fd   :  { %v3987_v37 = vsel %vm2905_vm3, %v8889_v15, 0.0  ;;  %v4793_v51 = vpack.c.bf16 %v4537_v20, %v4537_v20  ;;  %v4981_v44 = vsel %vm4962_vm11, %v4913_v57, %v4980_v1  ;;  %v4917_v6 = vunpack.c.l.b16 %v4785_v2 }
 0x3fe   :  { %v3988_v61 = vrot.slane %v3987_v37, 4  ;;  %v4982_v38 = vsel %vm4964_vm12, %v4914_v53, %v4981_v44  ;;  %v4988_v23 = vsel %vm4962_vm11, %v4921_v3, %v4987_v19  ;;  %v3975_v34 = vadd.f32 %v3974_v25, %v3973_v62  ;;  %v9372_v3 = vld [vmem:[#allocation28_spill] sm:$0xff]  ;;  %v9376_v25 = vld [vmem:[#allocation31_spill] sm:$0xff] }
 0x3ff   :  { %v4924_v36 = vunpack.c.l.b16 %v4792_v43  ;;  %v4983_v32 = vsel %vm4966_vm13, %v4915_v41, %v4982_v38  ;;  %v4989_v45 = vsel %vm4964_vm12, %v4922_v54, %v4988_v23  ;;  %v4925_v50 = vunpack.c.l.b16 %v4793_v51  ;;  %v9377_v23 = vld [vmem:[#allocation25_spill] sm:$0xff] }
 0x400   :  { %v3989_v48 = vadd.f32 %v3988_v61, %v3987_v37  ;;  %v4984_v30 = vsel %vm4968_vm14, %v4916_v27, %v4983_v32  ;;  %v4990_v63 = vsel %vm4966_vm13, %v4923_v60, %v4989_v45  ;;  %v8906_v46 = vmul.f32 %v9370_v11, %v8810_v14  ;;  %v9374_v14 = vld [vmem:[#allocation36_spill] sm:$0xff]  ;;  %v9381_v45 = vld [vmem:[#allocation30_spill] sm:$0xff] }
 0x401   :  { %v3976_v2 = vrot.slane %v3975_v34, 2  ;;  %v4985_v57 = vsel %vm4970_vm2, %v4917_v6, %v4984_v30  ;;  %v4991_v53 = vsel %vm4968_vm14, %v4924_v36, %v4990_v63  ;;  %v4557_v13 = vrot.slane %v9371_v8, 1 }
 0x402   :  { %v3990_v40 = vrot.slane %v3989_v48, 2  ;;  %v4992_v41 = vsel %vm4970_vm2, %v4925_v50, %v4991_v53  ;;  %v9373_v54 = vrot.slane %v9372_v3, 2  ;;  %v4569_v9 = vrot.slane %v8319_v47, 2 }
 0x403   :  { %v3977_v20 = vadd.f32 %v3976_v2, %v3975_v34  ;;  %v5022_v60 = vpack.c.b16 %v4992_v41, %v4985_v57  ;;  %v9375_v17 = vrot.slane %v9374_v14, 4  ;;  %v8922_v43 = vadd.f32 %v4735_v12, %v8836_v35  ;;  %v9379_v35 = vld [vmem:[#allocation29_spill] sm:$0xff] }
 0x404   :  { %v4563_v27 = vadd.f32 %v9373_v54, %v9372_v3  ;;  %v3991_v1 = vadd.f32 %v3990_v40, %v3989_v48  ;;  %v4580_v37 = vsel %vm2905_vm3, %v9376_v25, 0.0  ;;  %v4570_v44 = vadd.f32 %v4569_v9, %v8319_v47  ;;  %v9384_v9 = vld [vmem:[#allocation34_spill] sm:$0xff] }
 0x405   :  { %v4575_v62 = vadd.f32 %v9375_v17, %v9374_v14  ;;  %v3978_v51 = vrot.slane %v3977_v20, 1  ;;  %5027 = vrot.lane.b32.xlu1 %v5022_v60, %s5908_s2  ;;  %v4581_v6 = vrot.slane %v4580_v37, 4  ;;  %v9378_v34 = vrot.slane %v9377_v23, 1 }
 0x406   :  { %v4564_v19 = vrot.slane %v4563_v27, 1  ;;  %v3992_v38 = vrot.slane %v3991_v1, 1  ;;  %v9380_v12 = vrot.slane %v9379_v35, 1  ;;  %v4587_v48 = vsel %vm2905_vm3, %v9381_v45, 0.0 }
 0x407   :  { %v4576_v61 = vrot.slane %v4575_v62, 2  ;;  %v8931_v36 = vadd.f32 %v9378_v34, %v9377_v23  ;;  %v3979_v50 = vadd.f32 %v3978_v51, %v3977_v20  ;;  %v8941_v30 = vadd.f32 %v4557_v13, %v9371_v8 }
 0x408   :  { %v8936_v32 = vadd.f32 %v9380_v12, %v9379_v35  ;;  %v4582_v63 = vadd.f32 %v4581_v6, %v4580_v37  ;;  %v3993_v11 = vadd.f32 %v3992_v38, %v3991_v1  ;;  %v8943_v2 = vadd.f32 %v4564_v19, %v4563_v27  ;;  %v9387_v6 = vld [vmem:[#allocation33_spill] sm:$0xff] }
 0x409   :  { %v4577_v47 = vadd.f32 %v4576_v61, %v4575_v62  ;;  %v4588_v57 = vrot.slane %v4587_v48, 4  ;;  %v9382_v53 = vrot.slane %v8447_v58, 1  ;;  %v4055_v41 = vmax.f32 %v3979_v50, 1e-30 }
 0x40a   :  { %v4571_v3 = vrot.slane %v4570_v44, 1  ;;  %v4583_v54 = vrot.slane %v4582_v63, 2  ;;  %v9383_v20 = vrot.slane %v8422_v42, 1  ;;  %v4057_v8 = vmax.f32 %v3993_v11, 1e-30 }
 0x40b   :  { %v8948_v40 = vadd.f32 %v9382_v53, %v8447_v58  ;;  %v4589_v13 = vadd.f32 %v4588_v57, %v4587_v48  ;;  %v4613_v14 = vrot.slane %v9384_v9, 1  ;;  %v9385_v27 = vrot.slane %v8415_v52, 2 }
 0x40c   :  { %v8953_v60 = vadd.f32 %v9383_v20, %v8422_v42  ;;  %5815 = vrcp.f32 %v4055_v41  ;;  %v4578_v62 = vrot.slane %v4577_v47, 1  ;;  %v4584_v58 = vadd.f32 %v4583_v54, %v4582_v63 }
 0x40d   :  { %v4619_v17 = vadd.f32 %v9385_v27, %v8415_v52  ;;  %v4625_v1 = vrot.slane %v8529_v16, 2  ;;  %5817 = vrcp.f32 %v4057_v8  ;;  %v4590_v19 = vrot.slane %v4589_v13, 2 }
 0x40e   :  { %v9386_v42 = vrot.slane %v8556_v29, 4  ;;  %v4585_v51 = vrot.slane %v4584_v58, 1  ;;  %v4636_v38 = vsel %vm2905_vm3, %v9387_v6, 0.0  ;;  %v4643_v52 = vsel %vm2905_vm3, %v8550_v33, 0.0 }
 0x40f   :  { %v4620_v25 = vrot.slane %v4619_v17, 1  ;;  %v4626_v61 = vadd.f32 %v4625_v1, %v8529_v16  ;;  %v4572_v23 = vadd.f32 %v4571_v3, %v4570_v44  ;;  %v4591_v34 = vadd.f32 %v4590_v19, %v4589_v13 }
 0x410   :  { %v4631_v37 = vadd.f32 %v9386_v42, %v8556_v29  ;;  %v4637_v12 = vrot.slane %v4636_v38, 4  ;;  %v4579_v45 = vadd.f32 %v4578_v62, %v4577_v47  ;;  %v4614_v48 = vadd.f32 %v4613_v14, %v9384_v9 }
 0x411   :  { %v4627_v50 = vrot.slane %v4626_v61, 1  ;;  %v4644_v63 = vrot.slane %v4643_v52, 4  ;;  %v4586_v11 = vadd.f32 %v4585_v51, %v4584_v58  ;;  %v4592_v29 = vrot.slane %v4591_v34, 1 }
 0x412   :  { %v4632_v35 = vrot.slane %v4631_v37, 2  ;;  %v4638_v53 = vadd.f32 %v4637_v12, %v4636_v38  ;;  %v4621_v16 = vadd.f32 %v4620_v25, %v4619_v17  ;;  %v4794_v54 = vpack.c.bf16 %v8931_v36, %v8931_v36 }
 0x413   :  { %v4645_v41 = vadd.f32 %v4644_v63, %v4643_v52  ;;  %v4795_v33 = vpack.c.bf16 %v8936_v32, %v8936_v32  ;;  %v4593_v44 = vadd.f32 %v4592_v29, %v4591_v34  ;;  %v4628_v3 = vadd.f32 %v4627_v50, %v4626_v61 }
 0x414   :  { %v4633_v57 = vadd.f32 %v4632_v35, %v4631_v37  ;;  %v4639_v47 = vrot.slane %v4638_v53, 2  ;;  %v4796_v13 = vpack.c.bf16 %v8941_v30, %v8941_v30  ;;  %v4797_v9 = vpack.c.bf16 %v8943_v2, %v8943_v2 }
 0x415   :  { %v4646_v8 = vrot.slane %v4645_v41, 2  ;;  %v4798_v14 = vpack.c.bf16 %v4572_v23, %v4572_v23  ;;  %v4799_v62 = vpack.c.bf16 %v4579_v45, %v4579_v45  ;;  %v4800_v58 = vpack.c.bf16 %v4586_v11, %v4586_v11 }
 0x416   :  { %v4634_v20 = vrot.slane %v4633_v57, 1  ;;  %v4640_v17 = vadd.f32 %v4639_v47, %v4638_v53  ;;  %v4801_v1 = vpack.c.bf16 %v4593_v44, %v4593_v44  ;;  %v4802_v32 = vpack.c.bf16 %v8948_v40, %v8948_v40 }
 0x417   :  { %v4647_v36 = vadd.f32 %v4646_v8, %v4645_v41  ;;  %v4803_v19 = vpack.c.bf16 %v8953_v60, %v8953_v60  ;;  %v4804_v42 = vpack.c.bf16 %v4614_v48, %v4614_v48  ;;  %v4805_v37 = vpack.c.bf16 %v4621_v16, %v4621_v16 }
 0x418   :  { %v4635_v27 = vadd.f32 %v4634_v20, %v4633_v57  ;;  %v4641_v25 = vrot.slane %v4640_v17, 1  ;;  %v4806_v30 = vpack.c.bf16 %v4628_v3, %v4628_v3  ;;  %v4926_v2 = vunpack.c.l.b16 %v4794_v54  ;;  %v9388_v3 = vld [vmem:[#allocation57_spill] sm:$0xff] }
 0x419   :  { %v4648_v51 = vrot.slane %v4647_v36, 1  ;;  %v4927_v6 = vunpack.c.l.b16 %v4795_v33  ;;  %v5816_v38 = vpop.eup %5815  ;;  %v4928_v23 = vunpack.c.l.b16 %v4796_v13  ;;  %v4929_v34 = vunpack.c.l.b16 %v4797_v9 }
 0x41a   :  { %v4807_v61 = vpack.c.bf16 %v4635_v27, %v4635_v27  ;;  %v4642_v52 = vadd.f32 %v4641_v25, %v4640_v17  ;;  %v4930_v35 = vunpack.c.l.b16 %v4798_v14  ;;  %v5818_v12 = vpop.eup %5817  ;;  %v4183_v45 = vmul.f32 %v5816_v38, %v8885_v21  ;;  %v9390_v25 = vld [vmem:[#allocation32_spill] sm:$0xff] }
 0x41b   :  { %v4649_v40 = vadd.f32 %v4648_v51, %v4647_v36  ;;  %v4931_v50 = vunpack.c.l.b16 %v4799_v62  ;;  %v4934_v63 = vunpack.c.l.b16 %v4802_v32  ;;  %v4185_v60 = vmul.f32 %v5818_v12, %v8889_v15  ;;  %v9389_v36 = vld [vmem:[#allocation56_spill] sm:$0xff] }
 0x41c   :  { %v4808_v48 = vpack.c.bf16 %v4642_v52, %v4642_v52  ;;  %v4935_v11 = vunpack.c.l.b16 %v4803_v19  ;;  %v4936_v29 = vunpack.c.l.b16 %v4804_v42  ;;  %v4247_v57 = vmul.f32 %v8787_v56, %v4183_v45 }
 0x41d   :  { %v4809_v53 = vpack.c.bf16 %v4649_v40, %v4649_v40  ;;  %v4937_v16 = vunpack.c.l.b16 %v4805_v37  ;;  %v4938_v41 = vunpack.c.l.b16 %v4806_v30  ;;  %v4249_v54 = vmul.f32 %v8793_v59, %v4185_v60 }
 0x41e   :  { %v4939_v33 = vunpack.c.l.b16 %v4807_v61  ;;  %v4993_v44 = vsel %vm4958_vm9, %v4927_v6, %v4926_v2  ;;  %v5000_v21 = vsel %vm4958_vm9, %v4935_v11, %v4934_v63  ;;  %v4311_v20 = vmul.f32 %v4247_v57, %v9388_v3 }
 0x41f   :  { %v4932_v47 = vunpack.c.l.b16 %v4800_v58  ;;  %v4994_v15 = vsel %vm4960_vm10, %v4928_v23, %v4993_v44  ;;  %v5001_v8 = vsel %vm4960_vm10, %v4936_v29, %v5000_v21  ;;  %v4933_v13 = vunpack.c.l.b16 %v4801_v1 }
 0x420   :  { %v4940_v9 = vunpack.c.l.b16 %v4808_v48  ;;  %v4995_v56 = vsel %vm4962_vm11, %v4929_v34, %v4994_v15  ;;  %v5002_v14 = vsel %vm4962_vm11, %v4937_v16, %v5001_v8  ;;  %v4741_v59 = vsel %vm2905_vm3, %v4311_v20, 0.0 }
 0x421   :  { %v4941_v27 = vunpack.c.l.b16 %v4809_v53  ;;  %v4996_v17 = vsel %vm4964_vm12, %v4930_v35, %v4995_v56  ;;  %v5003_v62 = vsel %vm4964_vm12, %v4938_v41, %v5002_v14  ;;  %v4313_v32 = vmul.f32 %v9389_v36, %v4249_v54 }
 0x422   :  { %v4997_v58 = vsel %vm4966_vm13, %v4931_v50, %v4996_v17  ;;  %v5004_v19 = vsel %vm4966_vm13, %v4939_v33, %v5003_v62  ;;  %v4669_v1 = vrot.slane %v9390_v25, 1  ;;  %v4675_v30 = vadd.f32 %v4674_v18, %v8598_v28 }
 0x423   :  { %v4998_v42 = vsel %vm4968_vm14, %v4932_v47, %v4997_v58  ;;  %v5005_v37 = vsel %vm4968_vm14, %v4940_v9, %v5004_v19  ;;  %v4681_v51 = vrot.slane %v8625_v31, 2  ;;  %v4742_v61 = vrot.slane %v4741_v59, 4 }
 0x424   :  { %v4999_v2 = vsel %vm4970_vm2, %v4933_v13, %v4998_v42  ;;  %v5006_v6 = vsel %vm4970_vm2, %v4941_v27, %v5005_v37  ;;  %v4687_v38 = vadd.f32 %v4686_v39, %v8647_v55  ;;  %v4676_v23 = vrot.slane %v4675_v30, 1 }
 0x425   :  { %v5023_v52 = vpack.c.b16 %v5006_v6, %v4999_v2  ;;  %v4682_v34 = vadd.f32 %v4681_v51, %v8625_v31  ;;  %v4692_v35 = vsel %vm2905_vm3, %v8734_v24, 0.0  ;;  %v9391_v28 = vrot.slane %v8581_v4, 1 }
 0x426   :  { %v4688_v12 = vrot.slane %v4687_v38, 2  ;;  %v4693_v45 = vrot.slane %v4692_v35, 4  ;;  %v4699_v40 = vsel %vm2905_vm3, %v8769_v10, 0.0  ;;  %v9392_v55 = vrot.slane %v8615_v49, 1 }
 0x427   :  { %v9016_v18 = vadd.f32 %v9391_v28, %v8581_v4  ;;  %5029 = vrot.lane.b32.xlu0 %v5023_v52, %s5908_s2  ;;  %v9025_v31 = vadd.f32 %v4669_v1, %v9390_v25  ;;  %v4700_v24 = vrot.slane %v4699_v40, 4  ;;  %v9030_v4 = vadd.f32 %v4711_v22, %v8721_v26 }
 0x428   :  { %v4663_v39 = vadd.f32 %v9392_v55, %v8615_v49  ;;  %v4683_v50 = vrot.slane %v4682_v34, 1  ;;  %v4689_v63 = vadd.f32 %v4688_v12, %v4687_v38  ;;  %v4694_v60 = vadd.f32 %v4693_v45, %v4692_v35 }
 0x429   :  { %v9393_v10 = vrot.slane %v8727_v5, 2  ;;  %v4677_v11 = vadd.f32 %v4676_v23, %v4675_v30  ;;  %v4701_v29 = vadd.f32 %v4700_v24, %v4699_v40  ;;  %v4737_v49 = vrot.slane %v8922_v43, 2 }
 0x42a   :  { %v4743_v57 = vadd.f32 %v4742_v61, %v4741_v59  ;;  %v4690_v53 = vrot.slane %v4689_v63, 1  ;;  %v4695_v16 = vrot.slane %v4694_v60, 2  ;;  %v4725_v41 = vrot.slane %v8710_v7, 1 }
 0x42b   :  { %v4731_v48 = vadd.f32 %v9393_v10, %v8727_v5  ;;  %v4702_v33 = vrot.slane %v4701_v29, 2  ;;  %v4738_v26 = vadd.f32 %v4737_v49, %v8922_v43  ;;  %v4748_v44 = vsel %vm2905_vm3, %v8906_v46, 0.0 }
 0x42c   :  { %v4744_v22 = vrot.slane %v4743_v57, 2  ;;  %v4684_v21 = vadd.f32 %v4683_v50, %v4682_v34  ;;  %v4696_v3 = vadd.f32 %v4695_v16, %v4694_v60  ;;  %v9394_v5 = vrot.slane %v8771_v0, 1 }
 0x42d   :  { %v4732_v54 = vrot.slane %v4731_v48, 1  ;;  %v4749_v47 = vrot.slane %v4748_v44, 4  ;;  %v4703_v15 = vadd.f32 %v4702_v33, %v4701_v29  ;;  %v4739_v8 = vrot.slane %v4738_v26, 1 }
 0x42e   :  { %v4719_v20 = vadd.f32 %v9394_v5, %v8771_v0  ;;  %v4745_v13 = vadd.f32 %v4744_v22, %v4743_v57  ;;  %v4755_v9 = vsel %vm2905_vm3, %v4313_v32, 0.0  ;;  %v4697_v56 = vrot.slane %v4696_v3, 1 }
 0x42f   :  { %v4726_v14 = vadd.f32 %v4725_v41, %v8710_v7  ;;  %v4750_v43 = vadd.f32 %v4749_v47, %v4748_v44  ;;  %v4756_v59 = vrot.slane %v4755_v9, 4  ;;  %v4691_v27 = vadd.f32 %v4690_v53, %v4689_v63 }
 0x430   :  { %v4704_v17 = vrot.slane %v4703_v15, 1  ;;  %v4733_v46 = vadd.f32 %v4732_v54, %v4731_v48  ;;  %v4746_v62 = vrot.slane %v4745_v13, 1  ;;  %v4698_v36 = vadd.f32 %v4697_v56, %v4696_v3 }
 0x431   :  { %v4751_v58 = vrot.slane %v4750_v43, 2  ;;  %v4757_v19 = vadd.f32 %v4756_v59, %v4755_v9  ;;  %v4810_v0 = vpack.c.bf16 %v9016_v18, %v9016_v18  ;;  %v4740_v1 = vadd.f32 %v4739_v8, %v4738_v26 }
 0x432   :  { %v4705_v25 = vadd.f32 %v4704_v17, %v4703_v15  ;;  %v4811_v42 = vpack.c.bf16 %v4663_v39, %v4663_v39  ;;  %v4812_v32 = vpack.c.bf16 %v9025_v31, %v9025_v31  ;;  %v4747_v37 = vadd.f32 %v4746_v62, %v4745_v13 }
 0x433   :  { %v4752_v7 = vadd.f32 %v4751_v58, %v4750_v43  ;;  %v4758_v30 = vrot.slane %v4757_v19, 2  ;;  %v4813_v51 = vpack.c.bf16 %v4677_v11, %v4677_v11  ;;  %v4814_v61 = vpack.c.bf16 %v4684_v21, %v4684_v21 }
 0x434   :  { %v4815_v2 = vpack.c.bf16 %v4691_v27, %v4691_v27  ;;  %v4816_v6 = vpack.c.bf16 %v4698_v36, %v4698_v36  ;;  %v4817_v38 = vpack.c.bf16 %v4705_v25, %v4705_v25  ;;  %v4818_v34 = vpack.c.bf16 %v9030_v4, %v9030_v4 }
 0x435   :  { %v4753_v52 = vrot.slane %v4752_v7, 1  ;;  %v4759_v23 = vadd.f32 %v4758_v30, %v4757_v19  ;;  %v4819_v35 = vpack.c.bf16 %v4719_v20, %v4719_v20  ;;  %v4820_v28 = vpack.c.bf16 %v4726_v14, %v4726_v14 }
 0x436   :  { %v4821_v18 = vpack.c.bf16 %v4733_v46, %v4733_v46  ;;  %v4822_v12 = vpack.c.bf16 %v4740_v1, %v4740_v1  ;;  %v4943_v45 = vunpack.c.l.b16 %v4811_v42  ;;  %v4823_v39 = vpack.c.bf16 %v4747_v37, %v4747_v37 }
 0x437   :  { %v4754_v40 = vadd.f32 %v4753_v52, %v4752_v7  ;;  %v4760_v55 = vrot.slane %v4759_v23, 1  ;;  %v4942_v31 = vunpack.c.l.b16 %v4810_v0  ;;  %v4944_v24 = vunpack.c.l.b16 %v4812_v32 }
 0x438   :  { %v4945_v50 = vunpack.c.l.b16 %v4813_v51  ;;  %v4946_v63 = vunpack.c.l.b16 %v4814_v61  ;;  %v4947_v60 = vunpack.c.l.b16 %v4815_v2  ;;  %v4950_v11 = vunpack.c.l.b16 %v4818_v34 }
 0x439   :  { %v4761_v10 = vadd.f32 %v4760_v55, %v4759_v23  ;;  %v4824_v48 = vpack.c.bf16 %v4754_v40, %v4754_v40  ;;  %v4951_v29 = vunpack.c.l.b16 %v4819_v35  ;;  %v4952_v49 = vunpack.c.l.b16 %v4820_v28 }
 0x43a   :  { %v4953_v57 = vunpack.c.l.b16 %v4821_v18  ;;  %v4954_v4 = vunpack.c.l.b16 %v4822_v12  ;;  %v5007_v53 = vsel %vm4958_vm9, %v4943_v45, %v4942_v31  ;;  %v4955_v41 = vunpack.c.l.b16 %v4823_v39 }
 0x43b   :  { %v4825_v16 = vpack.c.bf16 %v4761_v10, %v4761_v10  ;;  %v5008_v54 = vsel %vm4960_vm10, %v4944_v24, %v5007_v53  ;;  %v5014_v33 = vsel %vm4958_vm9, %v4951_v29, %v4950_v11  ;;  %v4948_v26 = vunpack.c.l.b16 %v4816_v6 }
 0x43c   :  { %v5009_v22 = vsel %vm4962_vm11, %v4945_v50, %v5008_v54  ;;  %v5015_v44 = vsel %vm4960_vm10, %v4952_v49, %v5014_v33  ;;  %v4949_v21 = vunpack.c.l.b16 %v4817_v38  ;;  %v4956_v47 = vunpack.c.l.b16 %v4824_v48 }
 0x43d   :  { %v4957_v3 = vunpack.c.l.b16 %v4825_v16  ;;  %v5010_v5 = vsel %vm4964_vm12, %v4946_v63, %v5009_v22  ;;  %v5016_v20 = vsel %vm4962_vm11, %v4953_v57, %v5015_v44 }
 0x43e   :  { %v5017_v15 = vsel %vm4964_vm12, %v4954_v4, %v5016_v20  ;;  %v5011_v8 = vsel %vm4966_vm13, %v4947_v60, %v5010_v5 }
 0x43f   :  { %v5018_v13 = vsel %vm4966_vm13, %v4955_v41, %v5017_v15  ;;  %v5012_v9 = vsel %vm4968_vm14, %v4948_v26, %v5011_v8 }
 0x440   :  { %v5019_v56 = vsel %vm4968_vm14, %v4956_v47, %v5018_v13  ;;  %v5013_v14 = vsel %vm4970_vm2, %v4949_v21, %v5012_v9 }
 0x441   :  { %v5020_v43 = vsel %vm4970_vm2, %v4957_v3, %v5019_v56 }
 0x442   :  { %v5024_v59 = vpack.c.b16 %v5020_v43, %v5013_v14 }
 0x444   :  { %5031 = vrot.lane.b32.xlu1 %v5024_v59, %s5908_s2 }
 0x453   :  { %v5026_v27 = vpop.permute.xlu0 %5025 }
 0x454   :  { %5502 = vmatprep.mubr.msk.bf16.mxu1 %vm200_vm0, %v5026_v27 }
 0x477   :  { %v5028_v17 = vpop.permute.xlu1 %5027 }
 0x478   :  { %5503 = vmatmul.mubr.msk.bf16.vlgmr.msra.gmra.mxu1 %vm200_vm0, %v5028_v17 }
 0x499   :  { %v5030_v46 = vpop.permute.xlu0 %5029 }
 0x49a   :  { %5506 = vmatprep.mubr.msk.bf16.mxu1 %vm200_vm0, %v5030_v46 }
 0x4b6   :  { %v5032_v62 = vpop.permute.xlu1 %5031 }
 0x4b7   :  { %5507 = vmatmul.mubr.msk.bf16.gmra.mxu1 %vm200_vm0, %v5032_v62 }
 0x538   :  { %v5504_v36 = vpop.f32.mrf.mxu1 }
 0x539   :  { %5124 = vst.msk [vmem:[#allocation2 + $0x10] sm:$0xff] %vm200_vm0, %v5504_v36 }
 0x53a   :  { %v5091_v58 = vpop.f32.mrf.mxu1 }
 0x53b   :  { %5122 = vst.msk [vmem:[#allocation2] sm:$0xff] %vm200_vm0, %v5091_v58 }
 0x53c   :  { %v5505_v19 = vpop.f32.mrf.mxu1 }
 0x53d   :  { %5125 = vst.msk [vmem:[#allocation2 + $0x18] sm:$0xff] %vm200_vm0, %v5505_v19 }
 0x53e   :  { %v5094_v0 = vpop.f32.mrf.mxu1 }
 0x53f   :  { %5123 = vst.msk [vmem:[#allocation2 + $0x8] sm:$0xff] %vm200_vm0, %v5094_v0 }
 0x577   :  { %v5508_v25 = vpop.f32.mrf.mxu1 }
 0x578   :  { %5128 = vst.msk [vmem:[#allocation2 + $0x30] sm:$0xff] %vm200_vm0, %v5508_v25 }
 0x579   :  { %v5107_v1 = vpop.f32.mrf.mxu1 }
 0x57a   :  { %5126 = vst.msk [vmem:[#allocation2 + $0x20] sm:$0xff] %vm200_vm0, %v5107_v1 }
 0x57b   :  { %v5509_v42 = vpop.f32.mrf.mxu1 }
 0x57c   :  { %5129 = vst.msk [vmem:[#allocation2 + $0x38] sm:$0xff] %vm200_vm0, %v5509_v42 }
 0x57d   :  { %v5110_v32 = vpop.f32.mrf.mxu1 }
 0x57e   :  { %5127 = vst.msk [vmem:[#allocation2 + $0x28] sm:$0xff] %vm200_vm0, %v5110_v32 }
 0x57f   :  { %5894 = shalt.err (!%p5891_p4)
}
 0x580   :  { %s5910_s22 = smov 128   ;;  %s5911_s23 = smov 8  }
 0x581   :  { %5141 = dma.vmem_to_hbm [thread:$0]  %s5136_s21, 1024, %s9088_s7, [#allocation3], %s5910_s22, %s5910_s22, %s5911_s23  }
 0x582   :  { %5903 = dma.done.wait [#allocation3], 1024  }
 0x583   :  { %5904 = vsyncadd [#allocation3], 4294966272 }
 0x584   :  { %5145 = vsyncpa [#allocation3], 1 }

</bundles_post_ra>
